<compile_context>
chip_gen: v5e
topology: v5e:2x2
jax: 0.10.0
libtpu: 0.0.40
codegen_flags: <defaults>
</compile_context>

<pallas_src>
import functools

import jax
import jax.numpy as jnp
from jax.experimental import pallas as pl
from jax.experimental.pallas import tpu as pltpu


# ----------------------------- config (synthetic) -----------------------------
class _Obj:
    pass


def make_config(image_size=4, h_dim=32, n_hidden_layers=2, nonlinearity="swish"):
    cfg = _Obj()
    cfg.data = _Obj()
    cfg.data.image_size = image_size
    cfg.model = _Obj()
    cfg.model.h_dim = h_dim
    cfg.model.n_hidden_layers = n_hidden_layers
    cfg.model.nonlinearity = nonlinearity
    return cfg


def _act(h, name):
    name = name.lower()
    if name == "elu":
        return jnp.where(h > 0, h, jnp.expm1(h))
    if name == "relu":
        return jnp.maximum(h, 0.0)
    if name == "lrelu":
        return jnp.where(h > 0, h, 0.2 * h)
    if name == "swish":
        return h * jax.nn.sigmoid(h)
    if name == "tanh":
        return jnp.tanh(h)
    raise NotImplementedError("activation function does not exist!")


# --------------------------------- kernel -------------------------------------
def _mlp_kernel(x_ref, t_ref, *refs, n_hidden, act_name):
    """refs = (w0x, w0t, b0, [w_i, b_i]*n_hidden, w_last, b_last, out_ref).

    w0x (in_dim, Hp) bf16, w0t (1, Hp) f32, b_i (1, Hp) f32, w_i (Hp, Hp) bf16,
    w_last (8, Hp) bf16 (row 0 = final weight, rows 1..7 zero),
    b_last (1, 1) f32, out_ref (1, bm) f32 (batch along lanes).
    """
    out_ref = refs[-1]
    w_last_ref, b_last_ref = refs[-3], refs[-2]
    w0x_ref, w0t_ref, b0_ref = refs[0], refs[1], refs[2]

    # ---- layer 0: fused concat([x, t]) @ W0 + b0 (t-row handled on the VPU) --
    h = jnp.dot(x_ref[...].astype(jnp.bfloat16), w0x_ref[...],
                preferred_element_type=jnp.float32)
    h = h + t_ref[...] * w0t_ref[...] + b0_ref[...]
    h = _act(h, act_name)

    # ---- hidden layers (bf16 MXU matmuls, f32 accumulation) ------------------
    for li in range(n_hidden):
        w = refs[3 + 2 * li][...]
        b = refs[4 + 2 * li][...]
        h = jnp.dot(h.astype(jnp.bfloat16), w,
                    preferred_element_type=jnp.float32) + b
        h = _act(h, act_name)

    # ---- final Linear(h_dim, 1): one (8,Hp)@(Hp,bm) MXU pass ------------------
    # Row 0 of w_last holds the weight vector; the transposed activations put
    # the batch along lanes, so the result row is stored lane-dense (no 128x
    # write amplification, no masked 1-lane stores).
    r = jnp.dot(w_last_ref[...], h.astype(jnp.bfloat16).T,
                preferred_element_type=jnp.float32)          # (8, bm)
    out_ref[...] = r[0:1, :] + b_last_ref[...]               # (1, bm)


# -------------------------------- wrapper --------------------------------------
def _round_up(n, m):
    return ((n + m - 1) // m) * m


def _pad2(a, shape, dtype):
    a = a.astype(dtype)
    pads = [(0, s - d) for d, s in zip(a.shape, shape)]
    if any(p[1] for p in pads):
        a = jnp.pad(a, pads)
    return a


@functools.partial(jax.jit, static_argnames=("act_name", "bm"))
def ncsn_mlp_forward(x, t, params, *, act_name="swish", bm=256):
    """
    x : (B, in_dim) float32
    t : (B,)        float32
    params: list of (W, b) with W shape (in, out), b shape (out,)
            (torch.nn.Linear weights, pre-transposed so y = x @ W + b)
    returns: (B, 1) float32
    """
    B, in_dim = x.shape
    n_hidden = len(params) - 2
    h_dim = params[0][0].shape[1]
    Hp = _round_up(h_dim, 128)       # lane-pad hidden width (exact: act(0) == 0)
    bm = min(bm, _round_up(B, 8))    # don't over-pad tiny batches
    Bp = _round_up(B, bm)            # batch-pad so the grid tiles evenly

    x = x.astype(jnp.float32)
    t = t.astype(jnp.float32)
    if Bp != B:
        x = jnp.pad(x, ((0, Bp - B), (0, 0)))
        t = jnp.pad(t, ((0, Bp - B),))
    t2 = t.reshape(Bp, 1)

    # ---- weight preprocessing (tiny): split/pad, bf16 for MXU operands -------
    W0, b0 = params[0]
    ops = [
        _pad2(W0[:in_dim], (in_dim, Hp), jnp.bfloat16),       # W0, x rows
        _pad2(W0[in_dim:in_dim + 1], (1, Hp), jnp.float32),   # W0, t row
        _pad2(b0.reshape(1, -1), (1, Hp), jnp.float32),
    ]
    for (W, b) in params[1:-1]:
        ops.append(_pad2(W, (Hp, Hp), jnp.bfloat16))
        ops.append(_pad2(b.reshape(1, -1), (1, Hp), jnp.float32))
    W_last, b_last = params[-1]                               # (h_dim, 1), (1,)
    ops.append(_pad2(W_last.reshape(1, h_dim), (8, Hp), jnp.bfloat16))
    ops.append(b_last.reshape(1, 1).astype(jnp.float32))

    in_specs = [
        pl.BlockSpec((bm, in_dim), lambda i: (i, 0)),   # x: batch-tiled
        pl.BlockSpec((bm, 1), lambda i: (i, 0)),        # t: batch-tiled
    ]
    for op in ops:                                       # weights: VMEM-resident
        in_specs.append(pl.BlockSpec(op.shape, lambda i: (0, 0)))

    kernel = functools.partial(_mlp_kernel, n_hidden=n_hidden, act_name=act_name)

    out = pl.pallas_call(
        kernel,
        out_shape=jax.ShapeDtypeStruct((1, Bp), jnp.float32),   # batch on lanes
        grid=(Bp // bm,),
        in_specs=in_specs,
        out_specs=pl.BlockSpec((1, bm), lambda i: (0, i)),
        compiler_params=pltpu.CompilerParams(
            dimension_semantics=("parallel",)),
    )(x, t2, *ops)

    return out.reshape(Bp, 1)[:B]


# ------------------------- deterministic param init ----------------------------
def init_params(key, config):
    in_dim = config.data.image_size * config.data.image_size
    h_dim = config.model.h_dim
    dims = [in_dim + 1] + [h_dim] * (config.model.n_hidden_layers + 1) + [1]
    params = []
    for li in range(len(dims) - 1):
        fan_in, fan_out = dims[li], dims[li + 1]
        key, kw, kb = jax.random.split(key, 3)
        bound = 1.0 / jnp.sqrt(fan_in)  # matches torch.nn.Linear default init
        w = jax.random.uniform(kw, (fan_in, fan_out), jnp.float32, -bound, bound)
        b = jax.random.uniform(kb, (fan_out,), jnp.float32, -bound, bound)
        params.append((w, b))
    return params


# --------------------------- pure-JAX reference ---------------------------------
def ncsn_mlp_ref(x, t, params, act_name="swish", mimic_bf16=True):
    """Pure-JAX reference. mimic_bf16=True rounds matmul operands to bf16
    (with f32 accumulation) to mirror the kernel's MXU numerics."""
    def q(a):
        return a.astype(jnp.bfloat16).astype(jnp.float32) if mimic_bf16 else a

    in_dim = x.shape[1]
    n = len(params)
    h = x
    for li, (w, b) in enumerate(params):
        if li == 0:
            h = q(x) @ q(w[:in_dim]) + t[:, None] * w[in_dim] + b
        elif li < n - 1:
            h = q(h) @ q(w) + b
        else:
            return q(h) @ q(w) + b      # final layer: bf16 operands, f32 accum
        h = _act(h, act_name)
    return h


# ----------------------------------- main ---------------------------------------
if __name__ == "__main__":
    config = make_config(image_size=4, h_dim=32, n_hidden_layers=2,
                         nonlinearity="swish")
    in_dim = config.data.image_size * config.data.image_size  # 16

    key = jax.random.PRNGKey(0)
    kx, kt, kp = jax.random.split(key, 3)

    B = 512  # two 256-row batch tiles -> parallel grid of 2 (keeps both v7x TCs busy)
    x = jax.random.normal(kx, (B, in_dim), jnp.float32)
    t = jax.random.uniform(kt, (B,), jnp.float32)
    params = init_params(kp, config)

    out = ncsn_mlp_forward(x, t, params, act_name=config.model.nonlinearity)
    out = jax.block_until_ready(out)

    ref = ncsn_mlp_ref(x, t, params, act_name=config.model.nonlinearity)
    assert out.shape == (B, 1)
    err = float(jnp.max(jnp.abs(out - ref)))
    assert err < 5e-4, f"mismatch vs JAX reference (max abs err {err})"

    print("KERNEL_OK")
</pallas_src>

<mosaic_0001>
module attributes {stable_mosaic.version = 11 : i64} {
  func.func @_mlp_kernel(%arg0: i32, %arg1: memref<256x16xf32, #tpu.memory_space<vmem>>, %arg2: memref<256x1xf32, #tpu.memory_space<vmem>>, %arg3: memref<16x128xbf16, #tpu.memory_space<vmem>>, %arg4: memref<1x128xf32, #tpu.memory_space<vmem>>, %arg5: memref<1x128xf32, #tpu.memory_space<vmem>>, %arg6: memref<128x128xbf16, #tpu.memory_space<vmem>>, %arg7: memref<1x128xf32, #tpu.memory_space<vmem>>, %arg8: memref<128x128xbf16, #tpu.memory_space<vmem>>, %arg9: memref<1x128xf32, #tpu.memory_space<vmem>>, %arg10: memref<8x128xbf16, #tpu.memory_space<vmem>>, %arg11: memref<1x1xf32, #tpu.memory_space<vmem>>, %arg12: memref<1x256xf32, #tpu.memory_space<vmem>>) attributes {dimension_semantics = [#tpu.dimension_semantics<parallel>], iteration_bounds = array<i64: 2>, scalar_prefetch = 0 : i64, scratch_operands = 0 : i64, tpu.core_type = #tpu.core_type<tc>, window_params = [{transform_indices = @transform_0, window_bounds = array<i64: 256, 16>}, {transform_indices = @transform_1, window_bounds = array<i64: 256, 1>}, {pipeline_mode = #tpu.pipeline_mode<synchronous>, transform_indices = @transform_2, window_bounds = array<i64: 16, 128>}, {pipeline_mode = #tpu.pipeline_mode<synchronous>, transform_indices = @transform_3, window_bounds = array<i64: 1, 128>}, {pipeline_mode = #tpu.pipeline_mode<synchronous>, transform_indices = @transform_4, window_bounds = array<i64: 1, 128>}, {pipeline_mode = #tpu.pipeline_mode<synchronous>, transform_indices = @transform_5, window_bounds = array<i64: 128, 128>}, {pipeline_mode = #tpu.pipeline_mode<synchronous>, transform_indices = @transform_6, window_bounds = array<i64: 1, 128>}, {pipeline_mode = #tpu.pipeline_mode<synchronous>, transform_indices = @transform_7, window_bounds = array<i64: 128, 128>}, {pipeline_mode = #tpu.pipeline_mode<synchronous>, transform_indices = @transform_8, window_bounds = array<i64: 1, 128>}, {pipeline_mode = #tpu.pipeline_mode<synchronous>, transform_indices = @transform_9, window_bounds = array<i64: 8, 128>}, {pipeline_mode = #tpu.pipeline_mode<synchronous>, transform_indices = @transform_10, window_bounds = array<i64: 1, 1>}, {transform_indices = @transform_11, window_bounds = array<i64: 1, 256>}]} {
    %c0 = arith.constant 0 : index
    %c0_0 = arith.constant 0 : index
    %0 = vector.load %arg1[%c0, %c0_0] : memref<256x16xf32, #tpu.memory_space<vmem>>, vector<256x16xf32>
    %1 = arith.truncf %0 : vector<256x16xf32> to vector<256x16xbf16>
    %c0_1 = arith.constant 0 : index
    %c0_2 = arith.constant 0 : index
    %2 = vector.load %arg3[%c0_1, %c0_2] : memref<16x128xbf16, #tpu.memory_space<vmem>>, vector<16x128xbf16>
    %cst = arith.constant dense<0.000000e+00> : vector<256x128xf32>
    %3 = tpu.matmul %1, %2, %cst {dimension_numbers = #tpu.dot_dimension_numbers<[1], [0], [0], [1], [0, 0, 1, 1], [], []>} : vector<256x16xbf16>, vector<16x128xbf16>, vector<256x128xf32> -> vector<256x128xf32>
    %c0_3 = arith.constant 0 : index
    %c0_4 = arith.constant 0 : index
    %4 = vector.load %arg2[%c0_3, %c0_4] : memref<256x1xf32, #tpu.memory_space<vmem>>, vector<256x1xf32>
    %c0_5 = arith.constant 0 : index
    %c0_6 = arith.constant 0 : index
    %5 = vector.load %arg4[%c0_5, %c0_6] : memref<1x128xf32, #tpu.memory_space<vmem>>, vector<1x128xf32>
    %6 = vector.broadcast %4 : vector<256x1xf32> to vector<256x128xf32>
    %7 = vector.broadcast %5 : vector<1x128xf32> to vector<256x128xf32>
    %8 = arith.mulf %6, %7 : vector<256x128xf32>
    %9 = arith.addf %3, %8 : vector<256x128xf32>
    %c0_7 = arith.constant 0 : index
    %c0_8 = arith.constant 0 : index
    %10 = vector.load %arg5[%c0_7, %c0_8] : memref<1x128xf32, #tpu.memory_space<vmem>>, vector<1x128xf32>
    %11 = vector.broadcast %10 : vector<1x128xf32> to vector<256x128xf32>
    %12 = arith.addf %9, %11 : vector<256x128xf32>
    %13 = arith.negf %12 : vector<256x128xf32>
    %14 = math.exp %13 : vector<256x128xf32>
    %cst_9 = arith.constant 1.000000e+00 : f32
    %15 = vector.broadcast %cst_9 : f32 to vector<256x128xf32>
    %16 = arith.addf %15, %14 : vector<256x128xf32>
    %17 = arith.divf %15, %16 : vector<256x128xf32>
    %18 = arith.mulf %12, %17 : vector<256x128xf32>
    %c0_10 = arith.constant 0 : index
    %c0_11 = arith.constant 0 : index
    %19 = vector.load %arg6[%c0_10, %c0_11] : memref<128x128xbf16, #tpu.memory_space<vmem>>, vector<128x128xbf16>
    %c0_12 = arith.constant 0 : index
    %c0_13 = arith.constant 0 : index
    %20 = vector.load %arg7[%c0_12, %c0_13] : memref<1x128xf32, #tpu.memory_space<vmem>>, vector<1x128xf32>
    %21 = arith.truncf %18 : vector<256x128xf32> to vector<256x128xbf16>
    %cst_14 = arith.constant dense<0.000000e+00> : vector<256x128xf32>
    %22 = tpu.matmul %21, %19, %cst_14 {dimension_numbers = #tpu.dot_dimension_numbers<[1], [0], [0], [1], [0, 0, 1, 1], [], []>} : vector<256x128xbf16>, vector<128x128xbf16>, vector<256x128xf32> -> vector<256x128xf32>
    %23 = vector.broadcast %20 : vector<1x128xf32> to vector<256x128xf32>
    %24 = arith.addf %22, %23 : vector<256x128xf32>
    %25 = arith.negf %24 : vector<256x128xf32>
    %26 = math.exp %25 : vector<256x128xf32>
    %cst_15 = arith.constant 1.000000e+00 : f32
    %27 = vector.broadcast %cst_15 : f32 to vector<256x128xf32>
    %28 = arith.addf %27, %26 : vector<256x128xf32>
    %29 = arith.divf %27, %28 : vector<256x128xf32>
    %30 = arith.mulf %24, %29 : vector<256x128xf32>
    %c0_16 = arith.constant 0 : index
    %c0_17 = arith.constant 0 : index
    %31 = vector.load %arg8[%c0_16, %c0_17] : memref<128x128xbf16, #tpu.memory_space<vmem>>, vector<128x128xbf16>
    %c0_18 = arith.constant 0 : index
    %c0_19 = arith.constant 0 : index
    %32 = vector.load %arg9[%c0_18, %c0_19] : memref<1x128xf32, #tpu.memory_space<vmem>>, vector<1x128xf32>
    %33 = arith.truncf %30 : vector<256x128xf32> to vector<256x128xbf16>
    %cst_20 = arith.constant dense<0.000000e+00> : vector<256x128xf32>
    %34 = tpu.matmul %33, %31, %cst_20 {dimension_numbers = #tpu.dot_dimension_numbers<[1], [0], [0], [1], [0, 0, 1, 1], [], []>} : vector<256x128xbf16>, vector<128x128xbf16>, vector<256x128xf32> -> vector<256x128xf32>
    %35 = vector.broadcast %32 : vector<1x128xf32> to vector<256x128xf32>
    %36 = arith.addf %34, %35 : vector<256x128xf32>
    %37 = arith.negf %36 : vector<256x128xf32>
    %38 = math.exp %37 : vector<256x128xf32>
    %cst_21 = arith.constant 1.000000e+00 : f32
    %39 = vector.broadcast %cst_21 : f32 to vector<256x128xf32>
    %40 = arith.addf %39, %38 : vector<256x128xf32>
    %41 = arith.divf %39, %40 : vector<256x128xf32>
    %42 = arith.mulf %36, %41 : vector<256x128xf32>
    %c0_22 = arith.constant 0 : index
    %c0_23 = arith.constant 0 : index
    %43 = vector.load %arg10[%c0_22, %c0_23] : memref<8x128xbf16, #tpu.memory_space<vmem>>, vector<8x128xbf16>
    %44 = arith.truncf %42 : vector<256x128xf32> to vector<256x128xbf16>
    %45 = tpu.transpose %44, [1, 0] : vector<256x128xbf16> -> vector<128x256xbf16>
    %cst_24 = arith.constant dense<0.000000e+00> : vector<8x256xf32>
    %46 = tpu.matmul %43, %45, %cst_24 {dimension_numbers = #tpu.dot_dimension_numbers<[1], [0], [0], [1], [0, 0, 1, 1], [], []>} : vector<8x128xbf16>, vector<128x256xbf16>, vector<8x256xf32> -> vector<8x256xf32>
    %47 = vector.extract_strided_slice %46 {offsets = [0, 0], sizes = [1, 256], strides = [1, 1]} : vector<8x256xf32> to vector<1x256xf32>
    %c0_25 = arith.constant 0 : index
    %c0_26 = arith.constant 0 : index
    %48 = vector.load %arg11[%c0_25, %c0_26] : memref<1x1xf32, #tpu.memory_space<vmem>>, vector<1x1xf32>
    %49 = vector.broadcast %48 : vector<1x1xf32> to vector<1x256xf32>
    %50 = arith.addf %47, %49 : vector<1x256xf32>
    %c0_27 = arith.constant 0 : index
    %c0_28 = arith.constant 0 : index
    %51 = vector.load %arg12[%c0_27, %c0_28] : memref<1x256xf32, #tpu.memory_space<vmem>>, vector<1x256xf32>
    tpu.vector_store %arg12[%c0_27, %c0_28], %50 {strides = array<i32>} : memref<1x256xf32, #tpu.memory_space<vmem>>, vector<1x256xf32>,
    return
  }
  func.func @transform_0(%arg0: i32) -> (i32, i32) {
    %c0_i32 = arith.constant 0 : i32
    %c0_i32_0 = arith.constant 0 : i32
    return %arg0, %c0_i32 : i32, i32
  }
  func.func @transform_1(%arg0: i32) -> (i32, i32) {
    %c0_i32 = arith.constant 0 : i32
    %c0_i32_0 = arith.constant 0 : i32
    return %arg0, %c0_i32 : i32, i32
  }
  func.func @transform_2(%arg0: i32) -> (i32, i32) {
    %c0_i32 = arith.constant 0 : i32
    %c0_i32_0 = arith.constant 0 : i32
    %c0_i32_1 = arith.constant 0 : i32
    return %c0_i32, %c0_i32_0 : i32, i32
  }
  func.func @transform_3(%arg0: i32) -> (i32, i32) {
    %c0_i32 = arith.constant 0 : i32
    %c0_i32_0 = arith.constant 0 : i32
    %c0_i32_1 = arith.constant 0 : i32
    return %c0_i32, %c0_i32_0 : i32, i32
  }
  func.func @transform_4(%arg0: i32) -> (i32, i32) {
    %c0_i32 = arith.constant 0 : i32
    %c0_i32_0 = arith.constant 0 : i32
    %c0_i32_1 = arith.constant 0 : i32
    return %c0_i32, %c0_i32_0 : i32, i32
  }
  func.func @transform_5(%arg0: i32) -> (i32, i32) {
    %c0_i32 = arith.constant 0 : i32
    %c0_i32_0 = arith.constant 0 : i32
    %c0_i32_1 = arith.constant 0 : i32
    return %c0_i32, %c0_i32_0 : i32, i32
  }
  func.func @transform_6(%arg0: i32) -> (i32, i32) {
    %c0_i32 = arith.constant 0 : i32
    %c0_i32_0 = arith.constant 0 : i32
    %c0_i32_1 = arith.constant 0 : i32
    return %c0_i32, %c0_i32_0 : i32, i32
  }
  func.func @transform_7(%arg0: i32) -> (i32, i32) {
    %c0_i32 = arith.constant 0 : i32
    %c0_i32_0 = arith.constant 0 : i32
    %c0_i32_1 = arith.constant 0 : i32
    return %c0_i32, %c0_i32_0 : i32, i32
  }
  func.func @transform_8(%arg0: i32) -> (i32, i32) {
    %c0_i32 = arith.constant 0 : i32
    %c0_i32_0 = arith.constant 0 : i32
    %c0_i32_1 = arith.constant 0 : i32
    return %c0_i32, %c0_i32_0 : i32, i32
  }
  func.func @transform_9(%arg0: i32) -> (i32, i32) {
    %c0_i32 = arith.constant 0 : i32
    %c0_i32_0 = arith.constant 0 : i32
    %c0_i32_1 = arith.constant 0 : i32
    return %c0_i32, %c0_i32_0 : i32, i32
  }
  func.func @transform_10(%arg0: i32) -> (i32, i32) {
    %c0_i32 = arith.constant 0 : i32
    %c0_i32_0 = arith.constant 0 : i32
    %c0_i32_1 = arith.constant 0 : i32
    return %c0_i32, %c0_i32_0 : i32, i32
  }
  func.func @transform_11(%arg0: i32) -> (i32, i32) {
    %c0_i32 = arith.constant 0 : i32
    %c0_i32_0 = arith.constant 0 : i32
    return %c0_i32, %arg0 : i32, i32
  }
}

</mosaic_0001>

<bundles_post_ra>
// kernel: ncsn_mlp_forward.1
= control target key start
LH: loop header
LB: loop body
LE: loop exit
PB: predicated region body
PF: predicated region fallthrough
CT: control target
= control target key end

     0   :  { %s6619_s0 = inlined_call_operand.vmem [shape: f32[512,16], index: 0, kind: input, shape index: {}]   ;;  %s6620_s1 = inlined_call_operand.vmem [shape: f32[512,1], index: 1, kind: input, shape index: {}]   ;;  %s6621_s2 = inlined_call_operand.vmem [shape: bf16[16,128], index: 2, kind: input, shape index: {}]   ;;  %s6622_s3 = inlined_call_operand.vmem [shape: f32[1,128], index: 3, kind: input, shape index: {}]   ;;  %s6623_s4 = inlined_call_operand.vmem [shape: f32[1,128], index: 4, kind: input, shape index: {}]   ;;  %s6624_s5 = inlined_call_operand.vmem [shape: bf16[128,128], index: 5, kind: input, shape index: {}]   ;;  %s6625_s6 = inlined_call_operand.vmem [shape: f32[1,128], index: 6, kind: input, shape index: {}]   ;;  %s6626_s7 = inlined_call_operand.vmem [shape: bf16[128,128], index: 7, kind: input, shape index: {}]   ;;  %s6627_s8 = inlined_call_operand.vmem [shape: f32[1,128], index: 8, kind: input, shape index: {}]   ;;  %s6628_s9 = inlined_call_operand.vmem [shape: bf16[8,128], index: 9, kind: input, shape index: {}]   ;;  %s6629_s10 = inlined_call_operand.<no memory space> [shape: f32[1,1], index: 10, kind: input, shape index: {}]   ;;  %s6630_s11 = inlined_call_operand.hbm [shape: f32[1,512], index: 11, kind: output, shape index: {}]  }
   0x1   :  { %v16_v0 = vstv %s6629_s10 }
   0x2   :  { %17 = vst [vmem:[#allocation2] sm:$0x1] %v16_v0 }
   0x3   :  { %18 = vsyncpa [#allocation4], 0 }
   0x4   :  { %20 = vsyncpa [#allocation4 + $0x1], 0  ;;  %s4061_s19 = smov 0   ;;  %s4063_s20 = smov 0  }
   0x5   :  { %s4065_s21 = smov 0   ;;  %s4067_s22 = smov 0  }
   0x6 LB: > { %s4082_s10 = sadd.s32 4294967295, %s3995_s22   ;;  %s3287_s23 = sadd.s32 4294967294, %s3995_s22   ;;  %s3995_s22 = sphi %s4067_s22, %s6770_s22   ;;  %s3991_s21 = sphi %s4065_s21, %s6769_s21   ;;  %s3987_s20 = sphi %s4063_s20, %s6768_s20   ;;  %s3983_s19 = sphi %s4061_s19, %s6767_s19  }
   0x7   : > { %s4086_s24 = sadd.s32 1, %s3995_s22   ;;  %s274_s25 = sadd.s32 1, %s3991_s21 }
   0x8   : > { %s271_s26 = ssub.s32 %s3995_s22, %s4086_s24  ;;  %p284_p0 = scmp.ne.s32.totalorder %s3991_s21, %s3987_s20 }
   0x9   : > { %p272_p1 = scmp.eq.s32.totalorder %s271_s26, 0  ;;  %p285_p2 = scmp.eq.s32.totalorder %s4082_s10, 1 }
   0xa   : > { %p290_p3 = scmp.ne.s32.totalorder %s3987_s20, %s3983_s19  ;;  %p291_p4 = scmp.eq.s32.totalorder %s3287_s23, 1 }
   0xb   : > { %s4097_s27 = scalar_select %p272_p1, %s3991_s21, %s274_s25  }
   0xc   : > { %p4099_p5 = por %p285_p2, %p284_p0  ;;  %p4103_p6 = por %p291_p4, %p290_p3 }
   0xd   : > { %p3290_p7 = scmp.ge.s32.totalorder %s3995_s22, 1  ;;  %p354_p8 = scmp.lt.s32.totalorder %s3995_s22, 3 }
   0xf   : > { %p355_p9 = pnand %p3290_p7, %p354_p8 }
  0x10   : > { %s3292_s13 = sshll.u32 (!%p355_p9), %s4082_s10, 5  ;;  %s396_s23 = sand.u32 (!%p355_p9), 1, %s3987_s20  }
  0x11   : > { %358 = sbr.rel (%p355_p9) target bundleno = 1007 (0x3ef), region = 64  ;;  %p400_p10 = scmp.lt.s32.totalorder (!%p355_p9), %s3292_s13, 63 }
  0x12   : > { %s3477_s26 = sshll.u32 (!%p355_p9), %s4082_s10, 1  ;;  %s3201_s10 = scalar_lea.sflag (!%p355_p9), [#allocation4], %s396_s23 }
  0x13   : > { %s3953_s30 = scalar_lea.hbm (!%p355_p9), %s6630_s11, 4 }
  0x16   : > { %v3480_v1 = vld [vmem:[%s6621_s2] sm:$0xff]  ;;  %v3997_v2 = vmov 0   ;;  %s6772_s13 = smov (!%p400_p10, %s3292_s13), 63  ;;  %vm697_vm0 = vcmask 130048   ;;  %v3488_v59 = vld [vmem:[%s6624_s5 + $0x38] sm:$0xff]  ;;  %v3487_v61 = vld [vmem:[%s6624_s5 + $0x30] sm:$0xff] }
  0x17   : > { %3539 = vset.pattern.permute.xlu2 %v3997_v2  ;;  %3538 = vset.pattern.permute.xlu1 %v3997_v2  ;;  %s3293_s14 = sshll.u32 %s6772_s13, 3  ;;  %v3180_v50 = vld [vmem:[#allocation2] sm:$0x1]  ;;  %v3486_v62 = vld [vmem:[%s6624_s5 + $0x28] sm:$0xff]  ;;  %s3211_s13 = scalar_lea.hbm %s6630_s11, %s3477_s26 }
  0x18   : > { %3537 = vset.pattern.permute.xlu0 %v3997_v2  ;;  %753 = vmatpush.bf16.msra.mxu0 %v3480_v1  ;;  %s4116_s17 = scalar_lea.vmem %s6620_s1, %s3293_s14  ;;  %s4121_s25 = scalar_lea.vmem %s6619_s0, %s3293_s14  ;;  %v3485_v63 = vld [vmem:[%s6624_s5 + $0x20] sm:$0xff] }
  0x19   : > { %v467_v3 = vld [vmem:[%s4116_s17 + $0x20] sm:$0xff]  ;;  %v465_v4 = vld [vmem:[%s4116_s17 + $0x10] sm:$0xff]  ;;  %v414_v7 = vld [vmem:[%s4121_s25 + $0x8] sm:$0xff]  ;;  %1595 = vmatpush.bf16.msra.mxu1 %v3488_v59  ;;  %s3215_s16 = sshll.u32 %s3211_s13, 4  ;;  %s3216_s16 = int_to_ptr.hbm [resolvable:$true] %s3215_s16 }
  0x1a   : > { %v463_v5 = vld [vmem:[%s4116_s17] sm:$0xff]  ;;  %518 = vperm.xlu2 %3539, %v467_v3   ;;  %508 = vperm.xlu1 %3538, %v465_v4   ;;  %v468_v9 = vld [vmem:[%s4116_s17 + $0x28] sm:$0xff]  ;;  %v466_v10 = vld [vmem:[%s4116_s17 + $0x18] sm:$0xff] }
  0x1b   : > { %v413_v6 = vld [vmem:[%s4121_s25] sm:$0xff]  ;;  %498 = vperm.xlu0 %3537, %v463_v5   ;;  %v464_v11 = vld [vmem:[%s4116_s17 + $0x8] sm:$0xff]  ;;  %v415_v12 = vld [vmem:[%s4121_s25 + $0x10] sm:$0xff] }
  0x1c   : > { %v445_v8 = vpack.c.bf16 %v414_v7, %v413_v6  ;;  %v416_v13 = vld [vmem:[%s4121_s25 + $0x18] sm:$0xff]  ;;  %v471_v14 = vld [vmem:[%s4116_s17 + $0x40] sm:$0xff]  ;;  %v469_v16 = vld [vmem:[%s4116_s17 + $0x30] sm:$0xff] }
  0x1d   : > { %v470_v15 = vld [vmem:[%s4116_s17 + $0x38] sm:$0xff]  ;;  %v446_v17 = vpack.c.bf16 %v416_v13, %v415_v12  ;;  %v473_v19 = vld [vmem:[%s4116_s17 + $0x50] sm:$0xff]  ;;  %v472_v20 = vld [vmem:[%s4116_s17 + $0x48] sm:$0xff]  ;;  %1596 = vmatpush.bf16.msra.mxu1 %v3487_v61 }
  0x1e   : > { %3300 = vmatmul.msk.bf16.vlgmr.msra.gmra.mxu0 %vm697_vm0, %v445_v8  ;;  %v474_v18 = vld [vmem:[%s4116_s17 + $0x58] sm:$0xff]  ;;  %v417_v21 = vld [vmem:[%s4121_s25 + $0x20] sm:$0xff]  ;;  %v418_v22 = vld [vmem:[%s4121_s25 + $0x28] sm:$0xff] }
  0x1f   : > { %v477_v23 = vld [vmem:[%s4116_s17 + $0x70] sm:$0xff]  ;;  %v476_v24 = vld [vmem:[%s4116_s17 + $0x68] sm:$0xff]  ;;  %v475_v25 = vld [vmem:[%s4116_s17 + $0x60] sm:$0xff]  ;;  %v447_v26 = vpack.c.bf16 %v418_v22, %v417_v21 }
  0x20   : > { %v480_v27 = vld [vmem:[%s4116_s17 + $0x88] sm:$0xff]  ;;  %v479_v28 = vld [vmem:[%s4116_s17 + $0x80] sm:$0xff]  ;;  %v478_v29 = vld [vmem:[%s4116_s17 + $0x78] sm:$0xff] }
  0x21   : > { %v419_v30 = vld [vmem:[%s4121_s25 + $0x30] sm:$0xff]  ;;  %v420_v31 = vld [vmem:[%s4121_s25 + $0x38] sm:$0xff]  ;;  %v483_v32 = vld [vmem:[%s4116_s17 + $0xa0] sm:$0xff]  ;;  %1597 = vmatpush.bf16.msra.mxu1 %v3486_v62 }
  0x22   : > { %523 = vperm.xlu2 %3539, %v468_v9   ;;  %513 = vperm.xlu1 %3538, %v466_v10   ;;  %v482_v33 = vld [vmem:[%s4116_s17 + $0x98] sm:$0xff]  ;;  %v481_v34 = vld [vmem:[%s4116_s17 + $0x90] sm:$0xff]  ;;  %v448_v35 = vpack.c.bf16 %v420_v31, %v419_v30  ;;  %v484_v38 = vld [vmem:[%s4116_s17 + $0xa8] sm:$0xff] }
  0x23   : > { %503 = vperm.xlu0 %3537, %v464_v11   ;;  %v486_v36 = vld [vmem:[%s4116_s17 + $0xb8] sm:$0xff]  ;;  %v485_v37 = vld [vmem:[%s4116_s17 + $0xb0] sm:$0xff]  ;;  %v421_v39 = vld [vmem:[%s4121_s25 + $0x40] sm:$0xff] }
  0x24   : > { %v422_v40 = vld [vmem:[%s4121_s25 + $0x48] sm:$0xff]  ;;  %v489_v41 = vld [vmem:[%s4116_s17 + $0xd0] sm:$0xff]  ;;  %v487_v43 = vld [vmem:[%s4116_s17 + $0xc0] sm:$0xff] }
  0x25   : > { %v488_v42 = vld [vmem:[%s4116_s17 + $0xc8] sm:$0xff]  ;;  %v449_v44 = vpack.c.bf16 %v422_v40, %v421_v39  ;;  %v491_v46 = vld [vmem:[%s4116_s17 + $0xe0] sm:$0xff]  ;;  %v490_v47 = vld [vmem:[%s4116_s17 + $0xd8] sm:$0xff]  ;;  %1598 = vmatpush.bf16.msra.mxu1 %v3485_v63 }
  0x26   : > { %v492_v45 = vld [vmem:[%s4116_s17 + $0xe8] sm:$0xff]  ;;  %v423_v48 = vld [vmem:[%s4121_s25 + $0x50] sm:$0xff]  ;;  %v424_v49 = vld [vmem:[%s4121_s25 + $0x58] sm:$0xff] }
  0x27   : > { %v494_v51 = vld [vmem:[%s4116_s17 + $0xf8] sm:$0xff]  ;;  %v493_v52 = vld [vmem:[%s4116_s17 + $0xf0] sm:$0xff]  ;;  %v450_v53 = vpack.c.bf16 %v424_v49, %v423_v48  ;;  %v425_v54 = vld [vmem:[%s4121_s25 + $0x60] sm:$0xff]  ;;  %s3947_s17 = sshra.s32 %s3216_s16, 4  ;;  %s3948_s17 = int_to_ptr.hbm [resolvable:$true] %s3947_s17 }
  0x28   : > { %v426_v55 = vld [vmem:[%s4121_s25 + $0x68] sm:$0xff]  ;;  %v427_v57 = vld [vmem:[%s4121_s25 + $0x70] sm:$0xff]  ;;  %v428_v58 = vld [vmem:[%s4121_s25 + $0x78] sm:$0xff]  ;;  %s3949_s18 = scalar_lea.hbm %s3948_s17, 2  ;;  %p3954_p0 = scmp.lt.s32.totalorder %s3948_s17, %s6630_s11 }
  0x29   : > { %v451_v56 = vpack.c.bf16 %v426_v55, %v425_v54  ;;  %v452_v60 = vpack.c.bf16 %v428_v58, %v427_v57  ;;  %v4194_v0 = vld [vmem:[%s6622_s3] ss:$0 sm:$0xff]  ;;  %v430_v3 = vld [vmem:[%s4121_s25 + $0x88] sm:$0xff]  ;;  %v3484_v4 = vld [vmem:[%s6624_s5 + $0x18] sm:$0xff]  ;;  %p3950_p11 = scmp.ne.s32.totalorder %s3948_s17, %s3949_s18  ;;  %p3955_p1 = scmp.lt.s32.totalorder %s3953_s30, %s3949_s18 }
  0x2a   : > { %538 = vperm.xlu2 %3539, %v471_v14   ;;  %533 = vperm.xlu1 %3538, %v470_v15   ;;  %v429_v2 = vld [vmem:[%s4121_s25 + $0x80] sm:$0xff]  ;;  %v3483_v9 = vld [vmem:[%s6624_s5 + $0x10] sm:$0xff]  ;;  %v3482_v12 = vld [vmem:[%s6624_s5 + $0x8] sm:$0xff] }
  0x2b   : > { %528 = vperm.xlu0 %3537, %v469_v16   ;;  %1599 = vmatpush.bf16.msra.mxu1 %v3484_v4  ;;  %v4205_v6 = vld [vmem:[%s6623_s4] ss:$0 sm:$0xff]  ;;  %v453_v7 = vpack.c.bf16 %v430_v3, %v429_v2  ;;  %v431_v21 = vld [vmem:[%s4121_s25 + $0x90] sm:$0xff]  ;;  %v432_v22 = vld [vmem:[%s4121_s25 + $0x98] sm:$0xff]  ;;  %p3951_p12 = pnand %p3950_p11, %p4099_p5  ;;  %p3956_p2 = por %p3955_p1, %p3954_p0 }
  0x2d   : > { %p3952_p13 = pneg %p3951_p12 }
  0x2e   : > { %3301 = vmatmul.msk.bf16.gmra.mxu0 %vm697_vm0, %v446_v17  ;;  %v3481_v17 = vld [vmem:[%s6624_s5] sm:$0xff] }
  0x2f   : > { %1600 = vmatpush.bf16.msra.mxu1 %v3483_v9  ;;  %p3957_p3 = pnand %p3956_p2, %p3952_p13 }
  0x32   : > { %553 = vperm.xlu2 %3539, %v474_v18   ;;  %548 = vperm.xlu1 %3538, %v473_v19  }
  0x33   : > { %543 = vperm.xlu0 %3537, %v472_v20   ;;  %1601 = vmatpush.bf16.msra.mxu1 %v3482_v12 }
  0x37   : > { %1602 = vmatpush.bf16.msra.mxu1 %v3481_v17 }
  0x3a   : > { %568 = vperm.xlu2 %3539, %v477_v23   ;;  %563 = vperm.xlu1 %3538, %v476_v24  }
  0x3b   : > { %558 = vperm.xlu0 %3537, %v475_v25  }
  0x3e   : > { %3302 = vmatmul.msk.bf16.gmra.mxu0 %vm697_vm0, %v447_v26 }
  0x42   : > { %583 = vperm.xlu2 %3539, %v480_v27   ;;  %578 = vperm.xlu1 %3538, %v479_v28   ;;  %v454_v27 = vpack.c.bf16 %v432_v22, %v431_v21 }
  0x43   : > { %573 = vperm.xlu0 %3537, %v478_v29  }
  0x4a   : > { %598 = vperm.xlu2 %3539, %v483_v32   ;;  %593 = vperm.xlu1 %3538, %v482_v33  }
  0x4b   : > { %588 = vperm.xlu0 %3537, %v481_v34  }
  0x4e   : > { %3303 = vmatmul.msk.bf16.gmra.mxu0 %vm697_vm0, %v448_v35 }
  0x52   : > { %613 = vperm.xlu2 %3539, %v486_v36   ;;  %608 = vperm.xlu1 %3538, %v485_v37  }
  0x53   : > { %603 = vperm.xlu0 %3537, %v484_v38  }
  0x5a   : > { %628 = vperm.xlu2 %3539, %v489_v41   ;;  %623 = vperm.xlu1 %3538, %v488_v42  }
  0x5b   : > { %618 = vperm.xlu0 %3537, %v487_v43   ;;  %v433_v43 = vld [vmem:[%s4121_s25 + $0xa0] sm:$0xff] }
  0x5e   : > { %3304 = vmatmul.msk.bf16.gmra.mxu0 %vm697_vm0, %v449_v44  ;;  %v434_v44 = vld [vmem:[%s4121_s25 + $0xa8] sm:$0xff] }
  0x62   : > { %643 = vperm.xlu2 %3539, %v492_v45   ;;  %638 = vperm.xlu1 %3538, %v491_v46  }
  0x63   : > { %633 = vperm.xlu0 %3537, %v490_v47  }
  0x6a   : > { %3183 = vperm.xlu2 %3539, %v3180_v50   ;;  %653 = vperm.xlu1 %3538, %v494_v51   ;;  %v455_v51 = vpack.c.bf16 %v434_v44, %v433_v43 }
  0x6b   : > { %648 = vperm.xlu0 %3537, %v493_v52  }
  0x6e   : > { %3305 = vmatmul.msk.bf16.gmra.mxu0 %vm697_vm0, %v450_v53 }
  0x74   : > { %v519_v41 = vpop.permute.xlu2 %518 }
  0x75   : > { %v663_v47 = vmul.f32 %v4194_v0, %v519_v41 }
  0x7c   : > { %v524_v4 = vpop.permute.xlu2 %523 }
  0x7d   : > { %v664_v9 = vmul.f32 %v4194_v0, %v524_v4 }
  0x7e   : > { %3306 = vmatmul.msk.bf16.gmra.mxu0 %vm697_vm0, %v451_v56 }
  0x8c   : > { %v509_v20 = vpop.permute.xlu1 %508 }
  0x8d   : > { %v499_v1 = vpop.permute.xlu0 %498  ;;  %v661_v24 = vmul.f32 %v4194_v0, %v509_v20 }
  0x8e   : > { %3307 = vmatmul.msk.bf16.gmra.mxu0 %vm697_vm0, %v452_v60  ;;  %v659_v5 = vmul.f32 %v4194_v0, %v499_v1 }
  0x94   : > { %v514_v34 = vpop.permute.xlu1 %513 }
  0x95   : > { %v504_v14 = vpop.permute.xlu0 %503  ;;  %v662_v36 = vmul.f32 %v4194_v0, %v514_v34 }
  0x96   : > { %v660_v15 = vmul.f32 %v4194_v0, %v504_v14 }
  0x9b   : > { %v755_v8 = vpop.f32.mrf.mxu0 }
  0x9c   : > { %v756_v10 = vadd.f32 %v755_v8, %v659_v5 }
  0x9e   : > { %v4211_v11 = vadd.f32 %v4205_v6, %v756_v10  ;;  %3308 = vmatmul.msk.bf16.gmra.mxu0 %vm697_vm0, %v453_v7 }
  0xa0   : > { %v3316_v13 = vmul.f32 -1.442695, %v4211_v11 }
  0xa2   : > { %3544 = vpow2.f32 %v3316_v13 }
  0xa3   : > { %v757_v16 = vpop.f32.mrf.mxu0 }
  0xa4   : > { %v758_v18 = vadd.f32 %v757_v16, %v660_v15 }
  0xa6   : > { %v4223_v19 = vadd.f32 %v4205_v6, %v758_v18 }
  0xa8   : > { %v3545_v23 = vpop.eup %3544  ;;  %v3317_v25 = vmul.f32 -1.442695, %v4223_v19 }
  0xa9   : > { %v967_v26 = vadd.f32 1.0, %v3545_v23  ;;  %v529_v23 = vpop.permute.xlu0 %528 }
  0xaa   : > { %3546 = vpow2.f32 %v3317_v25 }
  0xab   : > { %3548 = vrcp.f32 %v967_v26  ;;  %v760_v28 = vpop.f32.mrf.mxu0  ;;  %v1010_v55 = vand.u32 2147483648, %v967_v26  ;;  %vm1004_vm2 = vweird.f32 %v967_v26  ;;  %v1008_v57 = vand.u32 2147483647, %v967_v26 }
  0xac   : > { %v761_v29 = vadd.f32 %v760_v28, %v661_v24 }
  0xad   : > { %v1011_v2 = vor.u32 1.1754944e-38, %v1010_v55  ;;  %vm1009_vm5 = vcmp.eq.f32.partialorder %v1008_v57, 8.507059e+37 }
  0xae   : > { %v4230_v30 = vadd.f32 %v4205_v6, %v761_v29  ;;  %3309 = vmatmul.msk.bf16.gmra.mxu0 %vm697_vm0, %v454_v27  ;;  %v436_v27 = vld [vmem:[%s4121_s25 + $0xb8] sm:$0xff] }
  0xb0   : > { %v3547_v31 = vpop.eup %3546  ;;  %v3318_v32 = vmul.f32 -1.442695, %v4230_v30 }
  0xb1   : > { %v3549_v33 = vpop.eup %3548  ;;  %v968_v35 = vadd.f32 1.0, %v3547_v31 }
  0xb2   : > { %3550 = vpow2.f32 %v3318_v32  ;;  %v1000_v37 = vmul.f32 %v3549_v33, %v967_v26  ;;  %vm1005_vm1 = vweird.f32 %v3549_v33  ;;  %v435_v26 = vld [vmem:[%s4121_s25 + $0xb0] sm:$0xff] }
  0xb3   : > { %3552 = vrcp.f32 %v968_v35  ;;  %v762_v38 = vpop.f32.mrf.mxu0  ;;  %vm4245_vm3 = vmor %vm1004_vm2, %vm1005_vm1  ;;  %v1023_v60 = vand.u32 2147483647, %v968_v35  ;;  %v1025_v61 = vand.u32 2147483648, %v968_v35  ;;  %vm1019_vm6 = vweird.f32 %v968_v35 }
  0xb4   : > { %v763_v39 = vadd.f32 %v762_v38, %v662_v36  ;;  %v1001_v40 = vsub.f32 1.0, %v1000_v37 }
  0xb5   : > { %v1026_v13 = vor.u32 1.1754944e-38, %v1025_v61  ;;  %vm1024_vm8 = vcmp.eq.f32.partialorder %v1023_v60, 8.507059e+37 }
  0xb6   : > { %v4236_v42 = vadd.f32 %v4205_v6, %v763_v39  ;;  %v1002_v45 = vmul.f32 %v3549_v33, %v1001_v40 }
  0xb8   : > { %v3551_v46 = vpop.eup %3550  ;;  %v3319_v48 = vmul.f32 -1.442695, %v4236_v42  ;;  %v1003_v52 = vadd.f32 %v3549_v33, %v1002_v45 }
  0xb9   : > { %v3553_v49 = vpop.eup %3552  ;;  %v4242_v50 = vadd.f32 1.0, %v3551_v46 }
  0xba   : > { %3554 = vpow2.f32 %v3319_v48  ;;  %v1015_v53 = vmul.f32 %v3553_v49, %v968_v35  ;;  %v1007_v63 = vsel %vm4245_vm3, %v3549_v33, %v1003_v52  ;;  %vm1020_vm4 = vweird.f32 %v3553_v49 }
  0xbb   : > { %3556 = vrcp.f32 %v4242_v50  ;;  %v765_v54 = vpop.f32.mrf.mxu0  ;;  %v1012_v12 = vsel %vm1009_vm5, %v1011_v2, %v1007_v63  ;;  %vm1021_vm7 = vmor %vm1019_vm6, %vm1020_vm4  ;;  %v665_v33 = vmul.f32 %v4194_v0, %v529_v23  ;;  %v1040_v37 = vand.u32 2147483648, %v4242_v50 }
  0xbc   : > { %v766_v56 = vadd.f32 %v765_v54, %v663_v47  ;;  %v1016_v58 = vsub.f32 1.0, %v1015_v53  ;;  %v1479_v20 = vmul.f32 %v1012_v12, %v4211_v11  ;;  %v456_v11 = vpack.c.bf16 %v436_v27, %v435_v26  ;;  %v539_v12 = vpop.permute.xlu2 %538 }
  0xbd   : > { %vm1034_vm10 = vweird.f32 %v4242_v50  ;;  %v1038_v39 = vand.u32 2147483647, %v4242_v50  ;;  %v1041_v48 = vor.u32 1.1754944e-38, %v1040_v37 }
  0xbe   : > { %v4250_v62 = vadd.f32 %v4205_v6, %v766_v56  ;;  %3310 = vmatmul.msk.bf16.gmra.mxu0 %vm697_vm0, %v455_v51  ;;  %v1017_v1 = vmul.f32 %v3553_v49, %v1016_v58 }
  0xbf   : > { %vm1039_vm13 = vcmp.eq.f32.partialorder %v1038_v39, 8.507059e+37 }
  0xc0   : > { %v3555_v3 = vpop.eup %3554  ;;  %v3320_v5 = vmul.f32 -1.442695, %v4250_v62  ;;  %v1018_v7 = vadd.f32 %v3553_v49, %v1017_v1 }
  0xc1   : > { %v3557_v8 = vpop.eup %3556  ;;  %v4257_v10 = vadd.f32 1.0, %v3555_v3 }
  0xc2   : > { %3558 = vpow2.f32 %v3320_v5  ;;  %v1022_v14 = vsel %vm1021_vm7, %v3553_v49, %v1018_v7  ;;  %v1030_v15 = vmul.f32 %v3557_v8, %v4242_v50  ;;  %vm1035_vm9 = vweird.f32 %v3557_v8  ;;  %v534_v50 = vpop.permute.xlu1 %533  ;;  %v437_v7 = vld [vmem:[%s4121_s25 + $0xc0] sm:$0xff] }
  0xc3   : > { %3560 = vrcp.f32 %v4257_v10  ;;  %v767_v16 = vpop.f32.mrf.mxu0  ;;  %v1027_v17 = vsel %vm1024_vm8, %v1026_v13, %v1022_v14  ;;  %vm4277_vm11 = vmor %vm1034_vm10, %vm1035_vm9  ;;  %v1053_v43 = vand.u32 2147483647, %v4257_v10  ;;  %v1055_v44 = vand.u32 2147483648, %v4257_v10 }
  0xc4   : > { %v768_v18 = vadd.f32 %v767_v16, %v664_v9  ;;  %v1480_v21 = vmul.f32 %v1027_v17, %v4223_v19  ;;  %v1031_v22 = vsub.f32 1.0, %v1030_v15  ;;  %vm1049_vm14 = vweird.f32 %v4257_v10 }
  0xc5   : > { %v666_v54 = vmul.f32 %v4194_v0, %v534_v50  ;;  %v1056_v57 = vor.u32 1.1754944e-38, %v1055_v44  ;;  %vm1054_vm1 = vcmp.eq.f32.partialorder %v1053_v43, 8.507059e+37  ;;  %v667_v15 = vmul.f32 %v4194_v0, %v539_v12 }
  0xc6   : > { %v4264_v24 = vadd.f32 %v4205_v6, %v768_v18  ;;  %v1528_v25 = vpack.c.bf16 %v1480_v21, %v1479_v20  ;;  %v1032_v28 = vmul.f32 %v3557_v8, %v1031_v22 }
  0xc8   : > { %v3559_v29 = vpop.eup %3558  ;;  %v3321_v31 = vmul.f32 -1.442695, %v4264_v24  ;;  %1603 = vmatmul.bf16.vlgmr.msra.gmra.mxu1 %v1528_v25  ;;  %v1033_v19 = vadd.f32 %v3557_v8, %v1032_v28  ;;  %v544_v28 = vpop.permute.xlu0 %543 }
  0xc9   : > { %v3561_v32 = vpop.eup %3560  ;;  %v4270_v34 = vadd.f32 1.0, %v3559_v29 }
  0xca   : > { %3562 = vpow2.f32 %v3321_v31  ;;  %v1045_v35 = vmul.f32 %v3561_v32, %v4257_v10  ;;  %v1037_v46 = vsel %vm4277_vm11, %v3557_v8, %v1033_v19  ;;  %vm1050_vm12 = vweird.f32 %v3561_v32  ;;  %v438_v8 = vld [vmem:[%s4121_s25 + $0xc8] sm:$0xff] }
  0xcb   : > { %3564 = vrcp.f32 %v4270_v34  ;;  %v770_v36 = vpop.f32.mrf.mxu0  ;;  %v1042_v56 = vsel %vm1039_vm13, %v1041_v48, %v1037_v46  ;;  %vm1051_vm15 = vmor %vm1049_vm14, %vm1050_vm12  ;;  %v1070_v20 = vand.u32 2147483648, %v4270_v34  ;;  %vm1064_vm3 = vweird.f32 %v4270_v34 }
  0xcc   : > { %v771_v38 = vadd.f32 %v770_v36, %v665_v33  ;;  %v1046_v40 = vsub.f32 1.0, %v1045_v35  ;;  %v1481_v1 = vmul.f32 %v1042_v56, %v4230_v30  ;;  %v457_v30 = vpack.c.bf16 %v438_v8, %v437_v7  ;;  %v549_v56 = vpop.permute.xlu1 %548 }
  0xcd   : > { %v1068_v22 = vand.u32 2147483647, %v4270_v34  ;;  %v1071_v33 = vor.u32 1.1754944e-38, %v1070_v20  ;;  %v668_v36 = vmul.f32 %v4194_v0, %v544_v28 }
  0xce   : > { %v4284_v45 = vadd.f32 %v4205_v6, %v771_v38  ;;  %3311 = vmatmul.msk.bf16.gmra.mxu0 %vm697_vm0, %v456_v11  ;;  %v1047_v47 = vmul.f32 %v3561_v32, %v1046_v40 }
  0xcf   : > { %vm1069_vm6 = vcmp.eq.f32.partialorder %v1068_v22, 8.507059e+37 }
  0xd0   : > { %v3563_v49 = vpop.eup %3562  ;;  %v3322_v51 = vmul.f32 -1.442695, %v4284_v45  ;;  %v1048_v52 = vadd.f32 %v3561_v32, %v1047_v47 }
  0xd1   : > { %v3565_v53 = vpop.eup %3564  ;;  %v4292_v55 = vadd.f32 1.0, %v3563_v49 }
  0xd2   : > { %3566 = vpow2.f32 %v3322_v51  ;;  %v1052_v58 = vsel %vm1051_vm15, %v3561_v32, %v1048_v52  ;;  %v1060_v59 = vmul.f32 %v3565_v53, %v4270_v34  ;;  %vm1065_vm2 = vweird.f32 %v3565_v53  ;;  %v439_v52 = vld [vmem:[%s4121_s25 + $0xd0] sm:$0xff] }
  0xd3   : > { %3568 = vrcp.f32 %v4292_v55  ;;  %v772_v60 = vpop.f32.mrf.mxu0  ;;  %v1057_v61 = vsel %vm1054_vm1, %v1056_v57, %v1052_v58  ;;  %vm4312_vm4 = vmor %vm1064_vm3, %vm1065_vm2  ;;  %v1083_v26 = vand.u32 2147483647, %v4292_v55  ;;  %v1085_v27 = vand.u32 2147483648, %v4292_v55 }
  0xd4   : > { %v773_v63 = vadd.f32 %v772_v60, %v666_v54  ;;  %v1482_v2 = vmul.f32 %v1057_v61, %v4236_v42  ;;  %v1061_v3 = vsub.f32 1.0, %v1060_v59  ;;  %vm1079_vm7 = vweird.f32 %v4292_v55 }
  0xd5   : > { %v1086_v39 = vor.u32 1.1754944e-38, %v1085_v27  ;;  %vm1084_vm9 = vcmp.eq.f32.partialorder %v1083_v26, 8.507059e+37  ;;  %v669_v59 = vmul.f32 %v4194_v0, %v549_v56 }
  0xd6   : > { %v4299_v4 = vadd.f32 %v4205_v6, %v773_v63  ;;  %v1529_v5 = vpack.c.bf16 %v1482_v2, %v1481_v1  ;;  %v1062_v9 = vmul.f32 %v3565_v53, %v1061_v3 }
  0xd8   : > { %v3567_v10 = vpop.eup %3566  ;;  %v3323_v13 = vmul.f32 -1.442695, %v4299_v4  ;;  %1608 = vmatmul.bf16.gmra.mxu1 %v1529_v5  ;;  %v1063_v42 = vadd.f32 %v3565_v53, %v1062_v9 }
  0xd9   : > { %v3569_v14 = vpop.eup %3568  ;;  %v4305_v16 = vadd.f32 1.0, %v3567_v10 }
  0xda   : > { %3570 = vpow2.f32 %v3323_v13  ;;  %v1075_v17 = vmul.f32 %v3569_v14, %v4292_v55  ;;  %v1067_v31 = vsel %vm4312_vm4, %v3565_v53, %v1063_v42  ;;  %vm1080_vm5 = vweird.f32 %v3569_v14  ;;  %v440_v53 = vld [vmem:[%s4121_s25 + $0xd8] sm:$0xff] }
  0xdb   : > { %3572 = vrcp.f32 %v4305_v16  ;;  %v775_v18 = vpop.f32.mrf.mxu0  ;;  %v1072_v38 = vsel %vm1069_vm6, %v1071_v33, %v1067_v31  ;;  %vm1081_vm8 = vmor %vm1079_vm7, %vm1080_vm5  ;;  %v1100_v1 = vand.u32 2147483648, %v4305_v16  ;;  %vm1094_vm11 = vweird.f32 %v4305_v16 }
  0xdc   : > { %v776_v21 = vadd.f32 %v775_v18, %v667_v15  ;;  %v1076_v23 = vsub.f32 1.0, %v1075_v17  ;;  %v1483_v47 = vmul.f32 %v1072_v38, %v4250_v62  ;;  %v458_v62 = vpack.c.bf16 %v440_v53, %v439_v52 }
  0xdd   : > { %v1098_v3 = vand.u32 2147483647, %v4305_v16 }
  0xde   : > { %v4319_v29 = vadd.f32 %v4205_v6, %v776_v21  ;;  %3312 = vmatmul.msk.bf16.gmra.mxu0 %vm697_vm0, %v457_v30  ;;  %v1077_v32 = vmul.f32 %v3569_v14, %v1076_v23 }
  0xdf   : > { %vm1099_vm14 = vcmp.eq.f32.partialorder %v1098_v3, 8.507059e+37 }
  0xe0   : > { %v3571_v34 = vpop.eup %3570  ;;  %v3324_v11 = vmul.f32 -1.442695, %v4319_v29  ;;  %v1078_v19 = vadd.f32 %v3569_v14, %v1077_v32 }
  0xe1   : > { %v3573_v35 = vpop.eup %3572  ;;  %v4327_v37 = vadd.f32 1.0, %v3571_v34  ;;  %v559_v34 = vpop.permute.xlu0 %558 }
  0xe2   : > { %3574 = vpow2.f32 %v3324_v11  ;;  %v1082_v40 = vsel %vm1081_vm8, %v3569_v14, %v1078_v19  ;;  %v1090_v41 = vmul.f32 %v3573_v35, %v4305_v16  ;;  %vm1095_vm10 = vweird.f32 %v3573_v35  ;;  %v554_v16 = vpop.permute.xlu2 %553 }
  0xe3   : > { %3576 = vrcp.f32 %v4327_v37  ;;  %v777_v43 = vpop.f32.mrf.mxu0  ;;  %v1087_v44 = vsel %vm1084_vm9, %v1086_v39, %v1082_v40  ;;  %vm4347_vm12 = vmor %vm1094_vm11, %vm1095_vm10  ;;  %v1113_v8 = vand.u32 2147483647, %v4327_v37  ;;  %v1115_v9 = vand.u32 2147483648, %v4327_v37 }
  0xe4   : > { %v778_v46 = vadd.f32 %v777_v43, %v668_v36  ;;  %v1484_v48 = vmul.f32 %v1087_v44, %v4264_v24  ;;  %v1091_v49 = vsub.f32 1.0, %v1090_v41  ;;  %v1101_v14 = vor.u32 1.1754944e-38, %v1100_v1  ;;  %v442_v36 = vld [vmem:[%s4121_s25 + $0xe8] sm:$0xff] }
  0xe5   : > { %vm1109_vm15 = vweird.f32 %v4327_v37  ;;  %v670_v18 = vmul.f32 %v4194_v0, %v554_v16  ;;  %v1116_v22 = vor.u32 1.1754944e-38, %v1115_v9  ;;  %vm1114_vm2 = vcmp.eq.f32.partialorder %v1113_v8, 8.507059e+37 }
  0xe6   : > { %v4334_v50 = vadd.f32 %v4205_v6, %v778_v46  ;;  %v1530_v51 = vpack.c.bf16 %v1484_v48, %v1483_v47  ;;  %v1092_v54 = vmul.f32 %v3573_v35, %v1091_v49  ;;  %v671_v41 = vmul.f32 %v4194_v0, %v559_v34 }
  0xe8   : > { %v3575_v55 = vpop.eup %3574  ;;  %v3325_v57 = vmul.f32 -1.442695, %v4334_v50  ;;  %1613 = vmatmul.bf16.gmra.mxu1 %v1530_v51  ;;  %v1093_v24 = vadd.f32 %v3573_v35, %v1092_v54 }
  0xe9   : > { %v3577_v58 = vpop.eup %3576  ;;  %v4340_v60 = vadd.f32 1.0, %v3575_v55  ;;  %v564_v55 = vpop.permute.xlu1 %563 }
  0xea   : > { %3578 = vpow2.f32 %v3325_v57  ;;  %v1105_v61 = vmul.f32 %v3577_v58, %v4327_v37  ;;  %v1097_v12 = vsel %vm4347_vm12, %v3573_v35, %v1093_v24  ;;  %vm1110_vm13 = vweird.f32 %v3577_v58  ;;  %v441_v35 = vld [vmem:[%s4121_s25 + $0xe0] sm:$0xff] }
  0xeb   : > { %3580 = vrcp.f32 %v4340_v60  ;;  %v780_v63 = vpop.f32.mrf.mxu0  ;;  %v1102_v21 = vsel %vm1099_vm14, %v1101_v14, %v1097_v12  ;;  %vm1111_vm1 = vmor %vm1109_vm15, %vm1110_vm13  ;;  %v1130_v47 = vand.u32 2147483648, %v4340_v60  ;;  %vm1124_vm4 = vweird.f32 %v4340_v60 }
  0xec   : > { %v781_v2 = vadd.f32 %v780_v63, %v669_v59  ;;  %v1106_v5 = vsub.f32 1.0, %v1105_v61  ;;  %v1485_v31 = vmul.f32 %v1102_v21, %v4284_v45  ;;  %v459_v45 = vpack.c.bf16 %v442_v36, %v441_v35  ;;  %v569_v21 = vpop.permute.xlu2 %568 }
  0xed   : > { %v1128_v49 = vand.u32 2147483647, %v4340_v60  ;;  %v1131_v59 = vor.u32 1.1754944e-38, %v1130_v47  ;;  %v672_v63 = vmul.f32 %v4194_v0, %v564_v55 }
  0xee   : > { %v4354_v10 = vadd.f32 %v4205_v6, %v781_v2  ;;  %3313 = vmatmul.msk.bf16.gmra.mxu0 %vm697_vm0, %v458_v62  ;;  %v1107_v13 = vmul.f32 %v3577_v58, %v1106_v5 }
  0xef   : > { %vm1129_vm7 = vcmp.eq.f32.partialorder %v1128_v49, 8.507059e+37 }
  0xf0   : > { %v3579_v15 = vpop.eup %3578  ;;  %v3326_v30 = vmul.f32 -1.442695, %v4354_v10  ;;  %v1108_v42 = vadd.f32 %v3577_v58, %v1107_v13 }
  0xf1   : > { %v3581_v17 = vpop.eup %3580  ;;  %v4362_v20 = vadd.f32 1.0, %v3579_v15 }
  0xf2   : > { %3582 = vpow2.f32 %v3326_v30  ;;  %v1112_v23 = vsel %vm1111_vm1, %v3577_v58, %v1108_v42  ;;  %v1120_v25 = vmul.f32 %v3581_v17, %v4340_v60  ;;  %vm1125_vm3 = vweird.f32 %v3581_v17  ;;  %v443_v42 = vld [vmem:[%s4121_s25 + $0xf0] sm:$0xff] }
  0xf3   : > { %3584 = vrcp.f32 %v4362_v20  ;;  %v782_v26 = vpop.f32.mrf.mxu0  ;;  %v1117_v27 = vsel %vm1114_vm2, %v1116_v22, %v1112_v23  ;;  %vm4382_vm5 = vmor %vm1124_vm4, %vm1125_vm3  ;;  %v1143_v53 = vand.u32 2147483647, %v4362_v20  ;;  %v1145_v54 = vand.u32 2147483648, %v4362_v20 }
  0xf4   : > { %v783_v28 = vadd.f32 %v782_v26, %v670_v18  ;;  %v1486_v32 = vmul.f32 %v1117_v27, %v4299_v4  ;;  %v1121_v33 = vsub.f32 1.0, %v1120_v25  ;;  %vm1139_vm8 = vweird.f32 %v4362_v20 }
  0xf5   : > { %v1146_v3 = vor.u32 1.1754944e-38, %v1145_v54  ;;  %vm1144_vm10 = vcmp.eq.f32.partialorder %v1143_v53, 8.507059e+37  ;;  %v673_v25 = vmul.f32 %v4194_v0, %v569_v21 }
  0xf6   : > { %v4369_v11 = vadd.f32 %v4205_v6, %v783_v28  ;;  %v1531_v19 = vpack.c.bf16 %v1486_v32, %v1485_v31  ;;  %v1122_v37 = vmul.f32 %v3581_v17, %v1121_v33 }
  0xf8   : > { %v3583_v38 = vpop.eup %3582  ;;  %v3327_v39 = vmul.f32 -1.442695, %v4369_v11  ;;  %1618 = vmatmul.bf16.gmra.mxu1 %v1531_v19  ;;  %v1123_v4 = vadd.f32 %v3581_v17, %v1122_v37  ;;  %v574_v37 = vpop.permute.xlu0 %573 }
  0xf9   : > { %v3585_v40 = vpop.eup %3584  ;;  %v4375_v43 = vadd.f32 1.0, %v3583_v38 }
  0xfa   : > { %3586 = vpow2.f32 %v3327_v39  ;;  %v1135_v44 = vmul.f32 %v3585_v40, %v4362_v20  ;;  %v1127_v57 = vsel %vm4382_vm5, %v3581_v17, %v1123_v4  ;;  %vm1140_vm6 = vweird.f32 %v3585_v40  ;;  %v444_v17 = vld [vmem:[%s4121_s25 + $0xf8] sm:$0xff]  ;;  %s3291_s25 = sshll.u32 %s396_s23, 1 }
  0xfb   : > { %3588 = vrcp.f32 %v4375_v43  ;;  %v785_v46 = vpop.f32.mrf.mxu0  ;;  %v1132_v2 = vsel %vm1129_vm7, %v1131_v59, %v1127_v57  ;;  %vm1141_vm9 = vmor %vm1139_vm8, %vm1140_vm6  ;;  %v1160_v31 = vand.u32 2147483648, %v4375_v43  ;;  %vm1154_vm12 = vweird.f32 %v4375_v43  ;;  %s398_s14 = scalar_lea.vmem [#allocation3], %s3291_s25 }
  0xfc   : > { %v786_v48 = vadd.f32 %v785_v46, %v671_v41  ;;  %v1136_v51 = vsub.f32 1.0, %v1135_v44  ;;  %v1487_v13 = vmul.f32 %v1132_v2, %v4319_v29  ;;  %v460_v29 = vpack.c.bf16 %v444_v17, %v443_v42  ;;  %s3213_s15 = sshll.u32 %s398_s14, 4  ;;  %s3214_s15 = int_to_ptr.vmem [resolvable:$true] %s3213_s15 }
  0xfd   : > { %v1158_v33 = vand.u32 2147483647, %v4375_v43  ;;  %v1161_v41 = vor.u32 1.1754944e-38, %v1160_v31  ;;  %v674_v46 = vmul.f32 %v4194_v0, %v574_v37 }
  0xfe   : > { %v4389_v56 = vadd.f32 %v4205_v6, %v786_v48  ;;  %3314 = vmatmul.msk.bf16.gmra.mxu0 %vm697_vm0, %v459_v45  ;;  %v1137_v58 = vmul.f32 %v3585_v40, %v1136_v51 }
  0xff   : > { %vm1159_vm15 = vcmp.eq.f32.partialorder %v1158_v33, 8.507059e+37 }
 0x100   : > { %v3587_v60 = vpop.eup %3586  ;;  %v3328_v62 = vmul.f32 -1.442695, %v4389_v56  ;;  %v1138_v24 = vadd.f32 %v3585_v40, %v1137_v58 }
 0x101   : > { %v3589_v61 = vpop.eup %3588  ;;  %v4397_v1 = vadd.f32 1.0, %v3587_v60  ;;  %v579_v60 = vpop.permute.xlu1 %578 }
 0x102   : > { %3590 = vpow2.f32 %v3328_v62  ;;  %v1142_v5 = vsel %vm1141_vm9, %v3585_v40, %v1138_v24  ;;  %v1150_v7 = vmul.f32 %v3589_v61, %v4375_v43  ;;  %vm1155_vm11 = vweird.f32 %v3589_v61 }
 0x103   : > { %3592 = vrcp.f32 %v4397_v1  ;;  %v787_v8 = vpop.f32.mrf.mxu0  ;;  %v1147_v9 = vsel %vm1144_vm10, %v1146_v3, %v1142_v5  ;;  %vm4417_vm13 = vmor %vm1154_vm12, %vm1155_vm11  ;;  %v1173_v35 = vand.u32 2147483647, %v4397_v1  ;;  %v1175_v36 = vand.u32 2147483648, %v4397_v1 }
 0x104   : > { %v788_v12 = vadd.f32 %v787_v8, %v672_v63  ;;  %v1488_v14 = vmul.f32 %v1147_v9, %v4334_v50  ;;  %v1151_v15 = vsub.f32 1.0, %v1150_v7  ;;  %vm1169_vm1 = vweird.f32 %v4397_v1 }
 0x105   : > { %v1176_v49 = vor.u32 1.1754944e-38, %v1175_v36  ;;  %v675_v3 = vmul.f32 %v4194_v0, %v579_v60 }
 0x106   : > { %v4404_v16 = vadd.f32 %v4205_v6, %v788_v12  ;;  %v1532_v30 = vpack.c.bf16 %v1488_v14, %v1487_v13  ;;  %v1152_v18 = vmul.f32 %v3589_v61, %v1151_v15 }
 0x108   : > { %v3591_v20 = vpop.eup %3590  ;;  %v3329_v22 = vmul.f32 -1.442695, %v4404_v16  ;;  %1623 = vmatmul.bf16.gmra.mxu1 %v1532_v30  ;;  %v1153_v50 = vadd.f32 %v3589_v61, %v1152_v18 }
 0x109   : > { %v3593_v23 = vpop.eup %3592  ;;  %v4410_v26 = vadd.f32 1.0, %v3591_v20 }
 0x10a   : > { %3594 = vpow2.f32 %v3329_v22  ;;  %v1165_v27 = vmul.f32 %v3593_v23, %v4397_v1  ;;  %v1157_v39 = vsel %vm4417_vm13, %v3589_v61, %v1153_v50  ;;  %vm1170_vm14 = vweird.f32 %v3593_v23  ;;  %v584_v22 = vpop.permute.xlu2 %583 }
 0x10b   : > { %3596 = vrcp.f32 %v4410_v26  ;;  %v790_v28 = vpop.f32.mrf.mxu0  ;;  %v1162_v48 = vsel %vm1159_vm15, %v1161_v41, %v1157_v39  ;;  %vm1171_vm2 = vmor %vm1169_vm1, %vm1170_vm14  ;;  %v1190_v8 = vand.u32 2147483648, %v4410_v26  ;;  %vm1184_vm4 = vweird.f32 %v4410_v26  ;;  %v589_v39 = vpop.permute.xlu0 %588 }
 0x10c   : > { %v791_v32 = vadd.f32 %v790_v28, %v673_v25  ;;  %v1166_v34 = vsub.f32 1.0, %v1165_v27  ;;  %v1489_v57 = vmul.f32 %v1162_v48, %v4354_v10  ;;  %v1188_v12 = vand.u32 2147483647, %v4410_v26 }
 0x10d   : > { %v1191_v20 = vor.u32 1.1754944e-38, %v1190_v8  ;;  %v3496_v8 = vld [vmem:[%s6626_s7 + $0x38] sm:$0xff] }
 0x10e   : > { %v4424_v38 = vadd.f32 %v4205_v6, %v791_v32  ;;  %3315 = vmatmul.msk.bf16.gmra.mxu0 %vm697_vm0, %v460_v29  ;;  %v1167_v40 = vmul.f32 %v3593_v23, %v1166_v34  ;;  %vm1174_vm0 = vcmp.eq.f32.partialorder %v1173_v35, 8.507059e+37  ;;  %vm1189_vm7 = vcmp.eq.f32.partialorder %v1188_v12, 8.507059e+37  ;;  %2408 = vmatpush.bf16.msra.mxu2 %v3496_v8 }
 0x10f   : > { %v676_v29 = vmul.f32 %v4194_v0, %v584_v22 }
 0x110   : > { %v3595_v43 = vpop.eup %3594  ;;  %v3330_v45 = vmul.f32 -1.442695, %v4424_v38  ;;  %v1168_v4 = vadd.f32 %v3593_v23, %v1167_v40 }
 0x111   : > { %v3597_v44 = vpop.eup %3596  ;;  %v980_v47 = vadd.f32 1.0, %v3595_v43 }
 0x112   : > { %3598 = vpow2.f32 %v3330_v45  ;;  %v1172_v51 = vsel %vm1171_vm2, %v3593_v23, %v1168_v4  ;;  %v1180_v52 = vmul.f32 %v3597_v44, %v4410_v26  ;;  %vm1185_vm3 = vweird.f32 %v3597_v44 }
 0x113   : > { %3600 = vrcp.f32 %v980_v47  ;;  %v792_v53 = vpop.f32.mrf.mxu0  ;;  %v1177_v54 = vsel %vm1174_vm0, %v1176_v49, %v1172_v51  ;;  %vm4446_vm5 = vmor %vm1184_vm4, %vm1185_vm3  ;;  %v1203_v15 = vand.u32 2147483647, %v980_v47  ;;  %v1205_v30 = vand.u32 2147483648, %v980_v47 }
 0x114   : > { %v793_v55 = vadd.f32 %v792_v53, %v674_v46  ;;  %v1490_v58 = vmul.f32 %v1177_v54, %v4369_v11  ;;  %v1181_v59 = vsub.f32 1.0, %v1180_v52  ;;  %vm1199_vm8 = vweird.f32 %v980_v47  ;;  %v4550_v54 = vld [vmem:[%s6625_s6] ss:$0 sm:$0xff] }
 0x115   : > { %v1206_v28 = vor.u32 1.1754944e-38, %v1205_v30  ;;  %vm1204_vm10 = vcmp.eq.f32.partialorder %v1203_v15, 8.507059e+37  ;;  %v677_v46 = vmul.f32 %v4194_v0, %v589_v39  ;;  %v4524_v39 = vld [vmem:[%s6623_s4] ss:$0 sm:$0xff] }
 0x116   : > { %v4436_v62 = vadd.f32 %v4205_v6, %v793_v55  ;;  %v1533_v24 = vpack.c.bf16 %v1490_v58, %v1489_v57  ;;  %v1182_v61 = vmul.f32 %v3597_v44, %v1181_v59  ;;  %v594_v58 = vpop.permute.xlu1 %593 }
 0x118   : > { %v3599_v63 = vpop.eup %3598  ;;  %v3331_v1 = vmul.f32 -1.442695, %v4436_v62  ;;  %1628 = vmatmul.bf16.gmra.mxu1 %v1533_v24  ;;  %v1183_v10 = vadd.f32 %v3597_v44, %v1182_v61 }
 0x119   : > { %v3601_v2 = vpop.eup %3600  ;;  %v4440_v5 = vadd.f32 1.0, %v3599_v63 }
 0x11a   : > { %3602 = vpow2.f32 %v3331_v1  ;;  %v1195_v11 = vmul.f32 %v3601_v2, %v980_v47  ;;  %v1187_v17 = vsel %vm4446_vm5, %v3597_v44, %v1183_v10  ;;  %vm1200_vm6 = vweird.f32 %v3601_v2 }
 0x11b   : > { %3604 = vrcp.f32 %v4440_v5  ;;  %v795_v7 = vpop.f32.mrf.mxu0  ;;  %v1192_v27 = vsel %vm1189_vm7, %v1191_v20, %v1187_v17  ;;  %vm1201_vm9 = vmor %vm1199_vm8, %vm1200_vm6  ;;  %v1220_v49 = vand.u32 2147483648, %v4440_v5  ;;  %vm1214_vm12 = vweird.f32 %v4440_v5 }
 0x11c   : > { %v796_v9 = vadd.f32 %v795_v7, %v675_v3  ;;  %v1196_v13 = vsub.f32 1.0, %v1195_v11  ;;  %v1491_v35 = vmul.f32 %v1192_v27, %v4389_v56  ;;  %v1218_v52 = vand.u32 2147483647, %v4440_v5 }
 0x11d   : > { %v1221_v61 = vor.u32 1.1754944e-38, %v1220_v49 }
 0x11e   : > { %v4451_v42 = vadd.f32 %v4205_v6, %v796_v9  ;;  %v1197_v18 = vmul.f32 %v3601_v2, %v1196_v13  ;;  %vm1219_vm15 = vcmp.eq.f32.partialorder %v1218_v52, 8.507059e+37  ;;  %v609_v8 = vpop.permute.xlu1 %608 }
 0x120   : > { %v3603_v21 = vpop.eup %3602  ;;  %v3332_v23 = vmul.f32 -1.442695, %v4451_v42  ;;  %v1198_v25 = vadd.f32 %v3601_v2, %v1197_v18 }
 0x121   : > { %v3605_v26 = vpop.eup %3604  ;;  %v982_v50 = vadd.f32 1.0, %v3603_v21 }
 0x122   : > { %3606 = vpow2.f32 %v3332_v23  ;;  %v1202_v31 = vsel %vm1201_vm9, %v3601_v2, %v1198_v25  ;;  %v1210_v32 = vmul.f32 %v3605_v26, %v4440_v5  ;;  %vm1215_vm11 = vweird.f32 %v3605_v26  ;;  %v3495_v23 = vld [vmem:[%s6626_s7 + $0x30] sm:$0xff] }
 0x123   : > { %3608 = vrcp.f32 %v982_v50  ;;  %v797_v33 = vpop.f32.mrf.mxu0  ;;  %v1207_v34 = vsel %vm1204_vm10, %v1206_v28, %v1202_v31  ;;  %vm4471_vm13 = vmor %vm1214_vm12, %vm1215_vm11  ;;  %v1233_v55 = vand.u32 2147483647, %v982_v50  ;;  %v1235_v57 = vand.u32 2147483648, %v982_v50  ;;  %2409 = vmatpush.bf16.msra.mxu2 %v3495_v23  ;;  %v3494_v28 = vld [vmem:[%s6626_s7 + $0x28] sm:$0xff] }
 0x124   : > { %v798_v19 = vadd.f32 %v797_v33, %v676_v29  ;;  %v1492_v36 = vmul.f32 %v1207_v34, %v4404_v16  ;;  %v1211_v37 = vsub.f32 1.0, %v1210_v32  ;;  %vm1229_vm1 = vweird.f32 %v982_v50  ;;  %v3490_v23 = vld [vmem:[%s6626_s7 + $0x8] sm:$0xff] }
 0x125   : > { %v678_v5 = vmul.f32 %v4194_v0, %v594_v58  ;;  %v1236_v7 = vor.u32 1.1754944e-38, %v1235_v57  ;;  %vm1234_vm0 = vcmp.eq.f32.partialorder %v1233_v55, 8.507059e+37  ;;  %v3492_v58 = vld [vmem:[%s6626_s7 + $0x18] sm:$0xff] }
 0x126   : > { %v4461_v40 = vadd.f32 %v4205_v6, %v798_v19  ;;  %v1534_v41 = vpack.c.bf16 %v1492_v36, %v1491_v35  ;;  %v1212_v43 = vmul.f32 %v3605_v26, %v1211_v37  ;;  %v604_v37 = vpop.permute.xlu0 %603 }
 0x127   : > { %2410 = vmatpush.bf16.msra.mxu2 %v3494_v28 }
 0x128   : > { %v3607_v45 = vpop.eup %3606  ;;  %v3333_v4 = vmul.f32 -1.442695, %v4461_v40  ;;  %1633 = vmatmul.bf16.gmra.mxu1 %v1534_v41  ;;  %v1213_v56 = vadd.f32 %v3605_v26, %v1212_v43 }
 0x129   : > { %v3609_v44 = vpop.eup %3608  ;;  %v4465_v47 = vadd.f32 1.0, %v3607_v45 }
 0x12a   : > { %3610 = vpow2.f32 %v3333_v4  ;;  %v1225_v16 = vmul.f32 %v3609_v44, %v982_v50  ;;  %v1217_v60 = vsel %vm4471_vm13, %v3605_v26, %v1213_v56  ;;  %vm1230_vm14 = vweird.f32 %v3609_v44  ;;  %v599_v26 = vpop.permute.xlu2 %598  ;;  %v3493_v4 = vld [vmem:[%s6626_s7 + $0x20] sm:$0xff] }
 0x12b   : > { %3612 = vrcp.f32 %v4465_v47  ;;  %v800_v48 = vpop.f32.mrf.mxu0  ;;  %v1222_v11 = vsel %vm1219_vm15, %v1221_v61, %v1217_v60  ;;  %vm1231_vm2 = vmor %vm1229_vm1, %vm1230_vm14  ;;  %v1250_v32 = vand.u32 2147483648, %v4465_v47  ;;  %vm1244_vm4 = vweird.f32 %v4465_v47  ;;  %2411 = vmatpush.bf16.msra.mxu2 %v3493_v4 }
 0x12c   : > { %v801_v51 = vadd.f32 %v800_v48, %v677_v46  ;;  %v1226_v53 = vsub.f32 1.0, %v1225_v16  ;;  %v1493_v30 = vmul.f32 %v1222_v11, %v4424_v38  ;;  %v4542_v48 = vld [vmem:[%s6622_s3] ss:$0 sm:$0xff] }
 0x12d   : > { %v680_v49 = vmul.f32 %v4542_v48, %v604_v37 }
 0x12e   : > { %v4476_v59 = vadd.f32 %v4205_v6, %v801_v51  ;;  %v1227_v24 = vmul.f32 %v3609_v44, %v1226_v53 }
 0x12f   : > { %2412 = vmatpush.bf16.msra.mxu2 %v3492_v58 }
 0x130   : > { %v3611_v63 = vpop.eup %3610  ;;  %v3334_v1 = vmul.f32 -1.442695, %v4476_v59  ;;  %v1228_v2 = vadd.f32 %v3609_v44, %v1227_v24 }
 0x131   : > { %v4481_v3 = vpop.eup %3612  ;;  %v4484_v10 = vadd.f32 1.0, %v3611_v63 }
 0x132   : > { %3614 = vpow2.f32 %v3334_v1  ;;  %v1232_v9 = vsel %vm1231_vm2, %v3609_v44, %v1228_v2  ;;  %v1240_v12 = vmul.f32 %v4481_v3, %v4465_v47  ;;  %vm1245_vm3 = vweird.f32 %v4481_v3 }
 0x133   : > { %3616 = vrcp.f32 %v4484_v10  ;;  %v802_v13 = vpop.f32.mrf.mxu0  ;;  %v1237_v14 = vsel %vm1234_vm0, %v1236_v7, %v1232_v9  ;;  %vm4515_vm5 = vmor %vm1244_vm4, %vm1245_vm3  ;;  %v1263_v35 = vand.u32 2147483647, %v4484_v10  ;;  %v1265_v36 = vand.u32 2147483648, %v4484_v10  ;;  %v3491_v9 = vld [vmem:[%s6626_s7 + $0x10] sm:$0xff] }
 0x134   : > { %v803_v15 = vadd.f32 %v802_v13, %v678_v5  ;;  %v1494_v17 = vmul.f32 %v1237_v14, %v4436_v62  ;;  %v1241_v18 = vsub.f32 1.0, %v1240_v12  ;;  %v679_v62 = vmul.f32 %v4194_v0, %v599_v26  ;;  %2413 = vmatpush.bf16.msra.mxu2 %v3491_v9 }
 0x135   : > { %v1248_v0 = vand.u32 2147483647, %v4465_v47  ;;  %v1251_v44 = vor.u32 1.1754944e-38, %v1250_v32  ;;  %vm1259_vm8 = vweird.f32 %v4484_v10  ;;  %v1266_v53 = vor.u32 1.1754944e-38, %v1265_v36 }
 0x136   : > { %v4495_v20 = vadd.f32 %v4205_v6, %v803_v15  ;;  %v1535_v21 = vpack.c.bf16 %v1494_v17, %v1493_v30  ;;  %v1242_v22 = vmul.f32 %v4481_v3, %v1241_v18  ;;  %vm1264_vm10 = vcmp.eq.f32.partialorder %v1263_v35, 8.507059e+37 }
 0x137   : > { %vm1249_vm7 = vcmp.eq.f32.partialorder %v1248_v0, 8.507059e+37  ;;  %v681_v17 = vmul.f32 %v4542_v48, %v609_v8 }
 0x138   : > { %v3615_v25 = vpop.eup %3614  ;;  %v3335_v29 = vmul.f32 -1.442695, %v4495_v20  ;;  %1638 = vmatmul.bf16.gmra.mxu1 %v1535_v21  ;;  %v1243_v6 = vadd.f32 %v4481_v3, %v1242_v22  ;;  %2414 = vmatpush.bf16.msra.mxu2 %v3490_v23 }
 0x139   : > { %v3617_v38 = vpop.eup %3616  ;;  %v4503_v50 = vadd.f32 1.0, %v3615_v25 }
 0x13a   : > { %3618 = vpow2.f32 %v3335_v29  ;;  %v1255_v27 = vmul.f32 %v3617_v38, %v4484_v10  ;;  %v1247_v43 = vsel %vm4515_vm5, %v4481_v3, %v1243_v6  ;;  %vm1260_vm6 = vweird.f32 %v3617_v38 }
 0x13b   : > { %3620 = vrcp.f32 %v4503_v50  ;;  %v805_v31 = vpop.f32.mrf.mxu0  ;;  %v1252_v52 = vsel %vm1249_vm7, %v1251_v44, %v1247_v43  ;;  %vm1261_vm9 = vmor %vm1259_vm8, %vm1260_vm6  ;;  %v1280_v30 = vand.u32 2147483648, %v4503_v50  ;;  %vm1274_vm12 = vweird.f32 %v4503_v50 }
 0x13c   : > { %v806_v33 = vadd.f32 %v805_v31, %v679_v62  ;;  %v1256_v34 = vsub.f32 1.0, %v1255_v27  ;;  %v1495_v63 = vmul.f32 %v1252_v52, %v4451_v42  ;;  %v1278_v22 = vand.u32 2147483647, %v4503_v50 }
 0x13d   : > { %v1281_v6 = vor.u32 1.1754944e-38, %v1280_v30 }
 0x13e   : > { %v4527_v41 = vadd.f32 %v4524_v39, %v806_v33  ;;  %v1257_v45 = vmul.f32 %v3617_v38, %v1256_v34  ;;  %vm1279_vm15 = vcmp.eq.f32.partialorder %v1278_v22, 8.507059e+37  ;;  %v3489_v33 = vld [vmem:[%s6626_s7] sm:$0xff]  ;;  %v614_v34 = vpop.permute.xlu2 %613 }
 0x13f   : > { %2415 = vmatpush.bf16.msra.mxu2 %v3489_v33 }
 0x140   : > { %v3619_v46 = vpop.eup %3618  ;;  %v3336_v47 = vmul.f32 -1.442695, %v4527_v41  ;;  %v1258_v56 = vadd.f32 %v3617_v38, %v1257_v45  ;;  %v682_v45 = vmul.f32 %v4542_v48, %v614_v34 }
 0x141   : > { %v4537_v16 = vpop.eup %3620  ;;  %v4545_v51 = vadd.f32 1.0, %v3619_v46 }
 0x142   : > { %3622 = vpow2.f32 %v3336_v47  ;;  %v1262_v55 = vsel %vm1261_vm9, %v3617_v38, %v1258_v56  ;;  %v1270_v57 = vmul.f32 %v4537_v16, %v4503_v50  ;;  %vm1275_vm11 = vweird.f32 %v4537_v16 }
 0x143   : > { %3624 = vrcp.f32 %v4545_v51  ;;  %v807_v60 = vpop.f32.mrf.mxu0  ;;  %v1267_v24 = vsel %vm1264_vm10, %v1266_v53, %v1262_v55  ;;  %vm4585_vm13 = vmor %vm1274_vm12, %vm1275_vm11  ;;  %v1293_v27 = vand.u32 2147483647, %v4545_v51  ;;  %v1295_v50 = vand.u32 2147483648, %v4545_v51 }
 0x144   : > { %v808_v61 = vadd.f32 %v807_v60, %v680_v49  ;;  %v1496_v1 = vmul.f32 %v1267_v24, %v4461_v40  ;;  %v1271_v2 = vsub.f32 1.0, %v1270_v57  ;;  %vm1289_vm1 = vweird.f32 %v4545_v51 }
 0x145   : > { %v1604_v3 = vpop.f32.mrf.mxu1  ;;  %v1296_v44 = vor.u32 1.1754944e-38, %v1295_v50  ;;  %vm1294_vm0 = vcmp.eq.f32.partialorder %v1293_v27, 8.507059e+37 }
 0x146   : > { %v4561_v5 = vadd.f32 %v4524_v39, %v808_v61  ;;  %v4564_v10 = vadd.f32 %v4550_v54, %v1604_v3  ;;  %v1536_v11 = vpack.c.bf16 %v1496_v1, %v1495_v63  ;;  %v1272_v7 = vmul.f32 %v4537_v16, %v1271_v2  ;;  %v619_v63 = vpop.permute.xlu0 %618 }
 0x148   : > { %v3623_v42 = vpop.eup %3622  ;;  %v3337_v40 = vmul.f32 -1.442695, %v4561_v5  ;;  %v3380_v12 = vmul.f32 -1.442695, %v4564_v10  ;;  %1643 = vmatmul.bf16.gmra.mxu1 %v1536_v11  ;;  %v1273_v15 = vadd.f32 %v4537_v16, %v1272_v7  ;;  %v683_v7 = vmul.f32 %v4542_v48, %v619_v63 }
 0x149   : > { %v3625_v13 = vpop.eup %3624  ;;  %v4572_v14 = vadd.f32 1.0, %v3623_v42 }
 0x14a   : > { %3626 = vpow2.f32 %v3337_v40  ;;  %v1285_v18 = vmul.f32 %v3625_v13, %v4545_v51  ;;  %v1277_v62 = vsel %vm4585_vm13, %v4537_v16, %v1273_v15  ;;  %vm1290_vm14 = vweird.f32 %v3625_v13 }
 0x14b   : > { %3628 = vrcp.f32 %v4572_v14  ;;  %v810_v21 = vpop.f32.mrf.mxu0  ;;  %v1282_v36 = vsel %vm1279_vm15, %v1281_v6, %v1277_v62  ;;  %vm1291_vm2 = vmor %vm1289_vm1, %vm1290_vm14  ;;  %vm1304_vm4 = vweird.f32 %v4572_v14  ;;  %v1308_v23 = vand.u32 2147483647, %v4572_v14 }
 0x14c   : > { %3630 = vpow2.f32 %v3380_v12  ;;  %v811_v25 = vadd.f32 %v810_v21, %v681_v17  ;;  %v1286_v29 = vsub.f32 1.0, %v1285_v18  ;;  %v1497_v52 = vmul.f32 %v1282_v36, %v4476_v59  ;;  %v624_v21 = vpop.permute.xlu1 %623 }
 0x14d   : > { %v1606_v38 = vpop.f32.mrf.mxu1  ;;  %v1310_v17 = vand.u32 2147483648, %v4572_v14  ;;  %vm1309_vm8 = vcmp.eq.f32.partialorder %v1308_v23, 8.507059e+37 }
 0x14e   : > { %v4595_v28 = vadd.f32 %v4524_v39, %v811_v25  ;;  %v4598_v31 = vadd.f32 %v4550_v54, %v1606_v38  ;;  %v1287_v32 = vmul.f32 %v3625_v13, %v1286_v29 }
 0x14f   : > { %v1311_v50 = vor.u32 1.1754944e-38, %v1310_v17 }
 0x150   : > { %v3627_v0 = vpop.eup %3626  ;;  %v3338_v19 = vmul.f32 -1.442695, %v4595_v28  ;;  %v3381_v35 = vmul.f32 -1.442695, %v4598_v31  ;;  %v1288_v37 = vadd.f32 %v3625_v13, %v1287_v32 }
 0x151   : > { %v4606_v43 = vpop.eup %3628  ;;  %v4609_v4 = vadd.f32 1.0, %v3627_v0  ;;  %v684_v0 = vmul.f32 %v4542_v48, %v624_v21 }
 0x152   : > { %v3631_v46 = vpop.eup %3630  ;;  %3632 = vpow2.f32 %v3338_v19  ;;  %v1292_v47 = vsel %vm1291_vm2, %v3625_v13, %v1288_v37  ;;  %v1300_v56 = vmul.f32 %v4606_v43, %v4572_v14  ;;  %vm1305_vm3 = vweird.f32 %v4606_v43 }
 0x153   : > { %3634 = vrcp.f32 %v4609_v4  ;;  %v4614_v16 = vadd.f32 1.0, %v3631_v46  ;;  %v812_v49 = vpop.f32.mrf.mxu0  ;;  %v1297_v51 = vsel %vm1294_vm0, %v1296_v44, %v1292_v47  ;;  %v1325_v25 = vand.u32 2147483648, %v4609_v4  ;;  %vm4646_vm5 = vmor %vm1304_vm4, %vm1305_vm3 }
 0x154   : > { %3636 = vpow2.f32 %v3381_v35  ;;  %v813_v53 = vadd.f32 %v812_v49, %v682_v45  ;;  %v1498_v55 = vmul.f32 %v1297_v51, %v4495_v20  ;;  %v1301_v57 = vsub.f32 1.0, %v1300_v56 }
 0x155   : > { %v1609_v58 = vpop.f32.mrf.mxu1  ;;  %3638 = vrcp.f32 %v4614_v16  ;;  %v1323_v38 = vand.u32 2147483647, %v4609_v4  ;;  %vm1319_vm7 = vweird.f32 %v4609_v4  ;;  %v1326_v34 = vor.u32 1.1754944e-38, %v1325_v25 }
 0x156   : > { %v4619_v60 = vadd.f32 %v4524_v39, %v813_v53  ;;  %v4622_v24 = vadd.f32 %v4550_v54, %v1609_v58  ;;  %v1537_v61 = vpack.c.bf16 %v1498_v55, %v1497_v52  ;;  %v1302_v20 = vmul.f32 %v4606_v43, %v1301_v57  ;;  %v639_v58 = vpop.permute.xlu1 %638 }
 0x157   : > { %vm1324_vm10 = vcmp.eq.f32.partialorder %v1323_v38, 8.507059e+37  ;;  %v1823_v21 = vand.u32 2147483648, %v4614_v16  ;;  %vm1817_vm12 = vweird.f32 %v4614_v16 }
 0x158   : > { %v3633_v1 = vpop.eup %3632  ;;  %v3339_v2 = vmul.f32 -1.442695, %v4619_v60  ;;  %v3382_v59 = vmul.f32 -1.442695, %v4622_v24  ;;  %1648 = vmatmul.bf16.gmra.mxu1 %v1537_v61  ;;  %v1303_v12 = vadd.f32 %v4606_v43, %v1302_v20  ;;  %v634_v61 = vpop.permute.xlu0 %633 }
 0x159   : > { %v3635_v3 = vpop.eup %3634  ;;  %v4636_v15 = vadd.f32 1.0, %v3633_v1 }
 0x15a   : > { %v3637_v11 = vpop.eup %3636  ;;  %3640 = vpow2.f32 %v3339_v2  ;;  %v1315_v8 = vmul.f32 %v3635_v3, %v4609_v4  ;;  %vm1320_vm6 = vweird.f32 %v3635_v3  ;;  %v1307_v14 = vsel %vm4646_vm5, %v4606_v43, %v1303_v12 }
 0x15b   : > { %v4630_v9 = vadd.f32 1.0, %v3637_v11  ;;  %v815_v42 = vpop.f32.mrf.mxu0  ;;  %3642 = vpow2.f32 %v3382_v59  ;;  %v4634_v13 = vpop.eup %3638  ;;  %vm1321_vm9 = vmor %vm1319_vm7, %vm1320_vm6  ;;  %v1312_v36 = vsel %vm1309_vm8, %v1311_v50, %v1307_v14  ;;  %vm1334_vm3 = vweird.f32 %v4636_v15 }
 0x15c   : > { %v816_v40 = vadd.f32 %v815_v42, %v683_v7  ;;  %v1316_v18 = vsub.f32 1.0, %v1315_v8  ;;  %v1813_v6 = vmul.f32 %v4634_v13, %v4614_v16  ;;  %v1499_v52 = vmul.f32 %v1312_v36, %v4527_v41 }
 0x15d   : > { %v1611_v30 = vpop.f32.mrf.mxu1  ;;  %3644 = vrcp.f32 %v4630_v9  ;;  %v4692_v8 = vmul.f32 %v4542_v48, %v639_v58  ;;  %v686_v42 = vmul.f32 %v4542_v48, %v634_v61  ;;  %vm1818_vm11 = vweird.f32 %v4634_v13 }
 0x15e   : > { %v4642_v22 = vadd.f32 %v4524_v39, %v816_v40  ;;  %v1317_v29 = vmul.f32 %v3635_v3, %v1316_v18  ;;  %3646 = vrcp.f32 %v4636_v15  ;;  %v1814_v45 = vsub.f32 1.0, %v1813_v6  ;;  %vm4708_vm14 = vmor %vm1817_vm12, %vm1818_vm11 }
 0x15f   : > { %v4665_v44 = vadd.f32 %v4550_v54, %v1611_v30  ;;  %v1821_v18 = vand.u32 2147483647, %v4614_v16  ;;  %vm1832_vm15 = vweird.f32 %v4630_v9  ;;  %v1838_v16 = vand.u32 2147483648, %v4630_v9 }
 0x160   : > { %v3641_v62 = vpop.eup %3640  ;;  %v3340_v27 = vmul.f32 -1.442695, %v4642_v22  ;;  %v1318_v32 = vadd.f32 %v3635_v3, %v1317_v29  ;;  %v1815_v63 = vmul.f32 %v4634_v13, %v1814_v45  ;;  %v1338_v36 = vand.u32 2147483647, %v4636_v15 }
 0x161   : > { %v3643_v33 = vpop.eup %3642  ;;  %v4660_v19 = vadd.f32 1.0, %v3641_v62  ;;  %v3383_v1 = vmul.f32 -1.442695, %v4665_v44  ;;  %vm1822_vm1 = vcmp.eq.f32.partialorder %v1821_v18, 8.507059e+37 }
 0x162   : > { %3648 = vpow2.f32 %v3340_v27  ;;  %v1322_v37 = vsel %vm1321_vm9, %v3635_v3, %v1318_v32  ;;  %v4667_v47 = vadd.f32 1.0, %v3643_v33  ;;  %v1816_v12 = vadd.f32 %v4634_v13, %v1815_v63 }
 0x163   : > { %v817_v35 = vpop.f32.mrf.mxu0  ;;  %v4662_v43 = vpop.eup %3644  ;;  %v1327_v46 = vsel %vm1324_vm10, %v1326_v34, %v1322_v37  ;;  %3650 = vrcp.f32 %v4660_v19  ;;  %v1836_v32 = vand.u32 2147483647, %v4630_v9  ;;  %vm4751_vm5 = vcmp.eq.f32.partialorder %v1338_v36, 8.507059e+37 }
 0x164   : > { %v818_v4 = vadd.f32 %v817_v35, %v684_v0  ;;  %v4672_v51 = vpop.eup %3646  ;;  %v1500_v53 = vmul.f32 %v1327_v46, %v4561_v5  ;;  %v1828_v55 = vmul.f32 %v4662_v43, %v4630_v9  ;;  %3652 = vrcp.f32 %v4667_v47  ;;  %v629_v5 = vpop.permute.xlu2 %628 }
 0x165   : > { %v1614_v56 = vpop.f32.mrf.mxu1  ;;  %v1330_v11 = vmul.f32 %v4672_v51, %v4636_v15  ;;  %v685_v7 = vmul.f32 %v4542_v48, %v629_v5  ;;  %vm1833_vm13 = vweird.f32 %v4662_v43  ;;  %v1820_v50 = vsel %vm4708_vm14, %v4634_v13, %v1816_v12 }
 0x166   : > { %v4670_v49 = vadd.f32 %v4524_v39, %v818_v4  ;;  %v4683_v59 = vadd.f32 %v4550_v54, %v1614_v56  ;;  %v1538_v41 = vpack.c.bf16 %v1500_v53, %v1499_v52  ;;  %v1829_v20 = vsub.f32 1.0, %v1828_v55  ;;  %vm4728_vm2 = vmor %vm1832_vm15, %vm1833_vm13 }
 0x167   : > { %v1331_v29 = vsub.f32 1.0, %v1330_v11  ;;  %v1824_v0 = vor.u32 1.1754944e-38, %v1823_v21  ;;  %v1340_v4 = vand.u32 2147483648, %v4636_v15  ;;  %v1839_v52 = vor.u32 1.1754944e-38, %v1838_v16 }
 0x168   : > { %v3649_v57 = vpop.eup %3648  ;;  %v3341_v2 = vmul.f32 -1.442695, %v4670_v49  ;;  %1653 = vmatmul.bf16.gmra.mxu1 %v1538_v41  ;;  %v3384_v30 = vmul.f32 -1.442695, %v4683_v59  ;;  %v1830_v26 = vmul.f32 %v4662_v43, %v1829_v20  ;;  %vm1837_vm0 = vcmp.eq.f32.partialorder %v1836_v32, 8.507059e+37 }
 0x169   : > { %v4686_v3 = vadd.f32 1.0, %v3649_v57  ;;  %v4698_v17 = vpop.eup %3650  ;;  %v1332_v45 = vmul.f32 %v4672_v51, %v1331_v29  ;;  %v1825_v46 = vsel %vm1822_vm1, %v1824_v0, %v1820_v50  ;;  %vm1335_vm4 = vweird.f32 %v4672_v51 }
 0x16a   : > { %3654 = vpow2.f32 %v3341_v2  ;;  %v4706_v38 = vpop.eup %3652  ;;  %v1831_v27 = vadd.f32 %v4662_v43, %v1830_v26  ;;  %v1345_v33 = vmul.f32 %v4698_v17, %v4660_v19  ;;  %v2292_v41 = vmul.f32 %v1825_v46, %v4564_v10  ;;  %vm4781_vm8 = vmor %vm1334_vm3, %vm1335_vm4 }
 0x16b   : > { %v820_v40 = vpop.f32.mrf.mxu0  ;;  %3656 = vpow2.f32 %v3383_v1  ;;  %v1843_v13 = vmul.f32 %v4706_v38, %v4667_v47  ;;  %v1333_v5 = vadd.f32 %v4672_v51, %v1332_v45  ;;  %v1341_v11 = vor.u32 1.1754944e-38, %v1340_v4 }
 0x16c   : > { %v821_v23 = vadd.f32 %v820_v40, %v685_v7  ;;  %3658 = vrcp.f32 %v4686_v3  ;;  %v1835_v9 = vsel %vm4728_vm2, %v4662_v43, %v1831_v27  ;;  %v1346_v43 = vsub.f32 1.0, %v1345_v33 }
 0x16d   : > { %v1616_v25 = vpop.f32.mrf.mxu1  ;;  %3660 = vpow2.f32 %v3384_v30  ;;  %v1840_v61 = vsel %vm1837_vm0, %v1839_v52, %v1835_v9  ;;  %v1844_v20 = vsub.f32 1.0, %v1843_v13  ;;  %v1851_v30 = vand.u32 2147483647, %v4667_v47 }
 0x16e   : > { %v4713_v6 = vadd.f32 %v4524_v39, %v821_v23  ;;  %v4745_v57 = vadd.f32 %v4550_v54, %v1616_v25  ;;  %v2293_v40 = vmul.f32 %v1840_v61, %v4598_v31  ;;  %v1853_v18 = vand.u32 2147483648, %v4667_v47 }
 0x16f   : > { %v1347_v23 = vmul.f32 %v4698_v17, %v1346_v43  ;;  %vm1847_vm6 = vweird.f32 %v4667_v47  ;;  %vm1350_vm7 = vweird.f32 %v4698_v17  ;;  %v1845_v31 = vmul.f32 %v4706_v38, %v1844_v20 }
 0x170   : > { %v3655_v14 = vpop.eup %3654  ;;  %v3342_v56 = vmul.f32 -1.442695, %v4713_v6  ;;  %v3385_v21 = vmul.f32 -1.442695, %v4745_v57  ;;  %v2341_v26 = vpack.c.bf16 %v2293_v40, %v2292_v41  ;;  %v1353_v27 = vand.u32 2147483647, %v4660_v19 }
 0x171   : > { %v4724_v34 = vadd.f32 1.0, %v3655_v14  ;;  %v3657_v37 = vpop.eup %3656  ;;  %v1337_v50 = vsel %vm4781_vm8, %v4672_v51, %v1333_v5  ;;  %v1355_v32 = vand.u32 2147483648, %v4660_v19  ;;  %v1348_v35 = vadd.f32 %v4698_v17, %v1347_v23  ;;  %v649_v23 = vpop.permute.xlu0 %648 }
 0x172   : > { %v4742_v55 = vpop.eup %3658  ;;  %v4748_v58 = vadd.f32 1.0, %v3657_v37  ;;  %2416 = vmatmul.bf16.vlgmr.msra.gmra.mxu2 %v2341_v26  ;;  %vm4795_vm9 = vcmp.eq.f32.partialorder %v1851_v30, 8.507059e+37  ;;  %v1854_v13 = vor.u32 1.1754944e-38, %v1853_v18  ;;  %vm1364_vm10 = vweird.f32 %v4686_v3 }
 0x173   : > { %3662 = vrcp.f32 %v4724_v34  ;;  %v822_v53 = vpop.f32.mrf.mxu0  ;;  %v3661_v2 = vpop.eup %3660  ;;  %v1360_v7 = vmul.f32 %v4742_v55, %v4686_v3  ;;  %vm1349_vm11 = vweird.f32 %v4660_v19  ;;  %v1846_v9 = vadd.f32 %v4706_v38, %v1845_v31 }
 0x174   : > { %3664 = vpow2.f32 %v3342_v56  ;;  %v823_v12 = vadd.f32 %v822_v53, %v686_v42  ;;  %v4768_v25 = vadd.f32 1.0, %v3661_v2  ;;  %vm1848_vm12 = vweird.f32 %v4706_v38  ;;  %vm1351_vm13 = vmor %vm1349_vm11, %vm1350_vm7 }
 0x175   : > { %v1619_v63 = vpop.f32.mrf.mxu1  ;;  %3666 = vrcp.f32 %v4748_v58  ;;  %v1361_v16 = vsub.f32 1.0, %v1360_v7  ;;  %v1342_v45 = vsel %vm4751_vm5, %v1341_v11, %v1337_v50  ;;  %v1352_v19 = vsel %vm1351_vm13, %v4698_v17, %v1348_v35  ;;  %vm4826_vm1 = vmor %vm1847_vm6, %vm1848_vm12 }
 0x176   : > { %v4775_v29 = vadd.f32 %v4524_v39, %v823_v12  ;;  %v4787_v14 = vadd.f32 %v4550_v54, %v1619_v63  ;;  %3668 = vpow2.f32 %v3385_v21  ;;  %v1356_v52 = vor.u32 1.1754944e-38, %v1355_v32 }
 0x177   : > { %3670 = vrcp.f32 %v4768_v25  ;;  %v1362_v46 = vmul.f32 %v4742_v55, %v1361_v16  ;;  %v1368_v53 = vand.u32 2147483647, %v4686_v3  ;;  %vm1354_vm14 = vcmp.eq.f32.partialorder %v1353_v27, 8.507059e+37 }
 0x178   : > { %v3343_v15 = vmul.f32 -1.442695, %v4775_v29  ;;  %v3386_v56 = vmul.f32 -1.442695, %v4787_v14  ;;  %vm1365_vm15 = vweird.f32 %v4742_v55  ;;  %v1370_v63 = vand.u32 2147483648, %v4686_v3 }
 0x179   : > { %v4764_v10 = vpop.eup %3662  ;;  %v1357_v1 = vsel %vm1354_vm14, %v1356_v52, %v1352_v19  ;;  %vm1379_vm2 = vweird.f32 %v4724_v34  ;;  %v1501_v20 = vmul.f32 %v1342_v45, %v4595_v28  ;;  %v1850_v47 = vsel %vm4826_vm1, %v4706_v38, %v1846_v9  ;;  %v654_v28 = vpop.permute.xlu1 %653  ;;  %vm4858_vm3 = vmor %vm1364_vm10, %vm1365_vm15 }
 0x17a   : > { %v1375_v42 = vmul.f32 %v4764_v10, %v4724_v34  ;;  %v3665_v36 = vpop.eup %3664  ;;  %3672 = vpow2.f32 %v3343_v15  ;;  %v1502_v5 = vmul.f32 %v1357_v1, %v4619_v60  ;;  %v1363_v40 = vadd.f32 %v4742_v55, %v1362_v46 }
 0x17b   : > { %v825_v33 = vpop.f32.mrf.mxu0  ;;  %v4810_v4 = vpop.eup %3666  ;;  %v4817_v61 = vadd.f32 1.0, %v3665_v36  ;;  %3674 = vpow2.f32 %v3386_v56  ;;  %vm1380_vm0 = vweird.f32 %v4764_v10  ;;  %v1383_v26 = vand.u32 2147483647, %v4724_v34 }
 0x17c   : > { %v1376_v0 = vsub.f32 1.0, %v1375_v42  ;;  %v826_v2 = vadd.f32 %v825_v33, %v4692_v8  ;;  %v3669_v41 = vpop.eup %3668  ;;  %v1858_v11 = vmul.f32 %v4810_v4, %v4748_v58  ;;  %v644_v8 = vpop.permute.xlu2 %643  ;;  %v1539_v18 = vpack.c.bf16 %v1502_v5, %v1501_v20  ;;  %vm4877_vm4 = vmor %vm1379_vm2, %vm1380_vm0 }
 0x17d   : > { %v4802_v51 = vpop.f32.mrf.mxu1  ;;  %v4835_v7 = vpop.eup %3670  ;;  %3676 = vrcp.f32 %v4817_v61  ;;  %v1385_v38 = vand.u32 2147483648, %v4724_v34  ;;  %v1855_v27 = vsel %vm4795_vm9, %v1854_v13, %v1850_v47  ;;  %v4864_v32 = vadd.f32 1.0, %v3669_v41 }
 0x17e   : > { %v1377_v43 = vmul.f32 %v4764_v10, %v1376_v0  ;;  %v4842_v12 = vadd.f32 %v4524_v39, %v826_v2  ;;  %v1873_v50 = vmul.f32 %v4835_v7, %v4768_v25  ;;  %1658 = vmatmul.bf16.gmra.mxu1 %v1539_v18  ;;  %v1859_v33 = vsub.f32 1.0, %v1858_v11 }
 0x17f   : > { %v688_v0 = vmul.f32 %v4542_v48, %v644_v8  ;;  %v4868_v15 = vmul.f32 %v4542_v48, %v654_v28  ;;  %v1367_v3 = vsel %vm4858_vm3, %v4742_v55, %v1363_v40  ;;  %v689_v36 = vmul.f32 %v4542_v48, %v649_v23 }
 0x180   : > { %v3673_v30 = vpop.eup %3672  ;;  %v1378_v60 = vadd.f32 %v4764_v10, %v1377_v43  ;;  %v3344_v42 = vmul.f32 -1.442695, %v4842_v12  ;;  %vm1369_vm5 = vcmp.eq.f32.partialorder %v1368_v53, 8.507059e+37  ;;  %v1371_v37 = vor.u32 1.1754944e-38, %v1370_v63 }
 0x181   : > { %v4849_v31 = vadd.f32 1.0, %v3673_v30  ;;  %v3675_v9 = vpop.eup %3674  ;;  %v2294_v55 = vmul.f32 %v1855_v27, %v4622_v24  ;;  %vm1384_vm6 = vcmp.eq.f32.partialorder %v1383_v26, 8.507059e+37  ;;  %v1386_v45 = vor.u32 1.1754944e-38, %v1385_v38 }
 0x182   : > { %v1382_v13 = vsel %vm4877_vm4, %v4764_v10, %v1378_v60  ;;  %v1372_v46 = vsel %vm1369_vm5, %v1371_v37, %v1367_v3  ;;  %v1874_v56 = vsub.f32 1.0, %v1873_v50  ;;  %v1860_v48 = vmul.f32 %v4810_v4, %v1859_v33 }
 0x183   : > { %v827_v21 = vpop.f32.mrf.mxu0  ;;  %3678 = vrcp.f32 %v4849_v31  ;;  %v4887_v34 = vpop.eup %3676  ;;  %v1387_v19 = vsel %vm1384_vm6, %v1386_v45, %v1382_v13  ;;  %vm1863_vm7 = vweird.f32 %v4810_v4  ;;  %v1866_v52 = vand.u32 2147483647, %v4748_v58 }
 0x184   : > { %3680 = vpow2.f32 %v3344_v42  ;;  %v1868_v10 = vand.u32 2147483648, %v4748_v58  ;;  %v4894_v53 = vadd.f32 1.0, %v3675_v9  ;;  %v4898_v24 = vadd.f32 %v4550_v54, %v4802_v51 }
 0x185   : > { %v1624_v62 = vpop.f32.mrf.mxu1  ;;  %3682 = vrcp.f32 %v4864_v32  ;;  %v1861_v43 = vadd.f32 %v4810_v4, %v1860_v48  ;;  %v828_v63 = vadd.f32 %v827_v21, %v688_v0  ;;  %v1503_v2 = vmul.f32 %v1372_v46, %v4642_v22 }
 0x186   : > { %v1881_v41 = vand.u32 2147483647, %v4768_v25  ;;  %v1390_v17 = vmul.f32 %v4887_v34, %v4817_v61  ;;  %vm1862_vm8 = vweird.f32 %v4748_v58  ;;  %v1504_v5 = vmul.f32 %v1387_v19, %v4670_v49 }
 0x187   : > { %vm1877_vm9 = vweird.f32 %v4768_v25  ;;  %vm1864_vm10 = vmor %vm1862_vm8, %vm1863_vm7  ;;  %v1869_v11 = vor.u32 1.1754944e-38, %v1868_v10  ;;  %v4915_v22 = vadd.f32 %v4550_v54, %v1624_v62  ;;  %v1875_v40 = vmul.f32 %v4835_v7, %v1874_v56 }
 0x188   : > { %v1865_v58 = vsel %vm1864_vm10, %v4810_v4, %v1861_v43  ;;  %vm1867_vm11 = vcmp.eq.f32.partialorder %v1866_v52, 8.507059e+37  ;;  %v4920_v49 = vadd.f32 %v4524_v39, %v828_v63  ;;  %3684 = vrcp.f32 %v4894_v53 }
 0x189   : > { %v4901_v1 = vpop.eup %3678  ;;  %v3387_v60 = vmul.f32 -1.442695, %v4898_v24  ;;  %v1870_v18 = vsel %vm1867_vm11, %v1869_v11, %v1865_v58  ;;  %v1883_v21 = vand.u32 2147483648, %v4768_v25  ;;  %v1391_v23 = vsub.f32 1.0, %v1390_v17 }
 0x18a   : > { %v1405_v51 = vmul.f32 %v4901_v1, %v4849_v31  ;;  %v3681_v47 = vpop.eup %3680  ;;  %v2295_v26 = vmul.f32 %v1870_v18, %v4665_v44  ;;  %v3345_v4 = vmul.f32 -1.442695, %v4920_v49  ;;  %v3388_v42 = vmul.f32 -1.442695, %v4915_v22 }
 0x18b   : > { %v830_v8 = vpop.f32.mrf.mxu0  ;;  %v4922_v30 = vpop.eup %3682  ;;  %v4925_v28 = vadd.f32 1.0, %v3681_v47  ;;  %v1540_v62 = vpack.c.bf16 %v1504_v5, %v1503_v2  ;;  %vm1878_vm12 = vweird.f32 %v4835_v7  ;;  %v1398_v27 = vand.u32 2147483647, %v4817_v61 }
 0x18c   : > { %v1406_v38 = vsub.f32 1.0, %v1405_v51  ;;  %v2342_v16 = vpack.c.bf16 %v2295_v26, %v2294_v55  ;;  %v1876_v50 = vadd.f32 %v4835_v7, %v1875_v40  ;;  %v1400_v33 = vand.u32 2147483648, %v4817_v61  ;;  %vm4957_vm14 = vmor %vm1877_vm9, %vm1878_vm12 }
 0x18d   : > { %v1626_v20 = vpop.f32.mrf.mxu1  ;;  %3686 = vrcp.f32 %v4925_v28  ;;  %v831_v44 = vadd.f32 %v830_v8, %v689_v36  ;;  %vm4937_vm13 = vcmp.eq.f32.partialorder %v1881_v41, 8.507059e+37  ;;  %v1392_v3 = vmul.f32 %v4887_v34, %v1391_v23 }
 0x18e   : > { %3688 = vpow2.f32 %v3345_v4  ;;  %2421 = vmatmul.bf16.gmra.mxu2 %v2342_v16  ;;  %v4943_v35 = vadd.f32 %v4550_v54, %v1626_v20  ;;  %v1888_v37 = vmul.f32 %v4922_v30, %v4864_v32  ;;  %v4947_v13 = vpop.eup %3684  ;;  %v1884_v9 = vor.u32 1.1754944e-38, %v1883_v21  ;;  %1663 = vmatmul.bf16.gmra.mxu1 %v1540_v62 }
 0x18f   : > { %3690 = vpow2.f32 %v3387_v60  ;;  %v1407_v55 = vmul.f32 %v4901_v1, %v1406_v38  ;;  %v4951_v36 = vadd.f32 %v4524_v39, %v831_v44  ;;  %vm1394_vm15 = vweird.f32 %v4817_v61 }
 0x190   : > { %3692 = vpow2.f32 %v3388_v42  ;;  %vm4962_vm1 = vcmp.eq.f32.partialorder %v1398_v27, 8.507059e+37  ;;  %v3389_v56 = vmul.f32 -1.442695, %v4943_v35  ;;  %v1889_v48 = vsub.f32 1.0, %v1888_v37 }
 0x191   : > { %v1880_v25 = vsel %vm4957_vm14, %v4835_v7, %v1876_v50  ;;  %vm1395_vm2 = vweird.f32 %v4887_v34  ;;  %v1401_v10 = vor.u32 1.1754944e-38, %v1400_v33  ;;  %v3346_v43 = vmul.f32 -1.442695, %v4951_v36 }
 0x192   : > { %v1393_v41 = vadd.f32 %v4887_v34, %v1392_v3  ;;  %vm1410_vm0 = vweird.f32 %v4901_v1  ;;  %v1903_v17 = vmul.f32 %v4947_v13, %v4894_v53  ;;  %3694 = vpow2.f32 %v3389_v56  ;;  %vm4991_vm4 = vmor %vm1394_vm15, %vm1395_vm2 }
 0x193   : > { %v4967_v52 = vpop.eup %3686  ;;  %v832_v63 = vpop.f32.mrf.mxu0  ;;  %v1408_v5 = vadd.f32 %v4901_v1, %v1407_v55  ;;  %3696 = vpow2.f32 %v3346_v43  ;;  %v1890_v7 = vmul.f32 %v4922_v30, %v1889_v48  ;;  %v1885_v11 = vsel %vm4937_vm13, %v1884_v9, %v1880_v25 }
 0x194   : > { %v3689_v2 = vpop.eup %3688  ;;  %vm1409_vm3 = vweird.f32 %v4849_v31  ;;  %v1415_v8 = vand.u32 2147483648, %v4849_v31  ;;  %v833_v47 = vadd.f32 %v832_v63, %v4868_v15  ;;  %v1413_v60 = vand.u32 2147483647, %v4849_v31 }
 0x195   : > { %v1629_v19 = vpop.f32.mrf.mxu1  ;;  %v3691_v20 = vpop.eup %3690  ;;  %v4979_v51 = vadd.f32 1.0, %v3689_v2  ;;  %v1420_v18 = vmul.f32 %v4967_v52, %v4925_v28  ;;  %vm1893_vm5 = vweird.f32 %v4922_v30  ;;  %v1397_v15 = vsel %vm4991_vm4, %v4887_v34, %v1393_v41  ;;  %vm5005_vm6 = vmor %vm1409_vm3, %vm1410_vm0 }
 0x196   : > { %v3693_v40 = vpop.eup %3692  ;;  %v1904_v21 = vsub.f32 1.0, %v1903_v17  ;;  %v5009_v23 = vadd.f32 1.0, %v3691_v20  ;;  %v1898_v31 = vand.u32 2147483648, %v4864_v32  ;;  %v1412_v26 = vsel %vm5005_vm6, %v4901_v1, %v1408_v5 }
 0x197   : > { %3698 = vrcp.f32 %v4979_v51  ;;  %v1891_v4 = vadd.f32 %v4922_v30, %v1890_v7  ;;  %vm1892_vm7 = vweird.f32 %v4864_v32  ;;  %v1896_v34 = vand.u32 2147483647, %v4864_v32 }
 0x198   : > { %v3695_v38 = vpop.eup %3694  ;;  %v2296_v42 = vmul.f32 %v1885_v11, %v4683_v59  ;;  %v1416_v62 = vor.u32 1.1754944e-38, %v1415_v8  ;;  %v5019_v27 = vadd.f32 1.0, %v3693_v40  ;;  %vm5021_vm8 = vmor %vm1892_vm7, %vm1893_vm5  ;;  %v5026_v50 = vadd.f32 %v4524_v39, %v833_v47 }
 0x199   : > { %v3697_v1 = vpop.eup %3696  ;;  %v1402_v33 = vsel %vm4962_vm1, %v1401_v10, %v1397_v15  ;;  %vm1414_vm9 = vcmp.eq.f32.partialorder %v1413_v60, 8.507059e+37  ;;  %v1421_v44 = vsub.f32 1.0, %v1420_v18  ;;  %v1895_v59 = vsel %vm5021_vm8, %v4922_v30, %v1891_v4 }
 0x19a   : > { %v1417_v0 = vsel %vm1414_vm9, %v1416_v62, %v1412_v26  ;;  %v5033_v3 = vadd.f32 1.0, %v3697_v1  ;;  %v5035_v37 = vadd.f32 1.0, %v3695_v38  ;;  %v1899_v9 = vor.u32 1.1754944e-38, %v1898_v31 }
 0x19b   : > { %v1905_v39 = vmul.f32 %v4947_v13, %v1904_v21  ;;  %3700 = vrcp.f32 %v5009_v23  ;;  %vm1897_vm10 = vcmp.eq.f32.partialorder %v1896_v34, 8.507059e+37  ;;  %v3347_v45 = vmul.f32 -1.442695, %v5026_v50 }
 0x19c   : > { %3702 = vrcp.f32 %v5019_v27  ;;  %v1900_v30 = vsel %vm1897_vm10, %v1899_v9, %v1895_v59  ;;  %v5046_v56 = vadd.f32 %v4550_v54, %v1629_v19  ;;  %v1506_v48 = vmul.f32 %v1417_v0, %v4775_v29 }
 0x19d   : > { %v1631_v32 = vpop.f32.mrf.mxu1  ;;  %v5037_v55 = vpop.eup %3698  ;;  %vm1907_vm11 = vweird.f32 %v4894_v53  ;;  %v1422_v25 = vmul.f32 %v4967_v52, %v1421_v44  ;;  %3704 = vrcp.f32 %v5033_v3  ;;  %v1911_v10 = vand.u32 2147483647, %v4894_v53 }
 0x19e   : > { %v1435_v46 = vmul.f32 %v5037_v55, %v4979_v51  ;;  %v1913_v43 = vand.u32 2147483648, %v4894_v53  ;;  %3706 = vrcp.f32 %v5035_v37  ;;  %v1505_v2 = vmul.f32 %v1402_v33, %v4713_v6 }
 0x19f   : > { %vm1908_vm12 = vweird.f32 %v4947_v13  ;;  %v2297_v19 = vmul.f32 %v1900_v30, %v4745_v57  ;;  %3708 = vpow2.f32 %v3347_v45  ;;  %v1906_v29 = vadd.f32 %v4947_v13, %v1905_v39 }
 0x1a0   : > { %v1436_v63 = vsub.f32 1.0, %v1435_v46  ;;  %vm1425_vm13 = vweird.f32 %v4967_v52  ;;  %v3390_v17 = vmul.f32 -1.442695, %v5046_v56  ;;  %v1423_v5 = vadd.f32 %v4967_v52, %v1422_v25  ;;  %vm5082_vm15 = vmor %vm1907_vm11, %vm1908_vm12 }
 0x1a1   : > { %v5062_v20 = vpop.eup %3700  ;;  %v2343_v7 = vpack.c.bf16 %v2297_v19, %v2296_v42  ;;  %v1541_v11 = vpack.c.bf16 %v1506_v48, %v1505_v2  ;;  %v5066_v6 = vadd.f32 %v4550_v54, %v1631_v32  ;;  %vm5070_vm14 = vcmp.eq.f32.partialorder %v1911_v10, 8.507059e+37 }
 0x1a2   : > { %v1437_v41 = vmul.f32 %v5037_v55, %v1436_v63  ;;  %v5068_v8 = vpop.eup %3702  ;;  %v1914_v47 = vor.u32 1.1754944e-38, %v1913_v43  ;;  %v1428_v40 = vand.u32 2147483647, %v4925_v28  ;;  %v1430_v58 = vand.u32 2147483648, %v4925_v28 }
 0x1a3   : > { %v5076_v60 = vpop.eup %3704  ;;  %vm1424_vm1 = vweird.f32 %v4925_v28  ;;  %vm1440_vm2 = vweird.f32 %v5037_v55  ;;  %2426 = vmatmul.bf16.gmra.mxu2 %v2343_v7  ;;  %1668 = vmatmul.bf16.gmra.mxu1 %v1541_v11  ;;  %v3391_v15 = vmul.f32 -1.442695, %v5066_v6  ;;  %v1910_v53 = vsel %vm5082_vm15, %v4947_v13, %v1906_v29  ;;  %v5151_v7 = vld [vmem:[%s6625_s6] ss:$0 sm:$0xff] }
 0x1a4   : > { %v1438_v18 = vadd.f32 %v5037_v55, %v1437_v41  ;;  %v5090_v21 = vpop.eup %3706  ;;  %vm5097_vm0 = vmor %vm1424_vm1, %vm1425_vm13  ;;  %v1445_v28 = vand.u32 2147483648, %v4979_v51  ;;  %3710 = vpow2.f32 %v3390_v17  ;;  %v1918_v26 = vmul.f32 %v5062_v20, %v5009_v23 }
 0x1a5   : > { %v1634_v61 = vpop.f32.mrf.mxu1  ;;  %v3709_v4 = vpop.eup %3708  ;;  %v1427_v34 = vsel %vm5097_vm0, %v4967_v52, %v1423_v5  ;;  %vm1439_vm3 = vweird.f32 %v4979_v51  ;;  %v1443_v13 = vand.u32 2147483647, %v4979_v51  ;;  %3712 = vpow2.f32 %v3391_v15 }
 0x1a6   : > { %vm1429_vm4 = vcmp.eq.f32.partialorder %v1428_v40, 8.507059e+37  ;;  %v1431_v38 = vor.u32 1.1754944e-38, %v1430_v58  ;;  %vm5111_vm5 = vmor %vm1439_vm3, %vm1440_vm2  ;;  %v1450_v62 = vmul.f32 %v5076_v60, %v5033_v3  ;;  %v5117_v16 = vadd.f32 1.0, %v3709_v4 }
 0x1a7   : > { %v1915_v52 = vsel %vm5070_vm14, %v1914_v47, %v1910_v53  ;;  %v1442_v51 = vsel %vm5111_vm5, %v5037_v55, %v1438_v18  ;;  %v1933_v1 = vmul.f32 %v5068_v8, %v5019_v27  ;;  %v1919_v33 = vsub.f32 1.0, %v1918_v26 }
 0x1a8   : > { %v1432_v44 = vsel %vm1429_vm4, %v1431_v38, %v1427_v34  ;;  %v1446_v59 = vor.u32 1.1754944e-38, %v1445_v28  ;;  %v1948_v32 = vmul.f32 %v5090_v21, %v5035_v37  ;;  %3714 = vrcp.f32 %v5117_v16 }
 0x1a9   : > { %vm1444_vm6 = vcmp.eq.f32.partialorder %v1443_v13, 8.507059e+37  ;;  %v1920_v0 = vmul.f32 %v5062_v20, %v1919_v33  ;;  %v5131_v39 = vmul.f32 %v1915_v52, %v4787_v14  ;;  %v1451_v55 = vsub.f32 1.0, %v1450_v62 }
 0x1aa   : > { %v3711_v9 = vpop.eup %3710  ;;  %v1447_v45 = vsel %vm1444_vm6, %v1446_v59, %v1442_v51  ;;  %v1507_v30 = vmul.f32 %v1432_v44, %v4842_v12  ;;  %v1934_v48 = vsub.f32 1.0, %v1933_v1  ;;  %v1956_v25 = vand.u32 2147483647, %v5035_v37 }
 0x1ab   : > { %v3713_v46 = vpop.eup %3712  ;;  %v1928_v10 = vand.u32 2147483648, %v5009_v23  ;;  %vm1454_vm7 = vweird.f32 %v5033_v3  ;;  %v1949_v43 = vsub.f32 1.0, %v1948_v32  ;;  %vm1923_vm8 = vweird.f32 %v5062_v20 }
 0x1ac   : > { %v1926_v63 = vand.u32 2147483647, %v5009_v23  ;;  %v1508_v14 = vmul.f32 %v1447_v45, %v4920_v49  ;;  %v1458_v2 = vand.u32 2147483647, %v5033_v3  ;;  %v5141_v19 = vadd.f32 1.0, %v3713_v46 }
 0x1ad   : > { %v1921_v12 = vadd.f32 %v5062_v20, %v1920_v0  ;;  %v1636_v29 = vpop.f32.mrf.mxu1  ;;  %v1452_v17 = vmul.f32 %v5076_v60, %v1451_v55  ;;  %v5145_v5 = vadd.f32 1.0, %v3711_v9  ;;  %vm1922_vm9 = vweird.f32 %v5009_v23 }
 0x1ae   : > { %v3715_v41 = vpop.eup %3714  ;;  %v5154_v49 = vadd.f32 %v5151_v7, %v1634_v61  ;;  %v1935_v11 = vmul.f32 %v5068_v8, %v1934_v48  ;;  %vm1455_vm10 = vweird.f32 %v5076_v60  ;;  %vm1952_vm11 = vweird.f32 %v5035_v37  ;;  %vm1924_vm12 = vmor %vm1922_vm9, %vm1923_vm8 }
 0x1af   : > { %v1465_v57 = vmul.f32 %v3715_v41, %v5117_v16  ;;  %v1929_v23 = vor.u32 1.1754944e-38, %v1928_v10  ;;  %v1950_v47 = vmul.f32 %v5090_v21, %v1949_v43  ;;  %3716 = vrcp.f32 %v5141_v19  ;;  %vm5182_vm2 = vmor %vm1454_vm7, %vm1455_vm10 }
 0x1b0   : > { %v1925_v40 = vsel %vm1924_vm12, %v5062_v20, %v1921_v12  ;;  %vm1927_vm13 = vcmp.eq.f32.partialorder %v1926_v63, 8.507059e+37  ;;  %v3392_v18 = vmul.f32 -1.442695, %v5154_v49  ;;  %v1542_v15 = vpack.c.bf16 %v1508_v14, %v1507_v30 }
 0x1b1   : > { %v1466_v58 = vsub.f32 1.0, %v1465_v57  ;;  %v1930_v54 = vsel %vm1927_vm13, %v1929_v23, %v1925_v40  ;;  %v1453_v61 = vadd.f32 %v5076_v60, %v1452_v17  ;;  %v1473_v53 = vand.u32 2147483647, %v5117_v16 }
 0x1b2   : > { %v1475_v31 = vand.u32 2147483648, %v5117_v16  ;;  %3718 = vrcp.f32 %v5145_v5  ;;  %vm1470_vm14 = vweird.f32 %v3715_v41  ;;  %v2299_v26 = vmul.f32 %v1930_v54, %v4898_v24 }
 0x1b3   : > { %v1467_v28 = vmul.f32 %v3715_v41, %v1466_v58  ;;  %1673 = vmatmul.bf16.gmra.mxu1 %v1542_v15  ;;  %v5172_v20 = vadd.f32 %v5151_v7, %v1636_v29  ;;  %v1460_v4 = vand.u32 2147483648, %v5033_v3  ;;  %v1951_v34 = vadd.f32 %v5090_v21, %v1950_v47 }
 0x1b4   : > { %vm1953_vm15 = vweird.f32 %v5090_v21  ;;  %vm1469_vm1 = vweird.f32 %v5117_v16  ;;  %v2344_v38 = vpack.c.bf16 %v2299_v26, %v5131_v39  ;;  %3720 = vpow2.f32 %v3392_v18 }
 0x1b5   : > { %v1468_v24 = vadd.f32 %v3715_v41, %v1467_v28  ;;  %v3393_v42 = vmul.f32 -1.442695, %v5172_v20  ;;  %v1639_v62 = vpop.f32.mrf.mxu1  ;;  %v5188_v52 = vpop.eup %3716  ;;  %v1936_v51 = vadd.f32 %v5068_v8, %v1935_v11  ;;  %vm1938_vm0 = vweird.f32 %v5068_v8  ;;  %vm1471_vm3 = vmor %vm1469_vm1, %vm1470_vm14 }
 0x1b6   : > { %v1958_v16 = vand.u32 2147483648, %v5035_v37  ;;  %v1476_v3 = vor.u32 1.1754944e-38, %v1475_v31  ;;  %v1457_v1 = vsel %vm5182_vm2, %v5076_v60, %v1453_v61  ;;  %vm1474_vm4 = vcmp.eq.f32.partialorder %v1473_v53, 8.507059e+37  ;;  %2431 = vmatmul.bf16.gmra.mxu2 %v2344_v38  ;;  %vm5205_vm6 = vmor %vm1952_vm11, %vm1953_vm15 }
 0x1b7   : > { %v1472_v33 = vsel %vm1471_vm3, %v3715_v41, %v1468_v24  ;;  %3722 = vpow2.f32 %v3393_v42  ;;  %vm1937_vm5 = vweird.f32 %v5019_v27  ;;  %v1943_v59 = vand.u32 2147483648, %v5019_v27 }
 0x1b8   : > { %v5197_v44 = vpop.eup %3718  ;;  %v1461_v32 = vor.u32 1.1754944e-38, %v1460_v4  ;;  %v1477_v60 = vsel %vm1474_vm4, %v1476_v3, %v1472_v33  ;;  %v1941_v9 = vand.u32 2147483647, %v5019_v27  ;;  %vm1459_vm7 = vcmp.eq.f32.partialorder %v1458_v2, 8.507059e+37  ;;  %vm5217_vm8 = vmor %vm1937_vm5, %vm1938_vm0 }
 0x1b9   : > { %v1955_v39 = vsel %vm5205_vm6, %v5090_v21, %v1951_v34  ;;  %v1978_v45 = vmul.f32 %v5188_v52, %v5141_v19  ;;  %v1959_v30 = vor.u32 1.1754944e-38, %v1958_v16  ;;  %v1940_v27 = vsel %vm5217_vm8, %v5068_v8, %v1936_v51 }
 0x1ba   : > { %v1462_v46 = vsel %vm1459_vm7, %v1461_v32, %v1457_v1  ;;  %v3721_v48 = vpop.eup %3720  ;;  %vm1957_vm9 = vcmp.eq.f32.partialorder %v1956_v25, 8.507059e+37  ;;  %v1510_v21 = vmul.f32 %v1477_v60, %v5026_v50  ;;  %v1963_v10 = vmul.f32 %v5197_v44, %v5145_v5 }
 0x1bb   : > { %v1944_v43 = vor.u32 1.1754944e-38, %v1943_v59  ;;  %v1960_v63 = vsel %vm1957_vm9, %v1959_v30, %v1955_v39  ;;  %vm1942_vm10 = vcmp.eq.f32.partialorder %v1941_v9, 8.507059e+37  ;;  %v1509_v2 = vmul.f32 %v1462_v46, %v4951_v36 }
 0x1bc   : > { %v1979_v12 = vsub.f32 1.0, %v1978_v45  ;;  %v5231_v29 = vadd.f32 %v5151_v7, %v1639_v62  ;;  %v5233_v17 = vadd.f32 1.0, %v3721_v48  ;;  %v2301_v25 = vmul.f32 %v1960_v63, %v4943_v35 }
 0x1bd   : > { %v3723_v14 = vpop.eup %3722  ;;  %v1641_v41 = vpop.f32.mrf.mxu1  ;;  %v1945_v8 = vsel %vm1942_vm10, %v1944_v43, %v1940_v27  ;;  %v1964_v11 = vsub.f32 1.0, %v1963_v10  ;;  %v1543_v57 = vpack.c.bf16 %v1510_v21, %v1509_v2  ;;  %vm1983_vm11 = vweird.f32 %v5188_v52 }
 0x1be   : > { %v5235_v37 = vadd.f32 1.0, %v3723_v14  ;;  %v5238_v50 = vadd.f32 %v5151_v7, %v1641_v41  ;;  %v2300_v36 = vmul.f32 %v1945_v8, %v4915_v22  ;;  %v1980_v23 = vmul.f32 %v5188_v52, %v1979_v12 }
 0x1bf   : > { %v3394_v47 = vmul.f32 -1.442695, %v5231_v29  ;;  %v1965_v58 = vmul.f32 %v5197_v44, %v1964_v11  ;;  %v1988_v15 = vand.u32 2147483648, %v5141_v19  ;;  %vm1968_vm12 = vweird.f32 %v5197_v44 }
 0x1c0   : > { %3724 = vrcp.f32 %v5235_v37  ;;  %v3395_v40 = vmul.f32 -1.442695, %v5238_v50  ;;  %v2345_v54 = vpack.c.bf16 %v2301_v25, %v2300_v36  ;;  %v1981_v35 = vadd.f32 %v5188_v52, %v1980_v23 }
 0x1c1   : > { %3726 = vrcp.f32 %v5233_v17  ;;  %v1966_v61 = vadd.f32 %v5197_v44, %v1965_v58  ;;  %vm1982_vm13 = vweird.f32 %v5141_v19  ;;  %v1986_v53 = vand.u32 2147483647, %v5141_v19 }
 0x1c2   : > { %3728 = vpow2.f32 %v3395_v40  ;;  %v1973_v28 = vand.u32 2147483648, %v5145_v5  ;;  %vm1984_vm14 = vmor %vm1982_vm13, %vm1983_vm11  ;;  %vm1967_vm15 = vweird.f32 %v5145_v5  ;;  %v1971_v26 = vand.u32 2147483647, %v5145_v5 }
 0x1c3   : > { %1678 = vmatmul.bf16.gmra.mxu1 %v1543_v57  ;;  %3730 = vpow2.f32 %v3394_v47  ;;  %v1985_v4 = vsel %vm1984_vm14, %v5188_v52, %v1981_v35  ;;  %vm1969_vm1 = vmor %vm1967_vm15, %vm1968_vm12  ;;  %v1989_v24 = vor.u32 1.1754944e-38, %v1988_v15  ;;  %vm1987_vm2 = vcmp.eq.f32.partialorder %v1986_v53, 8.507059e+37 }
 0x1c4   : > { %v1970_v19 = vsel %vm1969_vm1, %v5197_v44, %v1966_v61  ;;  %v1974_v62 = vor.u32 1.1754944e-38, %v1973_v28  ;;  %vm1972_vm0 = vcmp.eq.f32.partialorder %v1971_v26, 8.507059e+37  ;;  %vm2012_vm5 = vweird.f32 %v5235_v37 }
 0x1c5   : > { %v1644_v18 = vpop.f32.mrf.mxu1  ;;  %v1990_v51 = vsel %vm1987_vm2, %v1989_v24, %v1985_v4  ;;  %v2016_v27 = vand.u32 2147483647, %v5235_v37  ;;  %v2003_v10 = vand.u32 2147483648, %v5233_v17  ;;  %vm1997_vm7 = vweird.f32 %v5233_v17 }
 0x1c6   : > { %v5250_v22 = vpop.eup %3724  ;;  %2436 = vmatmul.bf16.gmra.mxu2 %v2345_v54  ;;  %v5271_v5 = vadd.f32 %v5151_v7, %v1644_v18  ;;  %v1975_v1 = vsel %vm1972_vm0, %v1974_v62, %v1970_v19  ;;  %v2303_v44 = vmul.f32 %v1990_v51, %v5066_v6  ;;  %v2001_v43 = vand.u32 2147483647, %v5233_v17 }
 0x1c7   : > { %v5257_v31 = vpop.eup %3726  ;;  %v2008_v34 = vmul.f32 %v5250_v22, %v5235_v37  ;;  %v2302_v60 = vmul.f32 %v1975_v1, %v5046_v56  ;;  %vm2013_vm3 = vweird.f32 %v5250_v22  ;;  %v2018_v56 = vand.u32 2147483648, %v5235_v37 }
 0x1c8   : > { %v3729_v13 = vpop.eup %3728  ;;  %v1993_v42 = vmul.f32 %v5257_v31, %v5233_v17  ;;  %v3396_v0 = vmul.f32 -1.442695, %v5271_v5  ;;  %vm1998_vm4 = vweird.f32 %v5257_v31  ;;  %vm2014_vm6 = vmor %vm2012_vm5, %vm2013_vm3  ;;  %vm2017_vm9 = vcmp.eq.f32.partialorder %v2016_v27, 8.507059e+37 }
 0x1c9   : > { %v3731_v38 = vpop.eup %3730  ;;  %v5268_v16 = vadd.f32 1.0, %v3729_v13  ;;  %v2009_v52 = vsub.f32 1.0, %v2008_v34  ;;  %v2346_v55 = vpack.c.bf16 %v2303_v44, %v2302_v60  ;;  %vm1999_vm8 = vmor %vm1997_vm7, %vm1998_vm4  ;;  %v2019_v12 = vor.u32 1.1754944e-38, %v2018_v56 }
 0x1ca   : > { %v5273_v33 = vadd.f32 1.0, %v3731_v38  ;;  %v1994_v32 = vsub.f32 1.0, %v1993_v42  ;;  %v2004_v25 = vor.u32 1.1754944e-38, %v2003_v10  ;;  %vm2002_vm10 = vcmp.eq.f32.partialorder %v2001_v43, 8.507059e+37 }
 0x1cb   : > { %3732 = vrcp.f32 %v5268_v16  ;;  %v2010_v9 = vmul.f32 %v5250_v22, %v2009_v52  ;;  %vm2042_vm13 = vweird.f32 %v5268_v16  ;;  %v2046_v34 = vand.u32 2147483647, %v5268_v16 }
 0x1cc   : > { %3734 = vrcp.f32 %v5273_v33  ;;  %v1995_v45 = vmul.f32 %v5257_v31, %v1994_v32  ;;  %v2033_v24 = vand.u32 2147483648, %v5273_v33  ;;  %vm2027_vm15 = vweird.f32 %v5273_v33 }
 0x1cd   : > { %v1646_v3 = vpop.f32.mrf.mxu1  ;;  %3736 = vpow2.f32 %v3396_v0  ;;  %v2011_v46 = vadd.f32 %v5250_v22, %v2010_v9  ;;  %v2031_v38 = vand.u32 2147483647, %v5273_v33  ;;  %vm2047_vm2 = vcmp.eq.f32.partialorder %v2046_v34, 8.507059e+37 }
 0x1ce   : > { %v5276_v59 = vadd.f32 %v5151_v7, %v1646_v3  ;;  %v1996_v48 = vadd.f32 %v5257_v31, %v1995_v45  ;;  %v2034_v1 = vor.u32 1.1754944e-38, %v2033_v24 }
 0x1cf   : > { %v2015_v63 = vsel %vm2014_vm6, %v5250_v22, %v2011_v46  ;;  %vm2032_vm0 = vcmp.eq.f32.partialorder %v2031_v38, 8.507059e+37 }
 0x1d0   : > { %v3397_v39 = vmul.f32 -1.442695, %v5276_v59  ;;  %v2000_v8 = vsel %vm1999_vm8, %v5257_v31, %v1996_v48  ;;  %v2020_v11 = vsel %vm2017_vm9, %v2019_v12, %v2015_v63 }
 0x1d1   : > { %v5288_v30 = vpop.eup %3732  ;;  %v2005_v47 = vsel %vm2002_vm10, %v2004_v25, %v2000_v8  ;;  %v2305_v58 = vmul.f32 %v2020_v11, %v5172_v20 }
 0x1d2   : > { %3738 = vpow2.f32 %v3397_v39  ;;  %v5295_v21 = vpop.eup %3734  ;;  %v2038_v14 = vmul.f32 %v5288_v30, %v5268_v16  ;;  %v2304_v18 = vmul.f32 %v2005_v47, %v5154_v49  ;;  %vm2043_vm11 = vweird.f32 %v5288_v30 }
 0x1d3   : > { %v3737_v2 = vpop.eup %3736  ;;  %v2023_v37 = vmul.f32 %v5295_v21, %v5273_v33  ;;  %v2048_v49 = vand.u32 2147483648, %v5268_v16  ;;  %vm2028_vm12 = vweird.f32 %v5295_v21  ;;  %vm2044_vm14 = vmor %vm2042_vm13, %vm2043_vm11 }
 0x1d4   : > { %v2039_v17 = vsub.f32 1.0, %v2038_v14  ;;  %v5311_v40 = vadd.f32 1.0, %v3737_v2  ;;  %v2347_v31 = vpack.c.bf16 %v2305_v58, %v2304_v18  ;;  %vm2029_vm1 = vmor %vm2027_vm15, %vm2028_vm12 }
 0x1d5   : > { %v1649_v6 = vpop.f32.mrf.mxu1  ;;  %v2024_v54 = vsub.f32 1.0, %v2023_v37  ;;  %v2049_v51 = vor.u32 1.1754944e-38, %v2048_v49 }
 0x1d6   : > { %2441 = vmatmul.bf16.gmra.mxu2 %v2346_v55  ;;  %v5309_v36 = vadd.f32 %v5151_v7, %v1649_v6  ;;  %v2040_v22 = vmul.f32 %v5288_v30, %v2039_v17  ;;  %v2063_v2 = vand.u32 2147483648, %v5311_v40  ;;  %vm2057_vm7 = vweird.f32 %v5311_v40 }
 0x1d7   : > { %v2025_v53 = vmul.f32 %v5295_v21, %v2024_v54 }
 0x1d8   : > { %v3739_v41 = vpop.eup %3738  ;;  %v3398_v15 = vmul.f32 -1.442695, %v5309_v36  ;;  %v2041_v20 = vadd.f32 %v5288_v30, %v2040_v22 }
 0x1d9   : > { %v5306_v57 = vadd.f32 1.0, %v3739_v41  ;;  %v2026_v4 = vadd.f32 %v5295_v21, %v2025_v53  ;;  %v2061_v41 = vand.u32 2147483647, %v5311_v40 }
 0x1da   : > { %v2045_v19 = vsel %vm2044_vm14, %v5288_v30, %v2041_v20 }
 0x1db   : > { %3740 = vrcp.f32 %v5306_v57  ;;  %v2030_v16 = vsel %vm2029_vm1, %v5295_v21, %v2026_v4  ;;  %v2050_v44 = vsel %vm2047_vm2, %v2049_v51, %v2045_v19  ;;  %v2078_v43 = vand.u32 2147483648, %v5306_v57 }
 0x1dc   : > { %3742 = vrcp.f32 %v5311_v40  ;;  %v2035_v9 = vsel %vm2032_vm0, %v2034_v1, %v2030_v16  ;;  %v2307_v55 = vmul.f32 %v2050_v44, %v5238_v50  ;;  %vm2072_vm5 = vweird.f32 %v5306_v57 }
 0x1dd   : > { %v1651_v23 = vpop.f32.mrf.mxu1  ;;  %v2306_v30 = vmul.f32 %v2035_v9, %v5231_v29  ;;  %v2076_v63 = vand.u32 2147483647, %v5306_v57  ;;  %v2079_v25 = vor.u32 1.1754944e-38, %v2078_v43  ;;  %vm2062_vm10 = vcmp.eq.f32.partialorder %v2061_v41, 8.507059e+37 }
 0x1de   : > { %v5315_v35 = vadd.f32 %v5151_v7, %v1651_v23  ;;  %v2064_v23 = vor.u32 1.1754944e-38, %v2063_v2 }
 0x1df   : > { %v2348_v21 = vpack.c.bf16 %v2307_v55, %v2306_v30  ;;  %vm2077_vm9 = vcmp.eq.f32.partialorder %v2076_v63, 8.507059e+37 }
 0x1e0   : > { %v3399_v61 = vmul.f32 -1.442695, %v5315_v35 }
 0x1e1   : > { %v5326_v26 = vpop.eup %3740 }
 0x1e2   : > { %3744 = vpow2.f32 %v3399_v61  ;;  %v5333_v13 = vpop.eup %3742  ;;  %v2068_v42 = vmul.f32 %v5326_v26, %v5306_v57  ;;  %vm2073_vm3 = vweird.f32 %v5326_v26 }
 0x1e3   : > { %3746 = vpow2.f32 %v3398_v15  ;;  %v2053_v3 = vmul.f32 %v5333_v13, %v5311_v40  ;;  %vm2058_vm4 = vweird.f32 %v5333_v13  ;;  %vm2074_vm6 = vmor %vm2072_vm5, %vm2073_vm3 }
 0x1e4   : > { %v2069_v33 = vsub.f32 1.0, %v2068_v42  ;;  %vm2059_vm8 = vmor %vm2057_vm7, %vm2058_vm4 }
 0x1e5   : > { %v1654_v28 = vpop.f32.mrf.mxu1  ;;  %v2054_v46 = vsub.f32 1.0, %v2053_v3 }
 0x1e6   : > { %2446 = vmatmul.bf16.gmra.mxu2 %v2347_v31  ;;  %v5347_v0 = vadd.f32 %v5151_v7, %v1654_v28  ;;  %v2070_v56 = vmul.f32 %v5326_v26, %v2069_v33 }
 0x1e7   : > { %v2055_v27 = vmul.f32 %v5333_v13, %v2054_v46 }
 0x1e8   : > { %v3745_v62 = vpop.eup %3744  ;;  %v3400_v48 = vmul.f32 -1.442695, %v5347_v0  ;;  %v2071_v10 = vadd.f32 %v5326_v26, %v2070_v56 }
 0x1e9   : > { %v3747_v52 = vpop.eup %3746  ;;  %v5344_v32 = vadd.f32 1.0, %v3745_v62  ;;  %v2056_v29 = vadd.f32 %v5333_v13, %v2055_v27 }
 0x1ea   : > { %v5349_v39 = vadd.f32 1.0, %v3747_v52  ;;  %v2075_v8 = vsel %vm2074_vm6, %v5326_v26, %v2071_v10  ;;  %v5434_v10 = vld [vmem:[%s6627_s8] ss:$0 sm:$0xff] }
 0x1eb   : > { %3748 = vrcp.f32 %v5344_v32  ;;  %v2060_v57 = vsel %vm2059_vm8, %v5333_v13, %v2056_v29  ;;  %v2080_v47 = vsel %vm2077_vm9, %v2079_v25, %v2075_v8  ;;  %v2108_v24 = vand.u32 2147483648, %v5344_v32 }
 0x1ec   : > { %3750 = vrcp.f32 %v5349_v39  ;;  %v2065_v15 = vsel %vm2062_vm10, %v2064_v23, %v2060_v57  ;;  %v2309_v53 = vmul.f32 %v2080_v47, %v5276_v59  ;;  %vm2102_vm13 = vweird.f32 %v5344_v32 }
 0x1ed   : > { %v1656_v60 = vpop.f32.mrf.mxu1  ;;  %v2308_v20 = vmul.f32 %v2065_v15, %v5271_v5  ;;  %v2106_v19 = vand.u32 2147483647, %v5344_v32  ;;  %v2093_v51 = vand.u32 2147483648, %v5349_v39  ;;  %vm2087_vm15 = vweird.f32 %v5349_v39 }
 0x1ee   : > { %v5352_v45 = vadd.f32 %v5151_v7, %v1656_v60  ;;  %v2091_v16 = vand.u32 2147483647, %v5349_v39  ;;  %v2109_v44 = vor.u32 1.1754944e-38, %v2108_v24 }
 0x1ef   : > { %v2349_v4 = vpack.c.bf16 %v2309_v53, %v2308_v20  ;;  %vm2107_vm2 = vcmp.eq.f32.partialorder %v2106_v19, 8.507059e+37  ;;  %v2094_v9 = vor.u32 1.1754944e-38, %v2093_v51 }
 0x1f0   : > { %v3401_v6 = vmul.f32 -1.442695, %v5352_v45  ;;  %vm2092_vm0 = vcmp.eq.f32.partialorder %v2091_v16, 8.507059e+37 }
 0x1f1   : > { %v5364_v50 = vpop.eup %3748 }
 0x1f2   : > { %3752 = vpow2.f32 %v3401_v6  ;;  %v5371_v14 = vpop.eup %3750  ;;  %v2098_v37 = vmul.f32 %v5364_v50, %v5344_v32  ;;  %vm2103_vm11 = vweird.f32 %v5364_v50 }
 0x1f3   : > { %3754 = vpow2.f32 %v3400_v48  ;;  %v2083_v17 = vmul.f32 %v5371_v14, %v5349_v39  ;;  %vm2088_vm12 = vweird.f32 %v5371_v14  ;;  %vm2104_vm14 = vmor %vm2102_vm13, %vm2103_vm11 }
 0x1f4   : > { %v2099_v40 = vsub.f32 1.0, %v2098_v37  ;;  %vm2089_vm1 = vmor %vm2087_vm15, %vm2088_vm12 }
 0x1f5   : > { %v5384_v18 = vpop.f32.mrf.mxu2  ;;  %v2084_v31 = vsub.f32 1.0, %v2083_v17 }
 0x1f6   : > { %2451 = vmatmul.bf16.gmra.mxu2 %v2348_v21  ;;  %v2100_v28 = vmul.f32 %v5364_v50, %v2099_v40 }
 0x1f7   : > { %v2085_v49 = vmul.f32 %v5371_v14, %v2084_v31 }
 0x1f8   : > { %v3753_v12 = vpop.eup %3752  ;;  %v2101_v13 = vadd.f32 %v5364_v50, %v2100_v28 }
 0x1f9   : > { %v3755_v11 = vpop.eup %3754  ;;  %v5382_v58 = vadd.f32 1.0, %v3753_v12  ;;  %v2086_v38 = vadd.f32 %v5371_v14, %v2085_v49 }
 0x1fa   : > { %v5389_v61 = vadd.f32 1.0, %v3755_v11  ;;  %v2105_v3 = vsel %vm2104_vm14, %v5364_v50, %v2101_v13 }
 0x1fb   : > { %v1659_v54 = vpop.f32.mrf.mxu1  ;;  %3756 = vrcp.f32 %v5382_v58  ;;  %v2090_v33 = vsel %vm2089_vm1, %v5371_v14, %v2086_v38  ;;  %v2110_v55 = vsel %vm2107_vm2, %v2109_v44, %v2105_v3  ;;  %v2138_v37 = vand.u32 2147483648, %v5382_v58 }
 0x1fc   : > { %v5387_v22 = vadd.f32 %v5151_v7, %v1659_v54  ;;  %3758 = vrcp.f32 %v5389_v61  ;;  %v2095_v30 = vsel %vm2092_vm0, %v2094_v9, %v2090_v33  ;;  %v2311_v48 = vmul.f32 %v2110_v55, %v5315_v35 }
 0x1fd   : > { %v5410_v42 = vpop.f32.mrf.mxu2  ;;  %v2310_v43 = vmul.f32 %v2095_v30, %v5309_v36  ;;  %vm2132_vm5 = vweird.f32 %v5382_v58  ;;  %v2136_v57 = vand.u32 2147483647, %v5382_v58  ;;  %v2123_v23 = vand.u32 2147483648, %v5389_v61 }
 0x1fe   : > { %v3402_v26 = vmul.f32 -1.442695, %v5387_v22  ;;  %vm2117_vm7 = vweird.f32 %v5389_v61  ;;  %v2121_v40 = vand.u32 2147483647, %v5389_v61 }
 0x1ff   : > { %v2350_v12 = vpack.c.bf16 %v2311_v48, %v2310_v43  ;;  %vm2137_vm9 = vcmp.eq.f32.partialorder %v2136_v57, 8.507059e+37 }
 0x200   : > { %3760 = vpow2.f32 %v3402_v26  ;;  %v2124_v26 = vor.u32 1.1754944e-38, %v2123_v23  ;;  %vm2122_vm10 = vcmp.eq.f32.partialorder %v2121_v40, 8.507059e+37 }
 0x201   : > { %v5400_v59 = vpop.eup %3756 }
 0x202   : > { %v5412_v62 = vpop.eup %3758  ;;  %v2128_v1 = vmul.f32 %v5400_v59, %v5382_v58  ;;  %vm2133_vm3 = vweird.f32 %v5400_v59  ;;  %v2139_v58 = vor.u32 1.1754944e-38, %v2138_v37 }
 0x203   : > { %v1661_v34 = vpop.f32.mrf.mxu1  ;;  %v2113_v60 = vmul.f32 %v5412_v62, %v5389_v61  ;;  %vm2118_vm4 = vweird.f32 %v5412_v62  ;;  %vm2134_vm6 = vmor %vm2132_vm5, %vm2133_vm3 }
 0x204   : > { %v5404_v5 = vadd.f32 %v5151_v7, %v1661_v34  ;;  %v2129_v39 = vsub.f32 1.0, %v2128_v1  ;;  %vm2119_vm8 = vmor %vm2117_vm7, %vm2118_vm4 }
 0x205   : > { %v2114_v27 = vsub.f32 1.0, %v2113_v60 }
 0x206   : > { %2456 = vmatmul.bf16.gmra.mxu2 %v2349_v4  ;;  %v3403_v52 = vmul.f32 -1.442695, %v5404_v5  ;;  %v3761_v32 = vpop.eup %3760  ;;  %v2130_v29 = vmul.f32 %v5400_v59, %v2129_v39 }
 0x207   : > { %v5427_v56 = vadd.f32 1.0, %v3761_v32  ;;  %v2115_v2 = vmul.f32 %v5412_v62, %v2114_v27 }
 0x208   : > { %3762 = vpow2.f32 %v3403_v52  ;;  %v2131_v8 = vadd.f32 %v5400_v59, %v2130_v29 }
 0x209   : > { %3764 = vrcp.f32 %v5427_v56  ;;  %v2116_v11 = vadd.f32 %v5412_v62, %v2115_v2  ;;  %vm2147_vm14 = vweird.f32 %v5427_v56 }
 0x20a   : > { %v2135_v15 = vsel %vm2134_vm6, %v5400_v59, %v2131_v8 }
 0x20b   : > { %v1664_v46 = vpop.f32.mrf.mxu1  ;;  %v2120_v31 = vsel %vm2119_vm8, %v5412_v62, %v2116_v11  ;;  %v2140_v49 = vsel %vm2137_vm9, %v2139_v58, %v2135_v15 }
 0x20c   : > { %v5425_v6 = vadd.f32 %v5151_v7, %v1664_v46  ;;  %v2125_v59 = vsel %vm2122_vm10, %v2124_v26, %v2120_v31  ;;  %v2313_v38 = vmul.f32 %v2140_v49, %v5352_v45 }
 0x20d   : > { %v2312_v52 = vmul.f32 %v2125_v59, %v5347_v0 }
 0x20e   : > { %v3404_v21 = vmul.f32 -1.442695, %v5425_v6  ;;  %v3763_v50 = vpop.eup %3762 }
 0x20f   : > { %v5439_v14 = vadd.f32 1.0, %v3763_v50  ;;  %v5457_v17 = vpop.eup %3764  ;;  %v2351_v33 = vpack.c.bf16 %v2313_v38, %v2312_v52  ;;  %v2153_v50 = vand.u32 2147483648, %v5427_v56 }
 0x210   : > { %3766 = vpow2.f32 %v3404_v21  ;;  %v2143_v20 = vmul.f32 %v5457_v17, %v5427_v56  ;;  %vm2148_vm12 = vweird.f32 %v5457_v17  ;;  %v2151_v21 = vand.u32 2147483647, %v5427_v56 }
 0x211   : > { %v2422_v63 = vpop.f32.mrf.mxu2  ;;  %3768 = vrcp.f32 %v5439_v14  ;;  %v2166_v55 = vand.u32 2147483647, %v5439_v14  ;;  %v2168_v46 = vand.u32 2147483648, %v5439_v14  ;;  %vm2162_vm13 = vweird.f32 %v5439_v14  ;;  %vm5528_vm1 = vmor %vm2147_vm14, %vm2148_vm12 }
 0x212   : > { %v5442_v35 = vadd.f32 %v5434_v10, %v2422_v63  ;;  %v2144_v19 = vsub.f32 1.0, %v2143_v20  ;;  %v2154_v23 = vor.u32 1.1754944e-38, %v2153_v50  ;;  %vm2152_vm0 = vcmp.eq.f32.partialorder %v2151_v21, 8.507059e+37 }
 0x213   : > { %v1666_v41 = vpop.f32.mrf.mxu1  ;;  %vm2167_vm2 = vcmp.eq.f32.partialorder %v2166_v55, 8.507059e+37 }
 0x214   : > { %v3446_v36 = vmul.f32 -1.442695, %v5442_v35  ;;  %v5452_v25 = vadd.f32 %v5151_v7, %v1666_v41  ;;  %v2145_v44 = vmul.f32 %v5457_v17, %v2144_v19  ;;  %v2169_v41 = vor.u32 1.1754944e-38, %v2168_v46 }
 0x216   : > { %2461 = vmatmul.bf16.gmra.mxu2 %v2350_v12  ;;  %3770 = vpow2.f32 %v3446_v36  ;;  %v3405_v47 = vmul.f32 -1.442695, %v5452_v25  ;;  %v3767_v54 = vpop.eup %3766  ;;  %v2146_v30 = vadd.f32 %v5457_v17, %v2145_v44 }
 0x217   : > { %v5464_v53 = vpop.eup %3768  ;;  %v5473_v61 = vadd.f32 1.0, %v3767_v54 }
 0x218   : > { %v2158_v28 = vmul.f32 %v5464_v53, %v5439_v14  ;;  %3772 = vpow2.f32 %v3405_v47  ;;  %vm2163_vm11 = vweird.f32 %v5464_v53  ;;  %v2150_v36 = vsel %vm5528_vm1, %v5457_v17, %v2146_v30 }
 0x219   : > { %v2424_v4 = vpop.f32.mrf.mxu2  ;;  %3774 = vrcp.f32 %v5473_v61  ;;  %vm5513_vm15 = vmor %vm2162_vm13, %vm2163_vm11  ;;  %v2155_v58 = vsel %vm2152_vm0, %v2154_v23, %v2150_v36  ;;  %v2183_v55 = vand.u32 2147483648, %v5473_v61  ;;  %vm2177_vm7 = vweird.f32 %v5473_v61 }
 0x21a   : > { %v2159_v13 = vsub.f32 1.0, %v2158_v28  ;;  %v5479_v62 = vadd.f32 %v5434_v10, %v2424_v4  ;;  %v2314_v59 = vmul.f32 %v2155_v58, %v5387_v22 }
 0x21c   : > { %v3771_v34 = vpop.eup %3770  ;;  %v2160_v16 = vmul.f32 %v5464_v53, %v2159_v13  ;;  %v3447_v45 = vmul.f32 -1.442695, %v5479_v62 }
 0x21d   : > { %v5475_v24 = vadd.f32 1.0, %v3771_v34 }
 0x21e   : > { %v3773_v3 = vpop.eup %3772  ;;  %v2161_v9 = vadd.f32 %v5464_v53, %v2160_v16 }
 0x21f   : > { %3776 = vrcp.f32 %v5475_v24  ;;  %v5490_v32 = vadd.f32 1.0, %v3773_v3  ;;  %v5496_v0 = vpop.eup %3774  ;;  %v2181_v3 = vand.u32 2147483647, %v5473_v61  ;;  %v2664_v50 = vand.u32 2147483647, %v5475_v24 }
 0x220   : > { %v1669_v51 = vpop.f32.mrf.mxu1  ;;  %v2165_v63 = vsel %vm5513_vm15, %v5464_v53, %v2161_v9  ;;  %v2173_v14 = vmul.f32 %v5496_v0, %v5473_v61  ;;  %vm2178_vm3 = vweird.f32 %v5496_v0  ;;  %vm2660_vm10 = vweird.f32 %v5475_v24 }
 0x221   : > { %v5486_v1 = vadd.f32 %v5151_v7, %v1669_v51  ;;  %3778 = vrcp.f32 %v5490_v32  ;;  %v2170_v47 = vsel %vm2167_vm2, %v2169_v41, %v2165_v63  ;;  %vm2192_vm5 = vweird.f32 %v5490_v32  ;;  %vm5589_vm9 = vmor %vm2177_vm7, %vm2178_vm3 }
 0x222   : > { %v2174_v15 = vsub.f32 1.0, %v2173_v14  ;;  %v2315_v20 = vmul.f32 %v2170_v47, %v5404_v5  ;;  %v2196_v46 = vand.u32 2147483647, %v5490_v32  ;;  %vm2182_vm12 = vcmp.eq.f32.partialorder %v2181_v3, 8.507059e+37 }
 0x223   : > { %v3406_v60 = vmul.f32 -1.442695, %v5486_v1  ;;  %vm2665_vm14 = vcmp.eq.f32.partialorder %v2664_v50, 8.507059e+37 }
 0x224   : > { %v2175_v38 = vmul.f32 %v5496_v0, %v2174_v15  ;;  %v2352_v44 = vpack.c.bf16 %v2315_v20, %v2314_v59  ;;  %vm2197_vm13 = vcmp.eq.f32.partialorder %v2196_v46, 8.507059e+37 }
 0x225   : > { %3780 = vpow2.f32 %v3406_v60  ;;  %v5506_v27 = vpop.eup %3776  ;;  %v2198_v60 = vand.u32 2147483648, %v5490_v32 }
 0x226   : > { %v2427_v39 = vpop.f32.mrf.mxu2  ;;  %3782 = vpow2.f32 %v3447_v45  ;;  %2466 = vmatmul.bf16.gmra.mxu2 %v2351_v33  ;;  %v2656_v37 = vmul.f32 %v5506_v27, %v5475_v24  ;;  %v2176_v33 = vadd.f32 %v5496_v0, %v2175_v38  ;;  %vm2661_vm6 = vweird.f32 %v5506_v27 }
 0x227   : > { %v5504_v48 = vadd.f32 %v5434_v10, %v2427_v39  ;;  %v5532_v8 = vpop.eup %3778  ;;  %v2199_v14 = vor.u32 1.1754944e-38, %v2198_v60  ;;  %vm5607_vm11 = vmor %vm2660_vm10, %vm2661_vm6 }
 0x228   : > { %v1671_v29 = vpop.f32.mrf.mxu1  ;;  %v2188_v54 = vmul.f32 %v5532_v8, %v5490_v32  ;;  %v2657_v28 = vsub.f32 1.0, %v2656_v37  ;;  %vm2193_vm4 = vweird.f32 %v5532_v8  ;;  %v2666_v32 = vand.u32 2147483648, %v5475_v24 }
 0x229   : > { %v3448_v2 = vmul.f32 -1.442695, %v5504_v48  ;;  %v5524_v12 = vadd.f32 %v5151_v7, %v1671_v29  ;;  %vm5580_vm8 = vmor %vm2192_vm5, %vm2193_vm4  ;;  %v2180_v63 = vsel %vm5589_vm9, %v5496_v0, %v2176_v33 }
 0x22a   : > { %v2189_v17 = vsub.f32 1.0, %v2188_v54  ;;  %v2658_v16 = vmul.f32 %v5506_v27, %v2657_v28  ;;  %v2667_v54 = vor.u32 1.1754944e-38, %v2666_v32 }
 0x22b   : > { %3784 = vpow2.f32 %v3448_v2  ;;  %v3407_v11 = vmul.f32 -1.442695, %v5524_v12  ;;  %v3781_v57 = vpop.eup %3780 }
 0x22c   : > { %v3783_v40 = vpop.eup %3782  ;;  %v5542_v53 = vadd.f32 1.0, %v3781_v57  ;;  %v2190_v49 = vmul.f32 %v5532_v8, %v2189_v17  ;;  %v2659_v30 = vadd.f32 %v5506_v27, %v2658_v16 }
 0x22d   : > { %3786 = vpow2.f32 %v3407_v11  ;;  %v5545_v26 = vadd.f32 1.0, %v3783_v40 }
 0x22e   : > { %v2429_v31 = vpop.f32.mrf.mxu2  ;;  %3788 = vrcp.f32 %v5542_v53  ;;  %v2191_v22 = vadd.f32 %v5532_v8, %v2190_v49  ;;  %v2663_v37 = vsel %vm5607_vm11, %v5506_v27, %v2659_v30  ;;  %vm2207_vm15 = vweird.f32 %v5542_v53 }
 0x22f   : > { %v5549_v4 = vadd.f32 %v5434_v10, %v2429_v31  ;;  %3790 = vrcp.f32 %v5545_v26  ;;  %v2679_v17 = vand.u32 2147483647, %v5545_v26  ;;  %v2681_v31 = vand.u32 2147483648, %v5545_v26 }
 0x230   : > { %v1674_v34 = vpop.f32.mrf.mxu1  ;;  %v2195_v61 = vsel %vm5580_vm8, %v5532_v8, %v2191_v22  ;;  %v2184_v8 = vor.u32 1.1754944e-38, %v2183_v55  ;;  %v2668_v20 = vsel %vm2665_vm14, %v2667_v54, %v2663_v37 }
 0x231   : > { %v3785_v13 = vpop.eup %3784  ;;  %v5555_v19 = vadd.f32 %v5151_v7, %v1674_v34  ;;  %v3449_v51 = vmul.f32 -1.442695, %v5549_v4  ;;  %v2200_v11 = vsel %vm2197_vm13, %v2199_v14, %v2195_v61  ;;  %v5643_v22 = vor.u32 1.1754944e-38, %v2681_v31 }
 0x232   : > { %v5557_v5 = vadd.f32 1.0, %v3785_v13  ;;  %v2185_v40 = vsel %vm2182_vm12, %v2184_v8, %v2180_v63  ;;  %v2317_v28 = vmul.f32 %v2200_v11, %v5452_v25  ;;  %vm2675_vm12 = vweird.f32 %v5545_v26 }
 0x233   : > { %v3787_v52 = vpop.eup %3786  ;;  %v3408_v45 = vmul.f32 -1.442695, %v5555_v19 }
 0x234   : > { %3792 = vrcp.f32 %v5557_v5  ;;  %v5570_v9 = vadd.f32 1.0, %v3787_v52  ;;  %v5575_v39 = vpop.eup %3788  ;;  %v2211_v52 = vand.u32 2147483647, %v5542_v53  ;;  %v2694_v32 = vand.u32 2147483647, %v5557_v5 }
 0x235   : > { %3794 = vpow2.f32 %v3449_v51  ;;  %v5603_v56 = vpop.eup %3790  ;;  %v2203_v24 = vmul.f32 %v5575_v39, %v5542_v53  ;;  %v2316_v51 = vmul.f32 %v2185_v40, %v5425_v6  ;;  %vm2208_vm1 = vweird.f32 %v5575_v39 }
 0x236   : > { %3796 = vrcp.f32 %v5570_v9  ;;  %2471 = vmatmul.bf16.gmra.mxu2 %v2352_v44  ;;  %v2671_v25 = vmul.f32 %v5603_v56, %v5545_v26  ;;  %v2213_v44 = vand.u32 2147483648, %v5542_v53  ;;  %vm5659_vm2 = vcmp.eq.f32.partialorder %v2211_v52, 8.507059e+37  ;;  %vm5698_vm7 = vmor %vm2207_vm15, %vm2208_vm1  ;;  %v3931_v53 = vld [vmem:[%s6625_s6] ss:$0 sm:$0xff] }
 0x237   : > { %3798 = vpow2.f32 %v3408_v45  ;;  %v2204_v49 = vsub.f32 1.0, %v2203_v24  ;;  %v5646_v45 = vmul.f32 %v2668_v20, %v5442_v35  ;;  %v2353_v50 = vpack.c.bf16 %v2317_v28, %v2316_v51 }
 0x238   : > { %v1676_v29 = vpop.f32.mrf.mxu1  ;;  %v2228_v63 = vand.u32 2147483648, %v5570_v9  ;;  %vm2222_vm3 = vweird.f32 %v5570_v9  ;;  %v2226_v11 = vand.u32 2147483647, %v5570_v9  ;;  %vm2690_vm4 = vweird.f32 %v5557_v5 }
 0x239   : > { %v5601_v2 = vadd.f32 %v5151_v7, %v1676_v29  ;;  %v2432_v36 = vpop.f32.mrf.mxu2  ;;  %v2205_v6 = vmul.f32 %v5575_v39, %v2204_v49  ;;  %vm5690_vm6 = vcmp.eq.f32.partialorder %v2694_v32, 8.507059e+37  ;;  %vm2676_vm11 = vweird.f32 %v5603_v56 }
 0x23a   : > { %v5613_v0 = vpop.eup %3792  ;;  %v5619_v57 = vadd.f32 %v5434_v10, %v2432_v36  ;;  %vm2227_vm9 = vcmp.eq.f32.partialorder %v2226_v11, 8.507059e+37 }
 0x23b   : > { %v3409_v23 = vmul.f32 -1.442695, %v5601_v2  ;;  %v3795_v47 = vpop.eup %3794  ;;  %v2686_v13 = vmul.f32 %v5613_v0, %v5557_v5  ;;  %v2206_v41 = vadd.f32 %v5575_v39, %v2205_v6  ;;  %vm2691_vm8 = vweird.f32 %v5613_v0 }
 0x23c   : > { %v5622_v15 = vpop.eup %3796  ;;  %v3450_v58 = vmul.f32 -1.442695, %v5619_v57  ;;  %v5632_v59 = vadd.f32 1.0, %v3795_v47  ;;  %v2214_v47 = vor.u32 1.1754944e-38, %v2213_v44  ;;  %vm5735_vm10 = vmor %vm2690_vm4, %vm2691_vm8  ;;  %vm5821_vm8 = vcmp.eq.f32.partialorder %v2679_v17, 8.507059e+37 }
 0x23d   : > { %3800 = vpow2.f32 %v3409_v23  ;;  %v3799_v27 = vpop.eup %3798  ;;  %v2218_v34 = vmul.f32 %v5622_v15, %v5570_v9  ;;  %v2687_v30 = vsub.f32 1.0, %v2686_v13  ;;  %vm2223_vm0 = vweird.f32 %v5622_v15 }
 0x23e   : > { %3802 = vpow2.f32 %v3450_v58  ;;  %v5634_v38 = vadd.f32 1.0, %v3799_v27  ;;  %v2696_v23 = vand.u32 2147483648, %v5557_v5  ;;  %vm5683_vm5 = vmor %vm2222_vm3, %vm2223_vm0  ;;  %v2210_v49 = vsel %vm5698_vm7, %v5575_v39, %v2206_v41 }
 0x23f   : > { %v2219_v16 = vsub.f32 1.0, %v2218_v34  ;;  %v2688_v37 = vmul.f32 %v5613_v0, %v2687_v30  ;;  %v2229_v34 = vor.u32 1.1754944e-38, %v2228_v63  ;;  %vm2705_vm1 = vweird.f32 %v5632_v59 }
 0x240   : > { %v1679_v3 = vpop.f32.mrf.mxu1  ;;  %3804 = vrcp.f32 %v5634_v38  ;;  %v2243_v5 = vand.u32 2147483648, %v5634_v38  ;;  %vm2237_vm13 = vweird.f32 %v5634_v38 }
 0x241   : > { %v2220_v33 = vmul.f32 %v5622_v15, %v2219_v16  ;;  %v2434_v60 = vpop.f32.mrf.mxu2  ;;  %v5651_v55 = vadd.f32 %v5151_v7, %v1679_v3  ;;  %3806 = vrcp.f32 %v5632_v59  ;;  %v2672_v7 = vsub.f32 1.0, %v2671_v25 }
 0x242   : > { %v5655_v21 = vadd.f32 %v5434_v10, %v2434_v60  ;;  %v2215_v60 = vsel %vm5659_vm2, %v2214_v47, %v2210_v49 }
 0x243   : > { %v3801_v46 = vpop.eup %3800  ;;  %v2221_v29 = vadd.f32 %v5622_v15, %v2220_v33  ;;  %v3410_v24 = vmul.f32 -1.442695, %v5651_v55  ;;  %v2673_v28 = vmul.f32 %v5603_v56, %v2672_v7  ;;  %v2697_v33 = vor.u32 1.1754944e-38, %v2696_v23 }
 0x244   : > { %v5663_v43 = vadd.f32 1.0, %v3801_v46  ;;  %v3803_v61 = vpop.eup %3802  ;;  %v3451_v14 = vmul.f32 -1.442695, %v5655_v21  ;;  %v2241_v7 = vand.u32 2147483647, %v5634_v38 }
 0x245   : > { %v5670_v8 = vadd.f32 1.0, %v3803_v61  ;;  %v2225_v27 = vsel %vm5683_vm5, %v5622_v15, %v2221_v29  ;;  %v2689_v15 = vadd.f32 %v5613_v0, %v2688_v37  ;;  %v5743_v35 = vadd.f32 %v5603_v56, %v2673_v28 }
 0x246   : > { %3808 = vrcp.f32 %v5663_v43  ;;  %v5674_v36 = vpop.eup %3804  ;;  %2476 = vmatmul.bf16.gmra.mxu2 %v2353_v50  ;;  %v2230_v39 = vsel %vm2227_vm9, %v2229_v34, %v2225_v27  ;;  %vm5766_vm15 = vcmp.eq.f32.partialorder %v2241_v7, 8.507059e+37  ;;  %v2244_v27 = vor.u32 1.1754944e-38, %v2243_v5 }
 0x247   : > { %3810 = vpow2.f32 %v3451_v14  ;;  %v5688_v58 = vpop.eup %3806  ;;  %v2233_v20 = vmul.f32 %v5674_v36, %v5634_v38  ;;  %v2693_v29 = vsel %vm5735_vm10, %v5613_v0, %v2689_v15  ;;  %v2319_v63 = vmul.f32 %v2230_v39, %v5524_v12  ;;  %vm5842_vm10 = vmor %vm2675_vm12, %vm2676_vm11 }
 0x248   : > { %3812 = vrcp.f32 %v5670_v8  ;;  %v1681_v40 = vpop.f32.mrf.mxu1  ;;  %v2701_v44 = vmul.f32 %v5688_v58, %v5632_v59  ;;  %v2709_v12 = vand.u32 2147483647, %v5632_v59  ;;  %v2698_v47 = vsel %vm5690_vm6, %v2697_v33, %v2693_v29 }
 0x249   : > { %v2437_v13 = vpop.f32.mrf.mxu2  ;;  %3814 = vpow2.f32 %v3410_v24  ;;  %v5714_v51 = vadd.f32 %v3931_v53, %v1681_v40  ;;  %v2234_v3 = vsub.f32 1.0, %v2233_v20  ;;  %v2318_v24 = vmul.f32 %v2215_v60, %v5486_v1 }
 0x24a   : > { %v5719_v52 = vadd.f32 %v5434_v10, %v2437_v13  ;;  %v2702_v11 = vsub.f32 1.0, %v2701_v44  ;;  %v2711_v40 = vand.u32 2147483648, %v5632_v59  ;;  %vm2238_vm14 = vweird.f32 %v5674_v36 }
 0x24b   : > { %v3411_v25 = vmul.f32 -1.442695, %v5714_v51  ;;  %v2235_v37 = vmul.f32 %v5674_v36, %v2234_v3  ;;  %v2354_v28 = vpack.c.bf16 %v2319_v63, %v2318_v24  ;;  %vm5782_vm0 = vcmp.eq.f32.partialorder %v2709_v12, 8.507059e+37  ;;  %vm5801_vm5 = vmor %vm2237_vm13, %vm2238_vm14 }
 0x24c   : > { %v5721_v16 = vpop.eup %3808  ;;  %v3452_v30 = vmul.f32 -1.442695, %v5719_v52  ;;  %v2703_v34 = vmul.f32 %v5688_v58, %v2702_v11  ;;  %v5789_v44 = vmul.f32 %v2698_v47, %v5504_v48  ;;  %vm2252_vm3 = vweird.f32 %v5663_v43 }
 0x24d   : > { %v3811_v6 = vpop.eup %3810  ;;  %v2248_v46 = vmul.f32 %v5721_v16, %v5663_v43  ;;  %3816 = vpow2.f32 %v3411_v25  ;;  %v2236_v49 = vadd.f32 %v5674_v36, %v2235_v37  ;;  %vm2253_vm2 = vweird.f32 %v5721_v16 }
 0x24e   : > { %v5731_v50 = vpop.eup %3812  ;;  %v5740_v61 = vadd.f32 1.0, %v3811_v6  ;;  %v2256_v6 = vand.u32 2147483647, %v5663_v43  ;;  %v2258_v33 = vand.u32 2147483648, %v5663_v43  ;;  %vm2720_vm4 = vweird.f32 %v5670_v8  ;;  %vm5811_vm7 = vmor %vm2252_vm3, %vm2253_vm2 }
 0x24f   : > { %v2249_v14 = vsub.f32 1.0, %v2248_v46  ;;  %v3815_v41 = vpop.eup %3814  ;;  %v2716_v23 = vmul.f32 %v5731_v50, %v5670_v8  ;;  %v2724_v46 = vand.u32 2147483647, %v5670_v8  ;;  %vm2706_vm6 = vweird.f32 %v5688_v58 }
 0x250   : > { %3818 = vrcp.f32 %v5740_v61  ;;  %v5762_v1 = vadd.f32 1.0, %v3815_v41  ;;  %v2240_v43 = vsel %vm5801_vm5, %v5674_v36, %v2236_v49  ;;  %v2739_v38 = vand.u32 2147483647, %v5740_v61  ;;  %vm2707_vm11 = vmor %vm2705_vm1, %vm2706_vm6 }
 0x251   : > { %v2250_v0 = vmul.f32 %v5721_v16, %v2249_v14  ;;  %3820 = vpow2.f32 %v3452_v30  ;;  %v2439_v54 = vpop.f32.mrf.mxu2  ;;  %v2717_v13 = vsub.f32 1.0, %v2716_v23  ;;  %v2726_v30 = vand.u32 2147483648, %v5670_v8 }
 0x252   : > { %v5771_v20 = vadd.f32 %v5434_v10, %v2439_v54  ;;  %3822 = vrcp.f32 %v5762_v1  ;;  %v2704_v14 = vadd.f32 %v5688_v58, %v2703_v34  ;;  %vm2257_vm9 = vcmp.eq.f32.partialorder %v2256_v6, 8.507059e+37 }
 0x253   : > { %v3817_v9 = vpop.eup %3816  ;;  %v2251_v53 = vadd.f32 %v5721_v16, %v2250_v0  ;;  %v2718_v36 = vmul.f32 %v5731_v50, %v2717_v13  ;;  %v2259_v24 = vor.u32 1.1754944e-38, %v2258_v33  ;;  %v2741_v37 = vand.u32 2147483648, %v5740_v61 }
 0x254   : > { %v3453_v15 = vmul.f32 -1.442695, %v5771_v20  ;;  %v5780_v39 = vadd.f32 1.0, %v3817_v9  ;;  %vm5846_vm13 = vcmp.eq.f32.partialorder %v2724_v46, 8.507059e+37  ;;  %v2727_v23 = vor.u32 1.1754944e-38, %v2726_v30 }
 0x255   : > { %v2255_v63 = vsel %vm5811_vm7, %v5721_v16, %v2251_v53  ;;  %v2712_v12 = vor.u32 1.1754944e-38, %v2711_v40  ;;  %v2678_v47 = vsel %vm5842_vm10, %v5603_v56, %v5743_v35  ;;  %vm2721_vm14 = vweird.f32 %v5731_v50 }
 0x256   : > { %v5786_v25 = vpop.eup %3818  ;;  %3824 = vpow2.f32 %v3453_v15  ;;  %2481 = vmatmul.bf16.gmra.mxu2 %v2354_v28  ;;  %v2245_v26 = vsel %vm5766_vm15, %v2244_v27, %v2240_v43  ;;  %v2260_v54 = vsel %vm2257_vm9, %v2259_v24, %v2255_v63  ;;  %v2719_v40 = vadd.f32 %v5731_v50, %v2718_v36  ;;  %vm5887_vm15 = vmor %vm2720_vm4, %vm2721_vm14 }
 0x257   : > { %v3821_v60 = vpop.eup %3820  ;;  %3826 = vrcp.f32 %v5780_v39  ;;  %v2731_v5 = vmul.f32 %v5786_v25, %v5740_v61  ;;  %vm2735_vm12 = vweird.f32 %v5740_v61  ;;  %vm5865_vm2 = vcmp.eq.f32.partialorder %v2739_v38, 8.507059e+37 }
 0x258   : > { %v5815_v7 = vadd.f32 1.0, %v3821_v60  ;;  %v5832_v41 = vpop.eup %3822  ;;  %v2708_v56 = vsel %vm2707_vm11, %v5688_v58, %v2704_v14  ;;  %v2742_v34 = vor.u32 1.1754944e-38, %v2741_v37  ;;  %v2320_v13 = vmul.f32 %v2245_v26, %v5555_v19 }
 0x259   : > { %v5835_v17 = vpop.f32.mrf.mxu2  ;;  %v2263_v0 = vmul.f32 %v5832_v41, %v5762_v1  ;;  %v2732_v28 = vsub.f32 1.0, %v2731_v5  ;;  %v2713_v59 = vsel %vm5782_vm0, %v2712_v12, %v2708_v56  ;;  %v2321_v53 = vmul.f32 %v2260_v54, %v5601_v2 }
 0x25a   : > { %3828 = vrcp.f32 %v5815_v7  ;;  %vm2267_vm1 = vweird.f32 %v5762_v1  ;;  %vm2736_vm0 = vweird.f32 %v5786_v25  ;;  %v5895_v19 = vmul.f32 %v2713_v59, %v5549_v4 }
 0x25b   : > { %v2733_v27 = vmul.f32 %v5786_v25, %v2732_v28  ;;  %v2264_v15 = vsub.f32 1.0, %v2263_v0  ;;  %v2723_v2 = vsel %vm5887_vm15, %v5731_v50, %v2719_v40  ;;  %v2683_v60 = vsel %vm5821_vm8, %v5643_v22, %v2678_v47  ;;  %vm2737_vm4 = vmor %vm2735_vm12, %vm2736_vm0 }
 0x25c   : > { %v3825_v9 = vpop.eup %3824  ;;  %v2271_v46 = vand.u32 2147483647, %v5762_v1  ;;  %v2273_v30 = vand.u32 2147483648, %v5762_v1  ;;  %vm2282_vm3 = vweird.f32 %v5780_v39  ;;  %v2355_v38 = vpack.c.bf16 %v2321_v53, %v2320_v13 }
 0x25d   : > { %v5870_v35 = vpop.eup %3826  ;;  %v5872_v31 = vadd.f32 1.0, %v3825_v9  ;;  %v2734_v48 = vadd.f32 %v5786_v25, %v2733_v27  ;;  %v2265_v50 = vmul.f32 %v5832_v41, %v2264_v15  ;;  %v2728_v22 = vsel %vm5846_vm13, %v2727_v23, %v2723_v2 }
 0x25e   : > { %v2278_v6 = vmul.f32 %v5870_v35, %v5780_v39  ;;  %v3140_v36 = vpack.c.bf16 %v5895_v19, %v5789_v44  ;;  %v5923_v63 = vmul.f32 %v2683_v60, %v5479_v62  ;;  %vm2283_vm5 = vweird.f32 %v5870_v35 }
 0x25f   : > { %3830 = vrcp.f32 %v5872_v31  ;;  %v2738_v29 = vsel %vm2737_vm4, %v5786_v25, %v2734_v48  ;;  %v2286_v61 = vand.u32 2147483647, %v5780_v39  ;;  %vm2268_vm6 = vweird.f32 %v5832_v41  ;;  %vm5948_vm9 = vmor %vm2282_vm3, %vm2283_vm5 }
 0x260   : > { %v5881_v33 = vpop.eup %3828  ;;  %v2279_v3 = vsub.f32 1.0, %v2278_v6  ;;  %v2288_v37 = vand.u32 2147483648, %v5780_v39  ;;  %v2743_v25 = vsel %vm5865_vm2, %v2742_v34, %v2738_v29  ;;  %v3139_v62 = vpack.c.bf16 %v5923_v63, %v5646_v45  ;;  %vm5960_vm10 = vmor %vm2267_vm1, %vm2268_vm6 }
 0x261   : > { %v2746_v8 = vmul.f32 %v5881_v33, %v5815_v7  ;;  %v5908_v4 = vpop.f32.mrf.mxu2  ;;  %vm2751_vm7 = vweird.f32 %v5881_v33  ;;  %v2266_v11 = vadd.f32 %v5832_v41, %v2265_v50  ;;  %v5940_v0 = vmul.f32 %v2728_v22, %v5619_v57 }
 0x262   : > { %v2280_v32 = vmul.f32 %v5870_v35, %v2279_v3  ;;  %vm2750_vm8 = vweird.f32 %v5815_v7  ;;  %v2756_v12 = vand.u32 2147483648, %v5815_v7  ;;  %v5953_v26 = vmul.f32 %v2743_v25, %v5655_v21 }
 0x263   : > { %v2747_v43 = vsub.f32 1.0, %v2746_v8  ;;  %v2754_v54 = vand.u32 2147483647, %v5815_v7  ;;  %vm2287_vm13 = vcmp.eq.f32.partialorder %v2286_v61, 8.507059e+37  ;;  %vm5967_vm14 = vmor %vm2750_vm8, %vm2751_vm7  ;;  %v2769_v21 = vand.u32 2147483647, %v5872_v31 }
 0x264   : > { %v2281_v14 = vadd.f32 %v5870_v35, %v2280_v32  ;;  %v2771_v7 = vand.u32 2147483648, %v5872_v31  ;;  %v2289_v40 = vor.u32 1.1754944e-38, %v2288_v37  ;;  %v3141_v49 = vpack.c.bf16 %v5953_v26, %v5940_v0 }
 0x265   : > { %v2748_v5 = vmul.f32 %v5881_v33, %v2747_v43  ;;  %v3831_v24 = vpop.eup %3830  ;;  %v2757_v34 = vor.u32 1.1754944e-38, %v2756_v12  ;;  %v2274_v59 = vor.u32 1.1754944e-38, %v2273_v30  ;;  %vm2755_vm12 = vcmp.eq.f32.partialorder %v2754_v54, 8.507059e+37 }
 0x266   : > { %v2761_v23 = vmul.f32 %v3831_v24, %v5872_v31  ;;  %2486 = vmatmul.bf16.gmra.mxu2 %v2355_v38  ;;  %v2285_v39 = vsel %vm5948_vm9, %v5870_v35, %v2281_v14  ;;  %v2270_v35 = vsel %vm5960_vm10, %v5832_v41, %v2266_v11  ;;  %vm2766_vm11 = vweird.f32 %v3831_v24 }
 0x267   : > { %v2749_v16 = vadd.f32 %v5881_v33, %v2748_v5  ;;  %v2290_v13 = vsel %vm2287_vm13, %v2289_v40, %v2285_v39  ;;  %vm2272_vm2 = vcmp.eq.f32.partialorder %v2271_v46, 8.507059e+37  ;;  %vm2765_vm15 = vweird.f32 %v5872_v31 }
 0x268   : > { %v2762_v28 = vsub.f32 1.0, %v2761_v23  ;;  %v2275_v6 = vsel %vm2272_vm2, %v2274_v59, %v2270_v35  ;;  %vm2767_vm1 = vmor %vm2765_vm15, %vm2766_vm11  ;;  %v2772_v58 = vor.u32 1.1754944e-38, %v2771_v7  ;;  %vm2770_vm0 = vcmp.eq.f32.partialorder %v2769_v21, 8.507059e+37 }
 0x269   : > { %v2447_v1 = vpop.f32.mrf.mxu2  ;;  %v2753_v56 = vsel %vm5967_vm14, %v5881_v33, %v2749_v16  ;;  %v2323_v33 = vmul.f32 %v2290_v13, %v5714_v51  ;;  %v2322_v3 = vmul.f32 %v2275_v6, %v5651_v55  ;;  %v6001_v55 = vadd.f32 %v5434_v10, %v5835_v17 }
 0x26a   : > { %v2763_v27 = vmul.f32 %v3831_v24, %v2762_v28  ;;  %v2758_v15 = vsel %vm2755_vm12, %v2757_v34, %v2753_v56  ;;  %v5996_v43 = vadd.f32 %v5434_v10, %v2447_v1 }
 0x26b   : > { %v5984_v41 = vmul.f32 %v2758_v15, %v5719_v52  ;;  %v2356_v30 = vpack.c.bf16 %v2323_v33, %v2322_v3  ;;  %v6005_v52 = vadd.f32 %v5434_v10, %v5908_v4  ;;  %v3454_v38 = vmul.f32 -1.442695, %v6001_v55 }
 0x26c   : > { %v2764_v53 = vadd.f32 %v3831_v24, %v2763_v27 }
 0x26d   : > { %v3455_v29 = vmul.f32 -1.442695, %v6005_v52 }
 0x26e   : > { %v2768_v2 = vsel %vm2767_vm1, %v3831_v24, %v2764_v53  ;;  %v6046_v53 = vadd.f32 %v5434_v10, %v5410_v42 }
 0x26f   : > { %v2773_v8 = vsel %vm2770_vm0, %v2772_v58, %v2768_v2 }
 0x270   : > { %v5988_v60 = vmul.f32 %v2773_v8, %v5771_v20  ;;  %v3456_v20 = vmul.f32 -1.442695, %v5996_v43 }
 0x271   : > { %v2449_v46 = vpop.f32.mrf.mxu2 }
 0x272   : > { %v3142_v31 = vpack.c.bf16 %v5988_v60, %v5984_v41  ;;  %v5993_v48 = vadd.f32 %v5434_v10, %v2449_v46 }
 0x274   : > { %v3457_v51 = vmul.f32 -1.442695, %v5993_v48 }
 0x276   : > { %2491 = vmatmul.bf16.gmra.mxu2 %v2356_v30  ;;  %3832 = vpow2.f32 %v3457_v51  ;;  %v3445_v30 = vmul.f32 -1.442695, %v6046_v53 }
 0x277   : > { %3834 = vpow2.f32 %v3456_v20 }
 0x279   : > { %v2452_v50 = vpop.f32.mrf.mxu2 }
 0x27a   : > { %v6009_v32 = vadd.f32 %v5434_v10, %v2452_v50 }
 0x27c   : > { %v3458_v22 = vmul.f32 -1.442695, %v6009_v32  ;;  %v3833_v17 = vpop.eup %3832 }
 0x27d   : > { %v3835_v14 = vpop.eup %3834  ;;  %v6017_v24 = vadd.f32 1.0, %v3833_v17 }
 0x27e   : > { %3836 = vpow2.f32 %v3458_v22  ;;  %v6020_v11 = vadd.f32 1.0, %v3835_v14 }
 0x27f   : > { %3838 = vpow2.f32 %v3454_v38  ;;  %vm2825_vm11 = vweird.f32 %v6017_v24 }
 0x280   : > { %3840 = vpow2.f32 %v3455_v29  ;;  %vm2810_vm7 = vweird.f32 %v6020_v11 }
 0x281   : > { %v2454_v4 = vpop.f32.mrf.mxu2 }
 0x282   : > { %v6015_v5 = vadd.f32 %v5434_v10, %v2454_v4 }
 0x284   : > { %v3837_v61 = vpop.eup %3836  ;;  %v3459_v37 = vmul.f32 -1.442695, %v6015_v5 }
 0x285   : > { %v2607_v25 = vadd.f32 1.0, %v3837_v61  ;;  %v3839_v16 = vpop.eup %3838 }
 0x286   : > { %3842 = vpow2.f32 %v3459_v37  ;;  %v3841_v23 = vpop.eup %3840  ;;  %v6023_v12 = vadd.f32 1.0, %v3839_v16  ;;  %v2831_v16 = vand.u32 2147483648, %v6017_v24 }
 0x287   : > { %3844 = vrcp.f32 %v2607_v25  ;;  %v6027_v54 = vadd.f32 1.0, %v3841_v23  ;;  %v2846_v3 = vand.u32 2147483648, %v2607_v25  ;;  %vm2840_vm4 = vweird.f32 %v2607_v25 }
 0x288   : > { %3846 = vrcp.f32 %v6017_v24  ;;  %v2844_v42 = vand.u32 2147483647, %v2607_v25 }
 0x289   : > { %v6025_v47 = vpop.f32.mrf.mxu2  ;;  %3848 = vrcp.f32 %v6020_v11  ;;  %v2847_v61 = vor.u32 1.1754944e-38, %v2846_v3 }
 0x28a   : > { %3850 = vrcp.f32 %v6023_v12  ;;  %vm2845_vm13 = vcmp.eq.f32.partialorder %v2844_v42, 8.507059e+37 }
 0x28b   : > { %3852 = vrcp.f32 %v6027_v54 }
 0x28c   : > { %v3843_v57 = vpop.eup %3842 }
 0x28d   : > { %v3845_v28 = vpop.eup %3844  ;;  %v2608_v39 = vadd.f32 1.0, %v3843_v57 }
 0x28e   : > { %v6031_v9 = vpop.eup %3846  ;;  %v2836_v21 = vmul.f32 %v3845_v28, %v2607_v25  ;;  %vm2841_vm3 = vweird.f32 %v3845_v28 }
 0x28f   : > { %3854 = vrcp.f32 %v2608_v39  ;;  %v6034_v7 = vpop.eup %3848  ;;  %v2821_v1 = vmul.f32 %v6031_v9, %v6017_v24  ;;  %vm6056_vm5 = vmor %vm2840_vm4, %vm2841_vm3  ;;  %v2861_v22 = vand.u32 2147483648, %v2608_v39  ;;  %v2859_v4 = vand.u32 2147483647, %v2608_v39 }
 0x290   : > { %v2837_v40 = vsub.f32 1.0, %v2836_v21  ;;  %v6038_v35 = vpop.eup %3850  ;;  %v2806_v27 = vmul.f32 %v6034_v7, %v6020_v11  ;;  %vm2855_vm8 = vweird.f32 %v2608_v39  ;;  %vm2811_vm9 = vweird.f32 %v6034_v7 }
 0x291   : > { %v2459_v56 = vpop.f32.mrf.mxu2  ;;  %v6042_v59 = vpop.eup %3852  ;;  %v2822_v15 = vsub.f32 1.0, %v2821_v1  ;;  %v2776_v6 = vmul.f32 %v6038_v35, %v6023_v12  ;;  %vm2826_vm10 = vweird.f32 %v6031_v9  ;;  %v2862_v21 = vor.u32 1.1754944e-38, %v2861_v22  ;;  %vm6095_vm15 = vmor %vm2810_vm7, %vm2811_vm9 }
 0x292   : > { %v2838_v34 = vmul.f32 %v3845_v28, %v2837_v40  ;;  %v2807_v2 = vsub.f32 1.0, %v2806_v27  ;;  %v2791_v8 = vmul.f32 %v6042_v59, %v6027_v54  ;;  %v2829_v40 = vand.u32 2147483647, %v6017_v24  ;;  %vm6073_vm2 = vmor %vm2825_vm11, %vm2826_vm10 }
 0x293   : > { %v2823_v51 = vmul.f32 %v6031_v9, %v2822_v15  ;;  %v2777_v10 = vsub.f32 1.0, %v2776_v6  ;;  %vm2860_vm12 = vcmp.eq.f32.partialorder %v2859_v4, 8.507059e+37  ;;  %v2816_v1 = vand.u32 2147483648, %v6020_v11 }
 0x294   : > { %v2839_v33 = vadd.f32 %v3845_v28, %v2838_v34  ;;  %v2808_v29 = vmul.f32 %v6034_v7, %v2807_v2  ;;  %v2792_v14 = vsub.f32 1.0, %v2791_v8  ;;  %v6080_v34 = vld [vmem:[%s6627_s8] ss:$0 sm:$0xff]  ;;  %vm2830_vm1 = vcmp.eq.f32.partialorder %v2829_v40, 8.507059e+37 }
 0x295   : > { %v3855_v13 = vpop.eup %3854  ;;  %v2824_v25 = vadd.f32 %v6031_v9, %v2823_v51  ;;  %v6101_v3 = vadd.f32 %v6080_v34, %v6025_v47  ;;  %3856 = vpow2.f32 %v3445_v30  ;;  %vm2796_vm0 = vweird.f32 %v6042_v59 }
 0x296   : > { %v2851_v58 = vmul.f32 %v3855_v13, %v2608_v39  ;;  %vm2856_vm6 = vweird.f32 %v3855_v13  ;;  %v2843_v17 = vsel %vm6056_vm5, %v3845_v28, %v2839_v33  ;;  %v2809_v28 = vadd.f32 %v6034_v7, %v2808_v29 }
 0x297   : > { %vm2857_vm14 = vmor %vm2855_vm8, %vm2856_vm6  ;;  %v2848_v23 = vsel %vm2845_vm13, %v2847_v61, %v2843_v17  ;;  %v2814_v39 = vand.u32 2147483647, %v6020_v11  ;;  %v2793_v24 = vmul.f32 %v6042_v59, %v2792_v14  ;;  %v2828_v6 = vsel %vm6073_vm2, %v6031_v9, %v2824_v25 }
 0x298   : > { %v2852_v46 = vsub.f32 1.0, %v2851_v58  ;;  %v3119_v2 = vmul.f32 %v2848_v23, %v6009_v32  ;;  %v2778_v9 = vmul.f32 %v6038_v35, %v2777_v10  ;;  %v2813_v32 = vsel %vm6095_vm15, %v6034_v7, %v2809_v28 }
 0x299   : > { %v6054_v20 = vpop.f32.mrf.mxu2  ;;  %v6109_v11 = vadd.f32 %v6080_v34, %v5384_v18  ;;  %v2794_v47 = vadd.f32 %v6042_v59, %v2793_v24  ;;  %vm2815_vm3 = vcmp.eq.f32.partialorder %v2814_v39, 8.507059e+37  ;;  %vm2795_vm4 = vweird.f32 %v6027_v54 }
 0x29a   : > { %v2853_v38 = vmul.f32 %v3855_v13, %v2852_v46  ;;  %v2817_v46 = vor.u32 1.1754944e-38, %v2816_v1  ;;  %v2801_v7 = vand.u32 2147483648, %v6027_v54  ;;  %v3460_v50 = vmul.f32 -1.442695, %v6101_v3  ;;  %vm6123_vm6 = vmor %vm2795_vm4, %vm2796_vm0 }
 0x29b   : > { %v2779_v18 = vadd.f32 %v6038_v35, %v2778_v9  ;;  %vm2781_vm5 = vweird.f32 %v6038_v35  ;;  %v3444_v22 = vmul.f32 -1.442695, %v6109_v11  ;;  %v2786_v29 = vand.u32 2147483648, %v6023_v12 }
 0x29c   : > { %v2854_v37 = vadd.f32 %v3855_v13, %v2853_v38  ;;  %v2818_v10 = vsel %vm2815_vm3, %v2817_v46, %v2813_v32  ;;  %v2799_v38 = vand.u32 2147483647, %v6027_v54  ;;  %vm2780_vm7 = vweird.f32 %v6023_v12 }
 0x29d   : > { %v2784_v4 = vand.u32 2147483647, %v6023_v12  ;;  %v2798_v14 = vsel %vm6123_vm6, %v6042_v59, %v2794_v47  ;;  %v3117_v54 = vmul.f32 %v2818_v10, %v5996_v43  ;;  %vm2782_vm8 = vmor %vm2780_vm7, %vm2781_vm5  ;;  %v2802_v61 = vor.u32 1.1754944e-38, %v2801_v7 }
 0x29e   : > { %v2858_v57 = vsel %vm2857_vm14, %v3855_v13, %v2854_v37  ;;  %v6083_v13 = vadd.f32 %v6080_v34, %v2459_v56  ;;  %v2832_v56 = vor.u32 1.1754944e-38, %v2831_v16  ;;  %v3857_v37 = vpop.eup %3856  ;;  %v2783_v25 = vsel %vm2782_vm8, %v6038_v35, %v2779_v18 }
 0x29f   : > { %v2863_v15 = vsel %vm2860_vm12, %v2862_v21, %v2858_v57  ;;  %vm2800_vm9 = vcmp.eq.f32.partialorder %v2799_v38, 8.507059e+37  ;;  %v2787_v23 = vor.u32 1.1754944e-38, %v2786_v29  ;;  %vm2785_vm10 = vcmp.eq.f32.partialorder %v2784_v4, 8.507059e+37 }
 0x2a0   : > { %v3120_v33 = vmul.f32 %v2863_v15, %v6015_v5  ;;  %v2833_v51 = vsel %vm2830_vm1, %v2832_v56, %v2828_v6  ;;  %v3461_v42 = vmul.f32 -1.442695, %v6083_v13  ;;  %v2803_v57 = vsel %vm2800_vm9, %v2802_v61, %v2798_v14 }
 0x2a1   : > { %v2464_v58 = vpop.f32.mrf.mxu2  ;;  %v3118_v30 = vmul.f32 %v2833_v51, %v5993_v48  ;;  %v2788_v21 = vsel %vm2785_vm10, %v2787_v23, %v2783_v25  ;;  %v3116_v59 = vmul.f32 %v2803_v57, %v6005_v52  ;;  %v6141_v27 = vadd.f32 1.0, %v3857_v37 }
 0x2a2   : > { %v3145_v5 = vpack.c.bf16 %v3120_v33, %v3119_v2  ;;  %3858 = vpow2.f32 %v3461_v42  ;;  %v6136_v43 = vadd.f32 %v6080_v34, %v2464_v58  ;;  %v3115_v40 = vmul.f32 %v2788_v21, %v6001_v55 }
 0x2a3   : > { %3860 = vpow2.f32 %v3460_v50  ;;  %v3144_v16 = vpack.c.bf16 %v3118_v30, %v3117_v54  ;;  %v6145_v15 = vadd.f32 %v6080_v34, %v6054_v20  ;;  %vm2645_vm4 = vweird.f32 %v6141_v27 }
 0x2a4   : > { %3154 = vmatpush.bf16.xpose.msra.mxu3 %v3145_v5  ;;  %3862 = vpow2.f32 %v3444_v22  ;;  %v3143_v6 = vpack.c.bf16 %v3116_v59, %v3115_v40  ;;  %v3463_v52 = vmul.f32 -1.442695, %v6136_v43  ;;  %v2651_v59 = vand.u32 2147483648, %v6141_v27 }
 0x2a5   : > { %v3462_v55 = vmul.f32 -1.442695, %v6145_v15 }
 0x2a8   : > { %v3859_v12 = vpop.eup %3858 }
 0x2a9   : > { %v2467_v48 = vpop.f32.mrf.mxu2  ;;  %v3861_v28 = vpop.eup %3860  ;;  %v6139_v39 = vadd.f32 1.0, %v3859_v12 }
 0x2aa   : > { %v3863_v1 = vpop.eup %3862  ;;  %v6147_v24 = vadd.f32 1.0, %v3861_v28 }
 0x2ab   : > { %v6150_v2 = vadd.f32 1.0, %v3863_v1  ;;  %3864 = vrcp.f32 %v6139_v39  ;;  %v2891_v37 = vand.u32 2147483648, %v6139_v39  ;;  %vm2885_vm15 = vweird.f32 %v6139_v39 }
 0x2ac   : > { %3155 = vmatpush.bf16.xpose.msra.mxu3 %v3144_v16  ;;  %3866 = vrcp.f32 %v6141_v27  ;;  %v2889_v16 = vand.u32 2147483647, %v6139_v39  ;;  %vm2870_vm1 = vweird.f32 %v6147_v24  ;;  %v2876_v57 = vand.u32 2147483648, %v6147_v24 }
 0x2ad   : > { %3868 = vrcp.f32 %v6147_v24  ;;  %v2636_v30 = vand.u32 2147483648, %v6150_v2  ;;  %vm2630_vm13 = vweird.f32 %v6150_v2  ;;  %v2634_v14 = vand.u32 2147483647, %v6150_v2 }
 0x2ae   : > { %3870 = vpow2.f32 %v3463_v52  ;;  %v2874_v40 = vand.u32 2147483647, %v6147_v24  ;;  %vm2890_vm5 = vcmp.eq.f32.partialorder %v2889_v16, 8.507059e+37 }
 0x2af   : > { %3872 = vrcp.f32 %v6150_v2  ;;  %v2637_v26 = vor.u32 1.1754944e-38, %v2636_v30  ;;  %vm2635_vm10 = vcmp.eq.f32.partialorder %v2634_v14, 8.507059e+37 }
 0x2b0   : > { %3874 = vpow2.f32 %v3462_v55  ;;  %vm2875_vm8 = vcmp.eq.f32.partialorder %v2874_v40, 8.507059e+37 }
 0x2b1   : > { %v2469_v35 = vpop.f32.mrf.mxu2  ;;  %v6157_v58 = vpop.eup %3864 }
 0x2b2   : > { %v6159_v33 = vpop.eup %3866  ;;  %v2881_v9 = vmul.f32 %v6157_v58, %v6139_v39  ;;  %v6173_v51 = vadd.f32 %v6080_v34, %v2469_v35  ;;  %vm2886_vm14 = vweird.f32 %v6157_v58 }
 0x2b3   : > { %v6161_v8 = vpop.eup %3868  ;;  %v2641_v41 = vmul.f32 %v6159_v33, %v6141_v27  ;;  %vm2646_vm12 = vweird.f32 %v6159_v33  ;;  %vm6217_vm0 = vmor %vm2885_vm15, %vm2886_vm14 }
 0x2b4   : > { %3156 = vmatpush.bf16.xpose.msra.mxu3 %v3143_v6  ;;  %v3871_v56 = vpop.eup %3870  ;;  %v2866_v46 = vmul.f32 %v6161_v8, %v6147_v24  ;;  %v2882_v60 = vsub.f32 1.0, %v2881_v9  ;;  %v3465_v18 = vmul.f32 -1.442695, %v6173_v51  ;;  %vm2871_vm2 = vweird.f32 %v6161_v8  ;;  %vm6254_vm6 = vmor %vm2645_vm4, %vm2646_vm12 }
 0x2b5   : > { %v6168_v32 = vpop.eup %3872  ;;  %v6175_v42 = vadd.f32 1.0, %v3871_v56  ;;  %v2642_v38 = vsub.f32 1.0, %v2641_v41  ;;  %vm6238_vm3 = vmor %vm2870_vm1, %vm2871_vm2  ;;  %v2649_v24 = vand.u32 2147483647, %v6141_v27  ;;  %v2877_v56 = vor.u32 1.1754944e-38, %v2876_v57 }
 0x2b6   : > { %v3875_v5 = vpop.eup %3874  ;;  %v2626_v7 = vmul.f32 %v6168_v32, %v6150_v2  ;;  %v2867_v50 = vsub.f32 1.0, %v2866_v46  ;;  %v2883_v22 = vmul.f32 %v6157_v58, %v2882_v60  ;;  %vm2631_vm11 = vweird.f32 %v6168_v32 }
 0x2b7   : > { %v6184_v10 = vadd.f32 1.0, %v3875_v5  ;;  %3876 = vrcp.f32 %v6175_v42  ;;  %v2643_v0 = vmul.f32 %v6159_v33, %v2642_v38  ;;  %vm6267_vm7 = vmor %vm2630_vm13, %vm2631_vm11  ;;  %v2652_v60 = vor.u32 1.1754944e-38, %v2651_v59 }
 0x2b8   : > { %v2627_v17 = vsub.f32 1.0, %v2626_v7  ;;  %v2868_v4 = vmul.f32 %v6161_v8, %v2867_v50  ;;  %vm2650_vm9 = vcmp.eq.f32.partialorder %v2649_v24, 8.507059e+37  ;;  %vm2915_vm11 = vweird.f32 %v6175_v42 }
 0x2b9   : > { %v2472_v20 = vpop.f32.mrf.mxu2  ;;  %3878 = vrcp.f32 %v6184_v10  ;;  %v2644_v21 = vadd.f32 %v6159_v33, %v2643_v0  ;;  %vm2900_vm12 = vweird.f32 %v6184_v10  ;;  %v2904_v57 = vand.u32 2147483647, %v6184_v10 }
 0x2ba   : > { %3880 = vpow2.f32 %v3465_v18  ;;  %v2628_v61 = vmul.f32 %v6168_v32, %v2627_v17  ;;  %v2869_v25 = vadd.f32 %v6161_v8, %v2868_v4  ;;  %v6233_v1 = vadd.f32 %v6080_v34, %v2472_v20 }
 0x2bc   : > { %3157 = vmatpush.bf16.xpose.msra.mxu3 %v3142_v31  ;;  %v6180_v31 = vadd.f32 %v6080_v34, %v2467_v48  ;;  %v2629_v44 = vadd.f32 %v6168_v32, %v2628_v61  ;;  %v2873_v52 = vsel %vm6238_vm3, %v6161_v8, %v2869_v25  ;;  %v2648_v8 = vsel %vm6254_vm6, %v6159_v33, %v2644_v21 }
 0x2bd   : > { %v6203_v48 = vpop.eup %3876  ;;  %v3466_v41 = vmul.f32 -1.442695, %v6233_v1  ;;  %v2878_v50 = vsel %vm2875_vm8, %v2877_v56, %v2873_v52  ;;  %v2653_v30 = vsel %vm2650_vm9, %v2652_v60, %v2648_v8 }
 0x2be   : > { %v3464_v29 = vmul.f32 -1.442695, %v6180_v31  ;;  %v2911_v35 = vmul.f32 %v6203_v48, %v6175_v42  ;;  %v2633_v7 = vsel %vm6267_vm7, %v6168_v32, %v2629_v44  ;;  %v6286_v32 = vmul.f32 %v2878_v50, %v6101_v3 }
 0x2bf   : > { %v6213_v23 = vpop.eup %3878  ;;  %vm2916_vm13 = vweird.f32 %v6203_v48 }
 0x2c0   : > { %3882 = vpow2.f32 %v3464_v29  ;;  %v3881_v28 = vpop.eup %3880  ;;  %v2896_v55 = vmul.f32 %v6213_v23, %v6184_v10  ;;  %vm2901_vm14 = vweird.f32 %v6213_v23  ;;  %vm6313_vm2 = vmor %vm2915_vm11, %vm2916_vm13 }
 0x2c1   : > { %v2474_v47 = vpop.f32.mrf.mxu2  ;;  %v6258_v9 = vadd.f32 1.0, %v3881_v28  ;;  %vm6329_vm15 = vmor %vm2900_vm12, %vm2901_vm14 }
 0x2c2   : > { %v6250_v20 = vadd.f32 %v6080_v34, %v2474_v47  ;;  %v2912_v47 = vsub.f32 1.0, %v2911_v35  ;;  %v2897_v2 = vsub.f32 1.0, %v2896_v55 }
 0x2c3   : > { %3884 = vrcp.f32 %v6258_v9  ;;  %v2949_v50 = vand.u32 2147483647, %v6258_v9 }
 0x2c4   : > { %3158 = vmatpush.bf16.xpose.msra.mxu3 %v3141_v49  ;;  %v2884_v49 = vadd.f32 %v6157_v58, %v2883_v22  ;;  %v3467_v38 = vmul.f32 -1.442695, %v6250_v20  ;;  %v2638_v22 = vsel %vm2635_vm10, %v2637_v26, %v2633_v7  ;;  %v2913_v29 = vmul.f32 %v6203_v48, %v2912_v47 }
 0x2c5   : > { %3886 = vpow2.f32 %v3466_v41  ;;  %v2898_v17 = vmul.f32 %v6213_v23, %v2897_v2  ;;  %v3105_v45 = vmul.f32 %v2638_v22, %v6109_v11  ;;  %v2919_v11 = vand.u32 2147483647, %v6175_v42 }
 0x2c6   : > { %v2888_v39 = vsel %vm6217_vm0, %v6157_v58, %v2884_v49  ;;  %v3883_v6 = vpop.eup %3882  ;;  %vm2905_vm0 = vcmp.eq.f32.partialorder %v2904_v57, 8.507059e+37  ;;  %vm2950_vm9 = vcmp.eq.f32.partialorder %v2949_v50, 8.507059e+37 }
 0x2c7   : > { %v6275_v18 = vadd.f32 1.0, %v3883_v6  ;;  %v2899_v26 = vadd.f32 %v6213_v23, %v2898_v17  ;;  %vm2920_vm1 = vcmp.eq.f32.partialorder %v2919_v11, 8.507059e+37 }
 0x2c9   : > { %v6198_v54 = vpop.f32.mrf.mxu2  ;;  %3888 = vrcp.f32 %v6275_v18  ;;  %v6299_v3 = vpop.eup %3884  ;;  %v2936_v2 = vand.u32 2147483648, %v6275_v18  ;;  %vm2930_vm7 = vweird.f32 %v6275_v18 }
 0x2ca   : > { %3890 = vpow2.f32 %v3467_v38  ;;  %v2941_v12 = vmul.f32 %v6299_v3, %v6258_v9  ;;  %v6325_v21 = vadd.f32 %v6080_v34, %v6198_v54  ;;  %vm2946_vm3 = vweird.f32 %v6299_v3 }
 0x2cb   : > { %v3887_v0 = vpop.eup %3886 }
 0x2cc   : > { %3159 = vmatpush.bf16.xpose.msra.mxu3 %v3140_v36  ;;  %v2892_v36 = vor.u32 1.1754944e-38, %v2891_v37  ;;  %v2906_v37 = vand.u32 2147483648, %v6184_v10  ;;  %v6333_v40 = vadd.f32 1.0, %v3887_v0  ;;  %v2903_v10 = vsel %vm6329_vm15, %v6213_v23, %v2899_v26 }
 0x2cd   : > { %v2942_v24 = vsub.f32 1.0, %v2941_v12  ;;  %v3468_v23 = vmul.f32 -1.442695, %v6325_v21 }
 0x2ce   : > { %v2893_v27 = vsel %vm2890_vm5, %v2892_v36, %v2888_v39  ;;  %v2907_v39 = vor.u32 1.1754944e-38, %v2906_v37  ;;  %v6348_v36 = vld [vmem:[%s6628_s9] sm:$0xf]  ;;  %3892 = vrcp.f32 %v6333_v40  ;;  %vm2945_vm5 = vweird.f32 %v6258_v9 }
 0x2cf   : > { %v6278_v33 = vmul.f32 %v2893_v27, %v6083_v13  ;;  %v3106_v13 = vmul.f32 %v2653_v30, %v6046_v53  ;;  %v2921_v53 = vand.u32 2147483648, %v6175_v42  ;;  %v6309_v61 = vpop.eup %3888  ;;  %v2943_v56 = vmul.f32 %v6299_v3, %v2942_v24  ;;  %vm2947_vm6 = vmor %vm2945_vm5, %vm2946_vm3 }
 0x2d0   : > { %v3891_v16 = vpop.eup %3890  ;;  %v2908_v6 = vsel %vm2905_vm0, %v2907_v39, %v2903_v10  ;;  %vm2931_vm4 = vweird.f32 %v6309_v61  ;;  %v2934_v30 = vand.u32 2147483647, %v6275_v18  ;;  %vm2960_vm12 = vweird.f32 %v6333_v40 }
 0x2d1   : > { %v2479_v5 = vpop.f32.mrf.mxu2  ;;  %v3146_v4 = vpack.c.bf16 %v6278_v33, %v6286_v32  ;;  %v3138_v14 = vpack.c.bf16 %v3106_v13, %v3105_v45  ;;  %v2922_v28 = vor.u32 1.1754944e-38, %v2921_v53  ;;  %v6341_v44 = vadd.f32 1.0, %v3891_v16  ;;  %vm2932_vm8 = vmor %vm2930_vm7, %vm2931_vm4 }
 0x2d2   : > { %v6307_v49 = vadd.f32 %v6080_v34, %v2479_v5  ;;  %v6358_v58 = vmul.f32 %v2908_v6, %v6145_v15  ;;  %v2944_v47 = vadd.f32 %v6299_v3, %v2943_v56  ;;  %v2951_v15 = vand.u32 2147483648, %v6258_v9 }
 0x2d3   : > { %vm2935_vm10 = vcmp.eq.f32.partialorder %v2934_v30, 8.507059e+37  ;;  %v2981_v24 = vand.u32 2147483648, %v6341_v44  ;;  %vm2975_vm11 = vweird.f32 %v6341_v44  ;;  %v2964_v56 = vand.u32 2147483647, %v6333_v40 }
 0x2d4   : > { %3160 = vmatpush.bf16.xpose.msra.mxu3 %v3139_v62  ;;  %v2914_v62 = vadd.f32 %v6203_v48, %v2913_v29  ;;  %v3469_v54 = vmul.f32 -1.442695, %v6307_v49  ;;  %v6364_v8 = vpop.eup %3892  ;;  %v2948_v22 = vsel %vm2947_vm6, %v6299_v3, %v2944_v47  ;;  %v2952_v13 = vor.u32 1.1754944e-38, %v2951_v15 }
 0x2d5   : > { %v2956_v17 = vmul.f32 %v6364_v8, %v6333_v40  ;;  %vm2961_vm13 = vweird.f32 %v6364_v8  ;;  %vm2965_vm0 = vcmp.eq.f32.partialorder %v2964_v56, 8.507059e+37 }
 0x2d6   : > { %v2918_v42 = vsel %vm6313_vm2, %v6203_v48, %v2914_v62  ;;  %v2926_v48 = vmul.f32 %v6309_v61, %v6275_v18  ;;  %3894 = vpow2.f32 %v3469_v54  ;;  %v2937_v62 = vor.u32 1.1754944e-38, %v2936_v2  ;;  %vm6446_vm15 = vmor %vm2960_vm12, %vm2961_vm13 }
 0x2d7   : > { %v2923_v35 = vsel %vm2920_vm1, %v2922_v28, %v2918_v42  ;;  %3896 = vrcp.f32 %v6341_v44  ;;  %v2953_v53 = vsel %vm2950_vm9, %v2952_v13, %v2948_v22  ;;  %v2957_v26 = vsub.f32 1.0, %v2956_v17 }
 0x2d8   : > { %v6353_v52 = vmul.f32 %v2923_v35, %v6136_v43  ;;  %v2927_v55 = vsub.f32 1.0, %v2926_v48  ;;  %3898 = vpow2.f32 %v3468_v23 }
 0x2d9   : > { %v6295_v63 = vpop.f32.mrf.mxu2  ;;  %v2958_v42 = vmul.f32 %v6364_v8, %v2957_v26 }
 0x2da   : > { %v2928_v27 = vmul.f32 %v6309_v61, %v2927_v55  ;;  %v3147_v5 = vpack.c.bf16 %v6353_v52, %v6358_v58  ;;  %v6409_v12 = vadd.f32 %v6080_v34, %v6295_v63 }
 0x2db   : > { %v2959_v35 = vadd.f32 %v6364_v8, %v2958_v42 }
 0x2dc   : > { %3161 = vmatpush.bf16.xpose.msra.mxu3 %v3138_v14  ;;  %v3895_v46 = vpop.eup %3894  ;;  %v2929_v7 = vadd.f32 %v6309_v61, %v2928_v27  ;;  %v3470_v23 = vmul.f32 -1.442695, %v6409_v12 }
 0x2dd   : > { %v6368_v41 = vpop.eup %3896  ;;  %v6376_v38 = vadd.f32 1.0, %v3895_v46 }
 0x2de   : > { %v3899_v60 = vpop.eup %3898  ;;  %v2971_v29 = vmul.f32 %v6368_v41, %v6341_v44  ;;  %v2933_v45 = vsel %vm2932_vm8, %v6309_v61, %v2929_v7  ;;  %v6397_v61 = vmul.f32 %v2953_v53, %v6173_v51  ;;  %vm2976_vm14 = vweird.f32 %v6368_v41 }
 0x2df   : > { %v6385_v9 = vadd.f32 1.0, %v3899_v60  ;;  %3900 = vrcp.f32 %v6376_v38  ;;  %v2938_v0 = vsel %vm2935_vm10, %v2937_v62, %v2933_v45  ;;  %vm6439_vm2 = vmor %vm2975_vm11, %vm2976_vm14  ;;  %v2982_v60 = vor.u32 1.1754944e-38, %v2981_v24 }
 0x2e0   : > { %v2972_v3 = vsub.f32 1.0, %v2971_v29  ;;  %v6401_v25 = vmul.f32 %v2938_v0, %v6180_v31  ;;  %v2966_v31 = vand.u32 2147483648, %v6333_v40  ;;  %v2963_v40 = vsel %vm6446_vm15, %v6364_v8, %v2959_v35 }
 0x2e1   : > { %v6343_v19 = vpop.f32.mrf.mxu2  ;;  %3902 = vrcp.f32 %v6385_v9  ;;  %vm3005_vm5 = vweird.f32 %v6376_v38  ;;  %vm2990_vm7 = vweird.f32 %v6385_v9 }
 0x2e2   : > { %v2973_v16 = vmul.f32 %v6368_v41, %v2972_v3  ;;  %v3148_v51 = vpack.c.bf16 %v6397_v61, %v6401_v25  ;;  %v6420_v10 = vadd.f32 %v6080_v34, %v6343_v19  ;;  %v2979_v19 = vand.u32 2147483647, %v6341_v44 }
 0x2e3   : > { %3162 = vmatmul.bf16.vlgmr.msra.gmra.mxu3 %v6348_v36  ;;  %v2967_v7 = vor.u32 1.1754944e-38, %v2966_v31  ;;  %v2996_v31 = vand.u32 2147483648, %v6385_v9  ;;  %v3195_v25 = vlaneseq }
 0x2e4   : > { %v2974_v63 = vadd.f32 %v6368_v41, %v2973_v16  ;;  %vm2980_vm1 = vcmp.eq.f32.partialorder %v2979_v19, 8.507059e+37  ;;  %v3011_v16 = vand.u32 2147483648, %v6376_v38 }
 0x2e5   : > { %v6404_v57 = vpop.eup %3900  ;;  %v2968_v13 = vsel %vm2965_vm0, %v2967_v7, %v2963_v40 }
 0x2e6   : > { %v3001_v54 = vmul.f32 %v6404_v57, %v6376_v38  ;;  %v2978_v47 = vsel %vm6439_vm2, %v6368_v41, %v2974_v63  ;;  %v6470_v0 = vmul.f32 %v2968_v13, %v6233_v1  ;;  %vm3006_vm4 = vweird.f32 %v6404_v57 }
 0x2e7   : > { %v6414_v28 = vpop.eup %3902  ;;  %v2983_v30 = vsel %vm2980_vm1, %v2982_v60, %v2978_v47  ;;  %vm3007_vm6 = vmor %vm3005_vm5, %vm3006_vm4  ;;  %v3012_v35 = vor.u32 1.1754944e-38, %v3011_v16 }
 0x2e8   : > { %v2986_v6 = vmul.f32 %v6414_v28, %v6385_v9  ;;  %v3002_v15 = vsub.f32 1.0, %v3001_v54  ;;  %v6463_v8 = vmul.f32 %v2983_v30, %v6250_v20  ;;  %vm2991_vm3 = vweird.f32 %v6414_v28 }
 0x2e9   : > { %v2487_v43 = vpop.f32.mrf.mxu2  ;;  %vm2992_vm8 = vmor %vm2990_vm7, %vm2991_vm3 }
 0x2ea   : > { %v6394_v11 = vadd.f32 %v6080_v34, %v2487_v43  ;;  %v3471_v43 = vmul.f32 -1.442695, %v6420_v10  ;;  %v2987_v50 = vsub.f32 1.0, %v2986_v6  ;;  %v3003_v41 = vmul.f32 %v6404_v57, %v3002_v15 }
 0x2eb   : > { %v2997_v6 = vor.u32 1.1754944e-38, %v2996_v31 }
 0x2ec   : > { %v3472_v59 = vmul.f32 -1.442695, %v6394_v11  ;;  %v2988_v62 = vmul.f32 %v6414_v28, %v2987_v50 }
 0x2ee   : > { %v2989_v1 = vadd.f32 %v6414_v28, %v2988_v62 }
 0x2f1   : > { %v2489_v18 = vpop.f32.mrf.mxu2 }
 0x2f2   : > { %v6390_v14 = vadd.f32 %v6080_v34, %v2489_v18 }
 0x2f4   : > { %v3473_v37 = vmul.f32 -1.442695, %v6390_v14 }
 0x2f6   : > { %3904 = vpow2.f32 %v3473_v37  ;;  %v3009_v37 = vand.u32 2147483647, %v6376_v38 }
 0x2f7   : > { %3906 = vpow2.f32 %v3472_v59  ;;  %v3149_v59 = vpack.c.bf16 %v6463_v8, %v6470_v0 }
 0x2f8   : > { %vm3010_vm9 = vcmp.eq.f32.partialorder %v3009_v37, 8.507059e+37 }
 0x2f9   : > { %v2492_v48 = vpop.f32.mrf.mxu2 }
 0x2fa   : > { %v6427_v39 = vadd.f32 %v6080_v34, %v2492_v48  ;;  %v2994_v48 = vand.u32 2147483647, %v6385_v9 }
 0x2fc   : > { %v3474_v55 = vmul.f32 -1.442695, %v6427_v39  ;;  %v3905_v46 = vpop.eup %3904  ;;  %vm2995_vm10 = vcmp.eq.f32.partialorder %v2994_v48, 8.507059e+37 }
 0x2fd   : > { %v3907_v2 = vpop.eup %3906  ;;  %v6456_v22 = vadd.f32 1.0, %v3905_v46 }
 0x2fe   : > { %3908 = vpow2.f32 %v3474_v55  ;;  %v6466_v53 = vadd.f32 1.0, %v3907_v2 }
 0x2ff   : > { %3910 = vpow2.f32 %v3470_v23  ;;  %v2993_v23 = vsel %vm2992_vm8, %v6414_v28, %v2989_v1  ;;  %vm3065_vm3 = vweird.f32 %v6456_v22 }
 0x300   : > { %3912 = vpow2.f32 %v3471_v43  ;;  %v2998_v27 = vsel %vm2995_vm10, %v2997_v6, %v2993_v23 }
 0x301   : > { %v2494_v29 = vpop.f32.mrf.mxu2  ;;  %3914 = vrcp.f32 %v6456_v22  ;;  %v6514_v15 = vmul.f32 %v2998_v27, %v6325_v21  ;;  %v3054_v27 = vand.u32 2147483647, %v6466_v53 }
 0x302   : > { %v6460_v17 = vadd.f32 %v6080_v34, %v2494_v29  ;;  %v3004_v34 = vadd.f32 %v6404_v57, %v3003_v41 }
 0x304   : > { %v3909_v45 = vpop.eup %3908  ;;  %v3475_v18 = vmul.f32 -1.442695, %v6460_v17  ;;  %v3008_v38 = vsel %vm3007_vm6, %v6404_v57, %v3004_v34  ;;  %vm3050_vm6 = vweird.f32 %v6466_v53 }
 0x305   : > { %v3911_v3 = vpop.eup %3910  ;;  %v6473_v26 = vadd.f32 1.0, %v3909_v45  ;;  %v3013_v55 = vsel %vm3010_vm9, %v3012_v35, %v3008_v38 }
 0x306   : > { %3916 = vpow2.f32 %v3475_v18  ;;  %v3913_v20 = vpop.eup %3912  ;;  %v6483_v42 = vadd.f32 1.0, %v3911_v3  ;;  %v6505_v43 = vmul.f32 %v3013_v55, %v6307_v49  ;;  %v3069_v55 = vand.u32 2147483647, %v6456_v22 }
 0x307   : > { %3918 = vrcp.f32 %v6473_v26  ;;  %v6492_v63 = vadd.f32 1.0, %v3913_v20  ;;  %v6494_v54 = vpop.eup %3914  ;;  %v3086_v21 = vand.u32 2147483648, %v6473_v26  ;;  %vm3080_vm14 = vweird.f32 %v6473_v26 }
 0x308   : > { %3920 = vrcp.f32 %v6466_v53  ;;  %v3061_v28 = vmul.f32 %v6494_v54, %v6456_v22  ;;  %v3150_v49 = vpack.c.bf16 %v6505_v43, %v6514_v15  ;;  %v3084_v62 = vand.u32 2147483647, %v6473_v26 }
 0x309   : > { %3922 = vrcp.f32 %v6483_v42  ;;  %vm3066_vm15 = vweird.f32 %v6494_v54  ;;  %vm3070_vm9 = vcmp.eq.f32.partialorder %v3069_v55, 8.507059e+37 }
 0x30a   : > { %3924 = vrcp.f32 %v6492_v63  ;;  %v3062_v7 = vsub.f32 1.0, %v3061_v28  ;;  %vm3085_vm1 = vcmp.eq.f32.partialorder %v3084_v62, 8.507059e+37  ;;  %v3056_v28 = vand.u32 2147483648, %v6466_v53  ;;  %vm3067_vm7 = vmor %vm3065_vm3, %vm3066_vm15 }
 0x30b   : > { %vm3192_vm3 = vcmask 1040384  }
 0x30c   : > { %v3917_v24 = vpop.eup %3916  ;;  %v3063_v45 = vmul.f32 %v6494_v54, %v3062_v7 }
 0x30d   : > { %v3919_v19 = vpop.eup %3918  ;;  %v2624_v9 = vadd.f32 1.0, %v3917_v24  ;;  %v3071_v24 = vand.u32 2147483648, %v6456_v22 }
 0x30e   : > { %v6500_v56 = vpop.eup %3920  ;;  %v3076_v57 = vmul.f32 %v3919_v19, %v6473_v26  ;;  %vm3081_vm13 = vweird.f32 %v3919_v19  ;;  %v3087_v26 = vor.u32 1.1754944e-38, %v3086_v21  ;;  %v3064_v38 = vadd.f32 %v6494_v54, %v3063_v45 }
 0x30f   : > { %3926 = vrcp.f32 %v2624_v9  ;;  %v3046_v44 = vmul.f32 %v6500_v56, %v6466_v53  ;;  %v6511_v47 = vpop.eup %3922  ;;  %vm6529_vm11 = vmor %vm3080_vm14, %vm3081_vm13  ;;  %v3101_v37 = vand.u32 2147483648, %v2624_v9  ;;  %v3099_v31 = vand.u32 2147483647, %v2624_v9 }
 0x310   : > { %v3077_v46 = vsub.f32 1.0, %v3076_v57  ;;  %v6516_v60 = vpop.eup %3924  ;;  %v3016_v2 = vmul.f32 %v6511_v47, %v6483_v42  ;;  %vm3051_vm2 = vweird.f32 %v6500_v56  ;;  %vm3095_vm0 = vweird.f32 %v2624_v9 }
 0x311   : > { %v3047_v30 = vsub.f32 1.0, %v3046_v44  ;;  %v3031_v41 = vmul.f32 %v6516_v60, %v6492_v63  ;;  %vm3100_vm5 = vcmp.eq.f32.partialorder %v3099_v31, 8.507059e+37  ;;  %v3068_v44 = vsel %vm3067_vm7, %v6494_v54, %v3064_v38  ;;  %vm3052_vm8 = vmor %vm3050_vm6, %vm3051_vm2 }
 0x312   : > { %v3078_v40 = vmul.f32 %v3919_v19, %v3077_v46  ;;  %v3017_v3 = vsub.f32 1.0, %v3016_v2  ;;  %v3072_v7 = vor.u32 1.1754944e-38, %v3071_v24  ;;  %vm3036_vm10 = vweird.f32 %v6516_v60 }
 0x313   : > { %v3048_v34 = vmul.f32 %v6500_v56, %v3047_v30  ;;  %v3032_v48 = vsub.f32 1.0, %v3031_v41  ;;  %v3057_v30 = vor.u32 1.1754944e-38, %v3056_v28  ;;  %vm3055_vm13 = vcmp.eq.f32.partialorder %v3054_v27, 8.507059e+37 }
 0x314   : > { %v3079_v29 = vadd.f32 %v3919_v19, %v3078_v40  ;;  %vm3021_vm14 = vweird.f32 %v6511_v47  ;;  %v3026_v21 = vand.u32 2147483648, %v6483_v42  ;;  %vm3020_vm2 = vweird.f32 %v6483_v42 }
 0x315   : > { %v3927_v50 = vpop.eup %3926  ;;  %v3049_v6 = vadd.f32 %v6500_v56, %v3048_v34  ;;  %v3033_v46 = vmul.f32 %v6516_v60, %v3032_v48  ;;  %v3024_v45 = vand.u32 2147483647, %v6483_v42  ;;  %vm3022_vm15 = vmor %vm3020_vm2, %vm3021_vm14 }
 0x316   : > { %v3091_v13 = vmul.f32 %v3927_v50, %v2624_v9  ;;  %v3083_v16 = vsel %vm6529_vm11, %v3919_v19, %v3079_v29  ;;  %vm3096_vm12 = vweird.f32 %v3927_v50  ;;  %v3102_v19 = vor.u32 1.1754944e-38, %v3101_v37 }
 0x317   : > { %v3088_v23 = vsel %vm3085_vm1, %v3087_v26, %v3083_v16  ;;  %vm3097_vm4 = vmor %vm3095_vm0, %vm3096_vm12  ;;  %v3053_v53 = vsel %vm3052_vm8, %v6500_v56, %v3049_v6  ;;  %v3073_v29 = vsel %vm3070_vm9, %v3072_v7, %v3068_v44  ;;  %vm3035_vm11 = vweird.f32 %v6492_v63 }
 0x318   : > { %v3092_v18 = vsub.f32 1.0, %v3091_v13  ;;  %v3135_v40 = vmul.f32 %v3088_v23, %v6427_v39  ;;  %v3034_v13 = vadd.f32 %v6516_v60, %v3033_v46  ;;  %v3041_v39 = vand.u32 2147483648, %v6492_v63  ;;  %vm3037_vm12 = vmor %vm3035_vm11, %vm3036_vm10 }
 0x319   : > { %v3039_v56 = vand.u32 2147483647, %v6492_v63  ;;  %v3134_v41 = vmul.f32 %v3073_v29, %v6390_v14  ;;  %v3027_v63 = vor.u32 1.1754944e-38, %v3026_v21  ;;  %vm3025_vm0 = vcmp.eq.f32.partialorder %v3024_v45, 8.507059e+37 }
 0x31a   : > { %v3093_v1 = vmul.f32 %v3927_v50, %v3092_v18  ;;  %v3038_v62 = vsel %vm3037_vm12, %v6516_v60, %v3034_v13 }
 0x31b   : > { %vm3040_vm1 = vcmp.eq.f32.partialorder %v3039_v56, 8.507059e+37 }
 0x31c   : > { %v3094_v35 = vadd.f32 %v3927_v50, %v3093_v1 }
 0x31e   : > { %v3098_v57 = vsel %vm3097_vm4, %v3927_v50, %v3094_v35  ;;  %v3018_v50 = vmul.f32 %v6511_v47, %v3017_v3  ;;  %v3042_v3 = vor.u32 1.1754944e-38, %v3041_v39  ;;  %vm3197_vm4 = vcmp.lt.s32.totalorder %v3195_v25, 256 }
 0x31f   : > { %v3103_v9 = vsel %vm3100_vm5, %v3102_v19, %v3098_v57 }
 0x320   : > { %v3136_v22 = vmul.f32 %v3103_v9, %v6460_v17  ;;  %v3058_v17 = vsel %vm3055_vm13, %v3057_v30, %v3053_v53  ;;  %v3019_v54 = vadd.f32 %v6511_v47, %v3018_v50  ;;  %v3043_v37 = vsel %vm3040_vm1, %v3042_v3, %v3038_v62 }
 0x321   : > { %v3133_v18 = vmul.f32 %v3058_v17, %v6394_v11  ;;  %v3132_v16 = vmul.f32 %v3043_v37, %v6420_v10  ;;  %v3184_v10 = vpop.permute.xlu2 %3183 }
 0x322   : > { %v3153_v2 = vpack.c.bf16 %v3136_v22, %v3135_v40  ;;  %v3023_v34 = vsel %vm3022_vm15, %v6511_v47, %v3019_v54  ;;  %v3186_v61 = vperm.slane %v3184_v10, 0 }
 0x323   : > { %v3152_v20 = vpack.c.bf16 %v3134_v41, %v3133_v18  ;;  %v3028_v14 = vsel %vm3025_vm0, %v3027_v63, %v3023_v34 }
 0x324   : > { %3167 = vmatpush.bf16.xpose.msrb.mxu3 %v3153_v2  ;;  %v3131_v42 = vmul.f32 %v3028_v14, %v6409_v12 }
 0x326   : > { %v3151_v60 = vpack.c.bf16 %v3132_v16, %v3131_v42 }
 0x32c   : > { %3168 = vmatpush.bf16.xpose.msrb.mxu3 %v3152_v20 }
 0x334   : > { %3169 = vmatpush.bf16.xpose.msrb.mxu3 %v3151_v60 }
 0x33c   : > { %3170 = vmatpush.bf16.xpose.msrb.mxu3 %v3150_v49 }
 0x344   : > { %3171 = vmatpush.bf16.xpose.msrb.mxu3 %v3149_v59 }
 0x34c   : > { %3172 = vmatpush.bf16.xpose.msrb.mxu3 %v3148_v51 }
 0x354   : > { %3173 = vmatpush.bf16.xpose.msrb.mxu3 %v3147_v5 }
 0x35c   : > { %3174 = vmatpush.bf16.xpose.msrb.mxu3 %v3146_v4 }
 0x363   : > { %3175 = vmatmul.bf16.vlgmr.msrb.gmra.mxu3 %v6348_v36 }
 0x366   : > { %v3163_v11 = vpop.f32.mrf.mxu3 }
 0x367   : > { %v3187_v33 = vadd.f32 %v3186_v61, %v3163_v11 }
 0x36e   : > { %v3165_v12 = vpop.f32.mrf.mxu3 }
 0x3e6   : > { %v3176_v52 = vpop.f32.mrf.mxu3 }
 0x3e7   : > { %v3188_v58 = vadd.f32 %v3186_v61, %v3176_v52 }
 0x3e9   : > { %v3191_v32 = vrot.slane %v3188_v58, 7 }
 0x3eb   : > { %v3193_v4 = vsel %vm3192_vm3, %v3187_v33, %v3191_v32 }
 0x3ec   : > { %3199 = vst.msk [vmem:[%s398_s14] sm:$0x3] %vm3197_vm4, %v3193_v4 }
 0x3ed   : > { %3960 = shalt.err (!%p3957_p3)
}
 0x3ee   : > { %3497 = dma.vmem_to_hbm [thread:$0]  (%p4099_p5), %s3214_s15, 32, %s3216_s16, %s3201_s10   ;;  %v3178_v36 = vpop.f32.mrf.mxu3 }
 0x3ef PF: > { %p3503_p4 = scmp.ge.s32.totalorder %s3995_s22, 2  ;;  %s3227_s23 = sand.u32 1, %s3983_s19  }
 0x3f0   : > { %s3228_s14 = scalar_lea.sflag [#allocation4], %s3227_s23 }
 0x3f1   : > { %p3500_p7 = pnand %p3503_p4, %p4103_p6 }
 0x3f3   : > { %p3501_p8 = pneg %p3500_p7 }
 0x3f5   : > { %3978 = dma.done.wait (%p3501_p8), %s3228_s14, 32  }
 0x3f6   : > { %3980 = vsyncadd (%p3501_p8), %s3228_s14, 4294967264  ;;  %p23_p9 = scmp.ge.s32.totalorder %s4086_s24, 4   ;;  %s6767_s19 = smov %s3987_s20 }
 0x3f7   : > { %s6768_s20 = smov %s3991_s21  ;;  %s6769_s21 = smov %s4097_s27 }
 0x3f8   : > { %s6770_s22 = smov %s4086_s24  ;;  %25 = sbr.rel (!%p23_p9) target bundleno = 6 (0x6), region = 102 }
 0x3fd   :  { %3234 = vsyncpa [#allocation4], 1 }
 0x3fe   :  { %3236 = vsyncpa [#allocation4 + $0x1], 1 }

</bundles_post_ra>
